<compile_context>
chip_gen: v7x
topology: tpu7x:2x2x1
jax: 0.10.0
libtpu: 0.0.40
codegen_flags: <defaults>
</compile_context>

<pallas_src>
import jax
import jax.numpy as jnp
from jax import lax
from jax.experimental import pallas as pl
from jax.experimental.pallas import tpu as pltpu


def _head_kernel(x_ref, wconv_ref, bconv_ref, wih_ref, whh_ref, blstm_ref,
                 wfc_ref, bfc_ref, out_ref, xg_ref, hseq_ref, lstm_ref):
    """Grid = (batch-block index, vocab-tile index).

    x_ref    : (Bblk*L, D)      bf16  encoder hidden states (rows = bb*L + t, batch-major)
    wconv_ref: (3, D, C)        bf16  conv taps, wconv[k] == torch_conv_weight[:, :, k].T
    bconv_ref: (1, C)           f32
    wih_ref  : (C, 4H)          bf16  == torch W_ih.T
    whh_ref  : (H, 4H)          bf16  == torch W_hh.T
    blstm_ref: (1, 4H)          f32   == b_ih + b_hh
    wfc_ref  : (H, TILE_V)      bf16  vocab tile of torch fc.weight.T
    bfc_ref  : (1, TILE_V)      f32
    out_ref  : (Bblk*L, TILE_V) bf16  (rows batch-major: row = bb*L + t)
    xg_ref   : VMEM (L, Bblk, 4H) f32  time-major hoisted input projection (+ bias)
    hseq_ref : VMEM (L, Bblk, H)  f32  time-major LSTM hidden-state sequence
    lstm_ref : VMEM (Bblk*L, H)   bf16 batch-major LSTM output, reused across vocab tiles
    """
    L, bblk, _ = xg_ref.shape
    H = whh_ref.shape[0]
    C = wconv_ref.shape[2]
    N = bblk * L

    v_idx = pl.program_id(1)

    # Conv + LSTM depend only on the batch block -> compute once per batch block (vocab tile 0)
    # and keep results in persistent VMEM scratch for the remaining vocab tiles.
    @pl.when(v_idx == 0)
    def _compute_lstm():
        x2d = x_ref[...]                                             # (N, D) bf16
        w0 = wconv_ref[0]
        w1 = wconv_ref[1]
        w2 = wconv_ref[2]

        # Conv1d(k=3, pad=1): one big batched matmul per tap (full MXU utilization).
        y0 = jnp.dot(x2d, w0, preferred_element_type=jnp.float32)    # tap seen by x[t-1]
        y1 = jnp.dot(x2d, w1, preferred_element_type=jnp.float32)    # center tap
        y2 = jnp.dot(x2d, w2, preferred_element_type=jnp.float32)    # tap seen by x[t+1]

        # Shift by +/- 1 row and zero the rows that would cross a batch boundary in the block.
        # (pltpu.roll on the sublane axis is the XLU alternative to the concatenates.)
        zrow = jnp.zeros((1, C), jnp.float32)
        prev = jnp.concatenate([zrow, y0[:-1]], axis=0)              # row r gets y0[r-1]
        nxt = jnp.concatenate([y2[1:], zrow], axis=0)                # row r gets y2[r+1]
        t_idx = lax.broadcasted_iota(jnp.int32, (N, 1), 0) % L
        prev = jnp.where(t_idx == 0, 0.0, prev)
        nxt = jnp.where(t_idx == L - 1, 0.0, nxt)
        conv = jnp.maximum(prev + y1 + nxt + bconv_ref[...], 0.0)    # (N, C) f32, ReLU

        # Hoisted LSTM input projection xg = conv @ W_ih + b (one big matmul), then re-laid
        # out time-major ONCE so the recurrence reads a single aligned tile per step.
        xg_bm = (jnp.dot(conv.astype(jnp.bfloat16), wih_ref[...],
                         preferred_element_type=jnp.float32) + blstm_ref[...])  # (N, 4H)
        for bb in range(bblk):                                       # static, once per block
            xg_ref[:, bb, :] = xg_bm[bb * L:(bb + 1) * L, :]

        whh = whh_ref[...]

        # LSTM recurrence, batched over the batch block. PyTorch gate order: i, f, g, o.
        def step(t, carry):
            h, c = carry
            gates = xg_ref[t] + jnp.dot(h.astype(jnp.bfloat16), whh,
                                        preferred_element_type=jnp.float32)   # (Bblk, 4H)
            i_g = jax.nn.sigmoid(gates[:, 0 * H:1 * H])
            f_g = jax.nn.sigmoid(gates[:, 1 * H:2 * H])
            g_g = jnp.tanh(gates[:, 2 * H:3 * H])
            o_g = jax.nn.sigmoid(gates[:, 3 * H:4 * H])
            c = f_g * c + i_g * g_g
            h = o_g * jnp.tanh(c)
            hseq_ref[t] = h                                          # one aligned store
            return (h, c)

        h0 = jnp.zeros((bblk, H), jnp.float32)
        c0 = jnp.zeros((bblk, H), jnp.float32)
        lax.fori_loop(0, L, step, (h0, c0))

        # Re-layout the hidden sequence batch-major and cast to bf16 ONCE; reused by every
        # vocab tile of this batch block (no per-tile cast of the whole sequence).
        for bb in range(bblk):                                       # static, once per block
            lstm_ref[bb * L:(bb + 1) * L, :] = hseq_ref[:, bb, :].astype(jnp.bfloat16)

    # Final Linear(H -> V), one lane-dense vocab tile per grid step; bf16 output halves the
    # dominant HBM-write phase.
    logits = jnp.dot(lstm_ref[...], wfc_ref[...],
                     preferred_element_type=jnp.float32) + bfc_ref[...]
    out_ref[...] = logits.astype(out_ref.dtype)


def enhanced_head_forward(hidden_states, params, *, batch_block=None, vocab_tile=None,
                          out_dtype=jnp.bfloat16):
    """hidden_states: (B, L, D) float32 == outputs.encoder_last_hidden_state."""
    B, L, D = hidden_states.shape
    wconv, bconv, wih, whh, blstm, wfc, bfc = params
    C = wconv.shape[2]
    H = whh.shape[0]
    V = wfc.shape[1]

    # --- tile defaults -------------------------------------------------------------------
    # >= 2 batch blocks when possible so v7x's two TensorCores both get work; larger
    # batch_block fattens the recurrent (Bblk,H)@(H,4H) matmul on v5e/v6e, VMEM permitting.
    if batch_block is None:
        batch_block = 1 if B <= 1 else max(1, min(8, B // 2))
        while B % batch_block:
            batch_block -= 1
    assert B % batch_block == 0, "B must be divisible by batch_block"
    n_b = B // batch_block

    out_itemsize = jnp.dtype(out_dtype).itemsize
    if vocab_tile is None:
        # keep the double-buffered out block around <= 2 MiB per buffer; lane-dense (mult of 128)
        cap = max(128, (2 * 1024 * 1024) // max(1, batch_block * L * out_itemsize))
        cap = max(128, (cap // 128) * 128)
        vocab_tile = min(cap, 2048, pl.cdiv(V, 128) * 128)
    assert vocab_tile % 128 == 0, "vocab_tile must be lane-dense (multiple of 128)"

    # Real BART vocab (50264) is not a multiple of 128 -> pad the fc weight/bias and slice back.
    V_pad = pl.cdiv(V, vocab_tile) * vocab_tile
    if V_pad != V:
        wfc = jnp.pad(wfc, ((0, 0), (0, V_pad - V)))
        bfc = jnp.pad(bfc, ((0, 0), (0, V_pad - V)))
    n_v = V_pad // vocab_tile
    grid = (n_b, n_v)

    # Flatten + cast the input in the wrapper: halves the input DMA, and the (B*L, D) view of
    # a contiguous (B, L, D) array is free.  Kernel rows are batch-major (row = b*L + t).
    x2d = hidden_states.reshape(B * L, D).astype(jnp.bfloat16)

    # --- explicit VMEM budget (feedback: default scoped limit is too small for real shapes) --
    vmem = 0
    vmem += 2 * batch_block * L * D * 2                         # x block (bf16, double-buffered)
    vmem += 2 * (3 * D * C + C * 4 * H + H * 4 * H) * 2         # conv / W_ih / W_hh (bf16)
    vmem += 2 * (C + 8 * H) * 4                                 # small biases (f32)
    vmem += 2 * (H * vocab_tile * 2 + vocab_tile * 4)           # fc tile + bias
    vmem += 2 * batch_block * L * vocab_tile * out_itemsize     # out block (double-buffered)
    vmem += batch_block * L * 4 * H * 4                         # xg scratch (f32, time-major)
    vmem += batch_block * L * H * 4                             # h-sequence scratch (f32)
    vmem += batch_block * L * H * 2                             # batch-major bf16 LSTM scratch
    # TODO(synk): on v7x (64 MiB VMEM) with L=1024 prefer a bf16 xg scratch / smaller batch_block.
    vmem_limit = int(min(64 * 1024 * 1024, max(16 * 1024 * 1024, int(vmem * 1.3))))

    in_specs = [
        pl.BlockSpec((batch_block * L, D), lambda b, v: (b, 0)),
        pl.BlockSpec((3, D, C),            lambda b, v: (0, 0, 0)),
        pl.BlockSpec((1, C),               lambda b, v: (0, 0)),
        pl.BlockSpec((C, 4 * H),           lambda b, v: (0, 0)),
        pl.BlockSpec((H, 4 * H),           lambda b, v: (0, 0)),
        pl.BlockSpec((1, 4 * H),           lambda b, v: (0, 0)),
        pl.BlockSpec((H, vocab_tile),      lambda b, v: (0, v)),
        pl.BlockSpec((1, vocab_tile),      lambda b, v: (0, v)),
    ]
    # Output rows are batch-major (row = global_batch * L + t) so the (B, L, V) reshape below
    # is a free, contiguous reshape and the stores are lane-dense.
    out_spec = pl.BlockSpec((batch_block * L, vocab_tile), lambda b, v: (b, v))

    flat = pl.pallas_call(
        _head_kernel,
        out_shape=jax.ShapeDtypeStruct((B * L, V_pad), out_dtype),
        grid_spec=pltpu.PrefetchScalarGridSpec(
            num_scalar_prefetch=0,
            grid=grid,
            in_specs=in_specs,
            out_specs=out_spec,
            scratch_shapes=[
                pltpu.VMEM((L, batch_block, 4 * H), jnp.float32),  # time-major xg
                pltpu.VMEM((L, batch_block, H), jnp.float32),      # time-major h sequence
                pltpu.VMEM((batch_block * L, H), jnp.bfloat16),    # batch-major bf16 LSTM out
            ],
        ),
        compiler_params=pltpu.CompilerParams(
            # batch axis parallel (megacore on v7x); vocab axis MUST stay sequential because
            # the pl.when(v==0) scratch reuse requires in-order vocab iterations per block.
            dimension_semantics=("parallel", "arbitrary"),
            vmem_limit_bytes=vmem_limit),
    )(x2d, wconv, bconv, wih, whh, blstm, wfc, bfc)

    if V_pad != V:
        flat = flat[:, :V]
    return flat.reshape(B, L, V)


def _reference_forward(hidden_states, params):
    """Pure-JAX reference of the same head (mirrors the kernel's bf16 matmul inputs)."""
    wconv, bconv, wih, whh, blstm, wfc, bfc = params
    B, L, D = hidden_states.shape
    H = whh.shape[0]

    xb = hidden_states.astype(jnp.bfloat16)
    xpad = jnp.pad(xb, ((0, 0), (1, 1), (0, 0)))
    dot = lambda a, b: jnp.einsum('bld,dc->blc', a, b, preferred_element_type=jnp.float32)
    conv = (dot(xpad[:, 0:L], wconv[0]) + dot(xpad[:, 1:L + 1], wconv[1])
            + dot(xpad[:, 2:L + 2], wconv[2]) + bconv)
    conv = jnp.maximum(conv, 0.0)

    xg = jnp.einsum('blc,cg->blg', conv.astype(jnp.bfloat16), wih,
                    preferred_element_type=jnp.float32) + blstm

    h = jnp.zeros((B, H), jnp.float32)
    c = jnp.zeros((B, H), jnp.float32)
    outs = []
    for t in range(L):
        gates = xg[:, t, :] + jnp.dot(h.astype(jnp.bfloat16), whh,
                                      preferred_element_type=jnp.float32)
        i_g = jax.nn.sigmoid(gates[:, 0 * H:1 * H])
        f_g = jax.nn.sigmoid(gates[:, 1 * H:2 * H])
        g_g = jnp.tanh(gates[:, 2 * H:3 * H])
        o_g = jax.nn.sigmoid(gates[:, 3 * H:4 * H])
        c = f_g * c + i_g * g_g
        h = o_g * jnp.tanh(c)
        outs.append(h)
    lstm_out = jnp.stack(outs, axis=1).astype(jnp.bfloat16)
    return jnp.einsum('blh,hv->blv', lstm_out, wfc,
                      preferred_element_type=jnp.float32) + bfc


def make_params(key, d_model, conv_ch, lstm_h, vocab):
    """Deterministic synthetic parameters with PyTorch-native shapes, re-laid-out for
    the kernel (matmul weights stored in bf16, biases in f32)."""
    ks = jax.random.split(key, 8)
    s = 0.05
    # torch shapes
    w_conv_t = jax.random.normal(ks[0], (conv_ch, d_model, 3), jnp.float32) * s   # (C_out, C_in, K)
    b_conv_t = jax.random.normal(ks[1], (conv_ch,), jnp.float32) * s
    w_ih_t = jax.random.normal(ks[2], (4 * lstm_h, conv_ch), jnp.float32) * s     # (4H, C)
    w_hh_t = jax.random.normal(ks[3], (4 * lstm_h, lstm_h), jnp.float32) * s      # (4H, H)
    b_ih_t = jax.random.normal(ks[4], (4 * lstm_h,), jnp.float32) * s
    b_hh_t = jax.random.normal(ks[5], (4 * lstm_h,), jnp.float32) * s
    w_fc_t = jax.random.normal(ks[6], (vocab, lstm_h), jnp.float32) * s           # (V, H)
    b_fc_t = jax.random.normal(ks[7], (vocab,), jnp.float32) * s

    # kernel layouts
    wconv = jnp.transpose(w_conv_t, (2, 1, 0)).astype(jnp.bfloat16)   # (3, D, C)
    bconv = b_conv_t.reshape(1, conv_ch)
    wih = w_ih_t.T.astype(jnp.bfloat16)                               # (C, 4H)
    whh = w_hh_t.T.astype(jnp.bfloat16)                               # (H, 4H)
    blstm = (b_ih_t + b_hh_t).reshape(1, 4 * lstm_h)
    wfc = w_fc_t.T.astype(jnp.bfloat16)                               # (H, V)
    bfc = b_fc_t.reshape(1, vocab)
    return (wconv, bconv, wih, whh, blstm, wfc, bfc)


if __name__ == "__main__":
    # Small shapes consistent with the module's forward:
    #   batch=4, seq=8, d_model=64 (stand-in for 1024), conv_out=512, lstm_hidden=256,
    #   vocab=256 (stand-in for 50264).  batch_block=2 and vocab_tile=128 exercise both
    #   grid axes (2 x 2 grid), including the scratch reuse across vocab tiles and the
    #   megacore-friendly (>=2 batch blocks) layout.
    B, L, D = 4, 8, 64
    CONV_CH, LSTM_H, VOCAB = 512, 256, 256

    key = jax.random.PRNGKey(0)
    k_hs, k_p = jax.random.split(key)

    # Stand-in for outputs.encoder_last_hidden_state (see TODO(synk) above).
    hidden_states = jax.random.normal(k_hs, (B, L, D), jnp.float32)
    params = make_params(k_p, D, CONV_CH, LSTM_H, VOCAB)

    logits = enhanced_head_forward(hidden_states, params, batch_block=2, vocab_tile=128)
    logits = jax.block_until_ready(logits)
    assert logits.shape == (B, L, VOCAB)
    assert logits.dtype == jnp.bfloat16

    ref = jax.block_until_ready(_reference_forward(hidden_states, params))
    logits_f32 = logits.astype(jnp.float32)
    max_err = jnp.max(jnp.abs(logits_f32 - ref))
    assert jnp.allclose(logits_f32, ref, atol=2e-2, rtol=2e-2), (
        f"mismatch vs JAX reference, max abs err = {max_err}")

    print("KERNEL_OK")
</pallas_src>

<mosaic_0001>
module attributes {stable_mosaic.version = 11 : i64} {
  func.func @_head_kernel(%arg0: i32, %arg1: i32, %arg2: memref<16x64xbf16, #tpu.memory_space<vmem>>, %arg3: memref<3x64x512xbf16, #tpu.memory_space<vmem>>, %arg4: memref<1x512xf32, #tpu.memory_space<vmem>>, %arg5: memref<512x1024xbf16, #tpu.memory_space<vmem>>, %arg6: memref<256x1024xbf16, #tpu.memory_space<vmem>>, %arg7: memref<1x1024xf32, #tpu.memory_space<vmem>>, %arg8: memref<256x128xbf16, #tpu.memory_space<vmem>>, %arg9: memref<1x128xf32, #tpu.memory_space<vmem>>, %arg10: memref<16x128xbf16, #tpu.memory_space<vmem>>, %arg11: memref<8x2x1024xf32, #tpu.memory_space<vmem>>, %arg12: memref<8x2x256xf32, #tpu.memory_space<vmem>>, %arg13: memref<16x256xbf16, #tpu.memory_space<vmem>>) attributes {dimension_semantics = [#tpu.dimension_semantics<parallel>, #tpu.dimension_semantics<arbitrary>], iteration_bounds = array<i64: 2, 2>, scalar_prefetch = 0 : i64, scratch_operands = 3 : i64, tpu.core_type = #tpu.core_type<tc>, window_params = [{transform_indices = @transform_0, window_bounds = array<i64: 16, 64>}, {pipeline_mode = #tpu.pipeline_mode<synchronous>, transform_indices = @transform_1, window_bounds = array<i64: 3, 64, 512>}, {pipeline_mode = #tpu.pipeline_mode<synchronous>, transform_indices = @transform_2, window_bounds = array<i64: 1, 512>}, {pipeline_mode = #tpu.pipeline_mode<synchronous>, transform_indices = @transform_3, window_bounds = array<i64: 512, 1024>}, {pipeline_mode = #tpu.pipeline_mode<synchronous>, transform_indices = @transform_4, window_bounds = array<i64: 256, 1024>}, {pipeline_mode = #tpu.pipeline_mode<synchronous>, transform_indices = @transform_5, window_bounds = array<i64: 1, 1024>}, {transform_indices = @transform_6, window_bounds = array<i64: 256, 128>}, {transform_indices = @transform_7, window_bounds = array<i64: 1, 128>}, {transform_indices = @transform_8, window_bounds = array<i64: 16, 128>}]} {
    %c0_i32 = arith.constant 0 : i32
    %0 = arith.cmpi eq, %arg1, %c0_i32 : i32
    %1 = arith.extui %0 : i1 to i32
    %c0_i32_0 = arith.constant 0 : i32
    %2 = arith.cmpi ne, %1, %c0_i32_0 : i32
    scf.if %2 {
      %c0_8 = arith.constant 0 : index
      %c0_9 = arith.constant 0 : index
      %11 = vector.load %arg2[%c0_8, %c0_9] : memref<16x64xbf16, #tpu.memory_space<vmem>>, vector<16x64xbf16>
      %c0_10 = arith.constant 0 : index
      %c0_11 = arith.constant 0 : index
      %c0_12 = arith.constant 0 : index
      %12 = vector.load %arg3[%c0_10, %c0_11, %c0_12] : memref<3x64x512xbf16, #tpu.memory_space<vmem>>, vector<1x64x512xbf16>
      %13 = vector.shape_cast %12 : vector<1x64x512xbf16> to vector<64x512xbf16>
      %c1 = arith.constant 1 : index
      %c0_13 = arith.constant 0 : index
      %c0_14 = arith.constant 0 : index
      %14 = vector.load %arg3[%c1, %c0_13, %c0_14] : memref<3x64x512xbf16, #tpu.memory_space<vmem>>, vector<1x64x512xbf16>
      %15 = vector.shape_cast %14 : vector<1x64x512xbf16> to vector<64x512xbf16>
      %c2 = arith.constant 2 : index
      %c0_15 = arith.constant 0 : index
      %c0_16 = arith.constant 0 : index
      %16 = vector.load %arg3[%c2, %c0_15, %c0_16] : memref<3x64x512xbf16, #tpu.memory_space<vmem>>, vector<1x64x512xbf16>
      %17 = vector.shape_cast %16 : vector<1x64x512xbf16> to vector<64x512xbf16>
      %cst_17 = arith.constant dense<0.000000e+00> : vector<16x512xf32>
      %18 = tpu.matmul %11, %13, %cst_17 {dimension_numbers = #tpu.dot_dimension_numbers<[1], [0], [0], [1], [0, 0, 1, 1], [], []>} : vector<16x64xbf16>, vector<64x512xbf16>, vector<16x512xf32> -> vector<16x512xf32>
      %cst_18 = arith.constant dense<0.000000e+00> : vector<16x512xf32>
      %19 = tpu.matmul %11, %15, %cst_18 {dimension_numbers = #tpu.dot_dimension_numbers<[1], [0], [0], [1], [0, 0, 1, 1], [], []>} : vector<16x64xbf16>, vector<64x512xbf16>, vector<16x512xf32> -> vector<16x512xf32>
      %cst_19 = arith.constant dense<0.000000e+00> : vector<16x512xf32>
      %20 = tpu.matmul %11, %17, %cst_19 {dimension_numbers = #tpu.dot_dimension_numbers<[1], [0], [0], [1], [0, 0, 1, 1], [], []>} : vector<16x64xbf16>, vector<64x512xbf16>, vector<16x512xf32> -> vector<16x512xf32>
      %cst_20 = arith.constant 0.000000e+00 : f32
      %21 = vector.broadcast %cst_20 : f32 to vector<1x512xf32>
      %22 = vector.extract_strided_slice %18 {offsets = [0, 0], sizes = [15, 512], strides = [1, 1]} : vector<16x512xf32> to vector<15x512xf32>
      %23 = tpu.concatenate %21, %22 in 0 : vector<1x512xf32>, vector<15x512xf32> -> vector<16x512xf32>
      %24 = vector.extract_strided_slice %20 {offsets = [1, 0], sizes = [15, 512], strides = [1, 1]} : vector<16x512xf32> to vector<15x512xf32>
      %25 = tpu.concatenate %24, %21 in 0 : vector<15x512xf32>, vector<1x512xf32> -> vector<16x512xf32>
      %26 = tpu.iota {dimensions = array<i32: 0>} : vector<16x1xi32>
      %c8_i32 = arith.constant 8 : i32
      %c0_i32_21 = arith.constant 0 : i32
      %27 = arith.cmpi eq, %c8_i32, %c0_i32_21 : i32
      %c1_i32 = arith.constant 1 : i32
      %28 = arith.select %27, %c1_i32, %c8_i32 : i32
      %29 = vector.broadcast %28 : i32 to vector<16x1xi32>
      %30 = arith.remsi %26, %29 : vector<16x1xi32>
      %c0_i32_22 = arith.constant 0 : i32
      %31 = vector.broadcast %c0_i32_22 : i32 to vector<16x1xi32>
      %32 = arith.cmpi ne, %30, %31 : vector<16x1xi32>
      %c0_i32_23 = arith.constant 0 : i32
      %33 = vector.broadcast %c0_i32_23 : i32 to vector<16x1xi32>
      %34 = arith.cmpi slt, %30, %33 : vector<16x1xi32>
      %c0_i32_24 = arith.constant 0 : i32
      %35 = arith.cmpi slt, %28, %c0_i32_24 : i32
      %36 = vector.broadcast %35 : i1 to vector<16x1xi1>
      %37 = vector.broadcast %36 : vector<16x1xi1> to vector<16x1xi1>
      %38 = arith.xori %34, %37 : vector<16x1xi1>
      %39 = arith.andi %38, %32 : vector<16x1xi1>
      %40 = vector.broadcast %28 : i32 to vector<16x1xi32>
      %41 = arith.addi %30, %40 : vector<16x1xi32>
      %42 = arith.select %39, %41, %30 : vector<16x1xi1>, vector<16x1xi32>
      %c0_i32_25 = arith.constant 0 : i32
      %43 = vector.broadcast %c0_i32_25 : i32 to vector<16x1xi32>
      %44 = arith.cmpi eq, %42, %43 : vector<16x1xi32>
      %cst_26 = arith.constant 0.000000e+00 : f32
      %45 = vector.shape_cast %44 : vector<16x1xi1> to vector<16x1xi1>
      %46 = vector.broadcast %45 : vector<16x1xi1> to vector<16x512xi1>
      %47 = vector.broadcast %cst_26 : f32 to vector<16x512xf32>
      %48 = arith.select %46, %47, %23 : vector<16x512xi1>, vector<16x512xf32>
      %c7_i32 = arith.constant 7 : i32
      %49 = vector.broadcast %c7_i32 : i32 to vector<16x1xi32>
      %50 = arith.cmpi eq, %42, %49 : vector<16x1xi32>
      %cst_27 = arith.constant 0.000000e+00 : f32
      %51 = vector.shape_cast %50 : vector<16x1xi1> to vector<16x1xi1>
      %52 = vector.broadcast %51 : vector<16x1xi1> to vector<16x512xi1>
      %53 = vector.broadcast %cst_27 : f32 to vector<16x512xf32>
      %54 = arith.select %52, %53, %25 : vector<16x512xi1>, vector<16x512xf32>
      %55 = arith.addf %48, %19 : vector<16x512xf32>
      %56 = arith.addf %55, %54 : vector<16x512xf32>
      %c0_28 = arith.constant 0 : index
      %c0_29 = arith.constant 0 : index
      %57 = vector.load %arg4[%c0_28, %c0_29] : memref<1x512xf32, #tpu.memory_space<vmem>>, vector<1x512xf32>
      %58 = vector.broadcast %57 : vector<1x512xf32> to vector<16x512xf32>
      %59 = arith.addf %56, %58 : vector<16x512xf32>
      %cst_30 = arith.constant 0.000000e+00 : f32
      %60 = vector.broadcast %cst_30 : f32 to vector<16x512xf32>
      %61 = arith.maximumf %59, %60 : vector<16x512xf32>
      %62 = arith.truncf %61 : vector<16x512xf32> to vector<16x512xbf16>
      %c0_31 = arith.constant 0 : index
      %c0_32 = arith.constant 0 : index
      %63 = vector.load %arg5[%c0_31, %c0_32] : memref<512x1024xbf16, #tpu.memory_space<vmem>>, vector<512x1024xbf16>
      %cst_33 = arith.constant dense<0.000000e+00> : vector<16x1024xf32>
      %64 = tpu.matmul %62, %63, %cst_33 {dimension_numbers = #tpu.dot_dimension_numbers<[1], [0], [0], [1], [0, 0, 1, 1], [], []>} : vector<16x512xbf16>, vector<512x1024xbf16>, vector<16x1024xf32> -> vector<16x1024xf32>
      %c0_34 = arith.constant 0 : index
      %c0_35 = arith.constant 0 : index
      %65 = vector.load %arg7[%c0_34, %c0_35] : memref<1x1024xf32, #tpu.memory_space<vmem>>, vector<1x1024xf32>
      %66 = vector.broadcast %65 : vector<1x1024xf32> to vector<16x1024xf32>
      %67 = arith.addf %64, %66 : vector<16x1024xf32>
      %68 = vector.extract_strided_slice %67 {offsets = [0, 0], sizes = [8, 1024], strides = [1, 1]} : vector<16x1024xf32> to vector<8x1024xf32>
      %c0_36 = arith.constant 0 : index
      %c0_37 = arith.constant 0 : index
      %c0_38 = arith.constant 0 : index
      %69 = vector.load %arg11[%c0_36, %c0_37, %c0_38] : memref<8x2x1024xf32, #tpu.memory_space<vmem>>, vector<8x1x1024xf32>
      %70 = vector.shape_cast %69 : vector<8x1x1024xf32> to vector<8x1024xf32>
      %71 = vector.shape_cast %68 : vector<8x1024xf32> to vector<8x1x1024xf32>
      tpu.vector_store %arg11[%c0_36, %c0_37, %c0_38], %71 {strides = array<i32>} : memref<8x2x1024xf32, #tpu.memory_space<vmem>>, vector<8x1x1024xf32>,
      %72 = vector.extract_strided_slice %67 {offsets = [8, 0], sizes = [8, 1024], strides = [1, 1]} : vector<16x1024xf32> to vector<8x1024xf32>
      %c0_39 = arith.constant 0 : index
      %c1_40 = arith.constant 1 : index
      %c0_41 = arith.constant 0 : index
      %73 = vector.load %arg11[%c0_39, %c1_40, %c0_41] : memref<8x2x1024xf32, #tpu.memory_space<vmem>>, vector<8x1x1024xf32>
      %74 = vector.shape_cast %73 : vector<8x1x1024xf32> to vector<8x1024xf32>
      %75 = vector.shape_cast %72 : vector<8x1024xf32> to vector<8x1x1024xf32>
      tpu.vector_store %arg11[%c0_39, %c1_40, %c0_41], %75 {strides = array<i32>} : memref<8x2x1024xf32, #tpu.memory_space<vmem>>, vector<8x1x1024xf32>,
      %c0_42 = arith.constant 0 : index
      %c0_43 = arith.constant 0 : index
      %76 = vector.load %arg6[%c0_42, %c0_43] : memref<256x1024xbf16, #tpu.memory_space<vmem>>, vector<256x1024xbf16>
      %cst_44 = arith.constant 0.000000e+00 : f32
      %77 = vector.broadcast %cst_44 : f32 to vector<2x256xf32>
      %cst_45 = arith.constant 0.000000e+00 : f32
      %78 = vector.broadcast %cst_45 : f32 to vector<2x256xf32>
      %c0_i32_46 = arith.constant 0 : i32
      %c8_i32_47 = arith.constant 8 : i32
      %79 = arith.addi %c0_i32_46, %c8_i32_47 : i32
      %c1_i32_48 = arith.constant 1 : i32
      %80:2 = scf.for %arg14 = %c0_i32_46 to %79 step %c1_i32_48 iter_args(%arg15 = %77, %arg16 = %78) -> (vector<2x256xf32>, vector<2x256xf32>)  : i32 {
        %89 = arith.index_cast %arg14 : i32 to index
        %c0_59 = arith.constant 0 : index
        %c0_60 = arith.constant 0 : index
        %90 = vector.load %arg11[%89, %c0_59, %c0_60] : memref<8x2x1024xf32, #tpu.memory_space<vmem>>, vector<1x2x1024xf32>
        %91 = vector.shape_cast %90 : vector<1x2x1024xf32> to vector<2x1024xf32>
        %92 = arith.truncf %arg15 : vector<2x256xf32> to vector<2x256xbf16>
        %cst_61 = arith.constant dense<0.000000e+00> : vector<2x1024xf32>
        %93 = tpu.matmul %92, %76, %cst_61 {dimension_numbers = #tpu.dot_dimension_numbers<[1], [0], [0], [1], [0, 0, 1, 1], [], []>} : vector<2x256xbf16>, vector<256x1024xbf16>, vector<2x1024xf32> -> vector<2x1024xf32>
        %94 = arith.addf %91, %93 : vector<2x1024xf32>
        %95 = vector.extract_strided_slice %94 {offsets = [0, 0], sizes = [2, 256], strides = [1, 1]} : vector<2x1024xf32> to vector<2x256xf32>
        %96 = arith.negf %95 : vector<2x256xf32>
        %97 = math.exp %96 : vector<2x256xf32>
        %cst_62 = arith.constant 1.000000e+00 : f32
        %98 = vector.broadcast %cst_62 : f32 to vector<2x256xf32>
        %99 = arith.addf %98, %97 : vector<2x256xf32>
        %100 = arith.divf %98, %99 : vector<2x256xf32>
        %101 = vector.extract_strided_slice %94 {offsets = [0, 256], sizes = [2, 256], strides = [1, 1]} : vector<2x1024xf32> to vector<2x256xf32>
        %102 = arith.negf %101 : vector<2x256xf32>
        %103 = math.exp %102 : vector<2x256xf32>
        %cst_63 = arith.constant 1.000000e+00 : f32
        %104 = vector.broadcast %cst_63 : f32 to vector<2x256xf32>
        %105 = arith.addf %104, %103 : vector<2x256xf32>
        %106 = arith.divf %104, %105 : vector<2x256xf32>
        %107 = vector.extract_strided_slice %94 {offsets = [0, 512], sizes = [2, 256], strides = [1, 1]} : vector<2x1024xf32> to vector<2x256xf32>
        %108 = math.tanh %107 : vector<2x256xf32>
        %109 = vector.extract_strided_slice %94 {offsets = [0, 768], sizes = [2, 256], strides = [1, 1]} : vector<2x1024xf32> to vector<2x256xf32>
        %110 = arith.negf %109 : vector<2x256xf32>
        %111 = math.exp %110 : vector<2x256xf32>
        %cst_64 = arith.constant 1.000000e+00 : f32
        %112 = vector.broadcast %cst_64 : f32 to vector<2x256xf32>
        %113 = arith.addf %112, %111 : vector<2x256xf32>
        %114 = arith.divf %112, %113 : vector<2x256xf32>
        %115 = arith.mulf %106, %arg16 : vector<2x256xf32>
        %116 = arith.mulf %100, %108 : vector<2x256xf32>
        %117 = arith.addf %115, %116 : vector<2x256xf32>
        %118 = math.tanh %117 : vector<2x256xf32>
        %119 = arith.mulf %114, %118 : vector<2x256xf32>
        %120 = arith.index_cast %arg14 : i32 to index
        %c0_65 = arith.constant 0 : index
        %c0_66 = arith.constant 0 : index
        %121 = vector.load %arg12[%120, %c0_65, %c0_66] : memref<8x2x256xf32, #tpu.memory_space<vmem>>, vector<1x2x256xf32>
        %122 = vector.shape_cast %121 : vector<1x2x256xf32> to vector<2x256xf32>
        %123 = vector.shape_cast %119 : vector<2x256xf32> to vector<1x2x256xf32>
        tpu.vector_store %arg12[%120, %c0_65, %c0_66], %123 {strides = array<i32>} : memref<8x2x256xf32, #tpu.memory_space<vmem>>, vector<1x2x256xf32>,
        scf.yield %119, %117 : vector<2x256xf32>, vector<2x256xf32>
      }
      %c8_i32_49 = arith.constant 8 : i32
      %c0_50 = arith.constant 0 : index
      %c0_51 = arith.constant 0 : index
      %c0_52 = arith.constant 0 : index
      %81 = vector.load %arg12[%c0_50, %c0_51, %c0_52] : memref<8x2x256xf32, #tpu.memory_space<vmem>>, vector<8x1x256xf32>
      %82 = vector.shape_cast %81 : vector<8x1x256xf32> to vector<8x256xf32>
      %83 = arith.truncf %82 : vector<8x256xf32> to vector<8x256xbf16>
      %c0_53 = arith.constant 0 : index
      %c0_54 = arith.constant 0 : index
      %84 = vector.load %arg13[%c0_53, %c0_54] : memref<16x256xbf16, #tpu.memory_space<vmem>>, vector<8x256xbf16>
      tpu.vector_store %arg13[%c0_53, %c0_54], %83 {strides = array<i32>} : memref<16x256xbf16, #tpu.memory_space<vmem>>, vector<8x256xbf16>,
      %c0_55 = arith.constant 0 : index
      %c1_56 = arith.constant 1 : index
      %c0_57 = arith.constant 0 : index
      %85 = vector.load %arg12[%c0_55, %c1_56, %c0_57] : memref<8x2x256xf32, #tpu.memory_space<vmem>>, vector<8x1x256xf32>
      %86 = vector.shape_cast %85 : vector<8x1x256xf32> to vector<8x256xf32>
      %87 = arith.truncf %86 : vector<8x256xf32> to vector<8x256xbf16>
      %c8 = arith.constant 8 : index
      %c0_58 = arith.constant 0 : index
      %88 = vector.load %arg13[%c8, %c0_58] : memref<16x256xbf16, #tpu.memory_space<vmem>>, vector<8x256xbf16>
      tpu.vector_store %arg13[%c8, %c0_58], %87 {strides = array<i32>} : memref<16x256xbf16, #tpu.memory_space<vmem>>, vector<8x256xbf16>,
    } else {
    }
    %c0 = arith.constant 0 : index
    %c0_1 = arith.constant 0 : index
    %3 = vector.load %arg13[%c0, %c0_1] : memref<16x256xbf16, #tpu.memory_space<vmem>>, vector<16x256xbf16>
    %c0_2 = arith.constant 0 : index
    %c0_3 = arith.constant 0 : index
    %4 = vector.load %arg8[%c0_2, %c0_3] : memref<256x128xbf16, #tpu.memory_space<vmem>>, vector<256x128xbf16>
    %cst = arith.constant dense<0.000000e+00> : vector<16x128xf32>
    %5 = tpu.matmul %3, %4, %cst {dimension_numbers = #tpu.dot_dimension_numbers<[1], [0], [0], [1], [0, 0, 1, 1], [], []>} : vector<16x256xbf16>, vector<256x128xbf16>, vector<16x128xf32> -> vector<16x128xf32>
    %c0_4 = arith.constant 0 : index
    %c0_5 = arith.constant 0 : index
    %6 = vector.load %arg9[%c0_4, %c0_5] : memref<1x128xf32, #tpu.memory_space<vmem>>, vector<1x128xf32>
    %7 = vector.broadcast %6 : vector<1x128xf32> to vector<16x128xf32>
    %8 = arith.addf %5, %7 : vector<16x128xf32>
    %9 = arith.truncf %8 : vector<16x128xf32> to vector<16x128xbf16>
    %c0_6 = arith.constant 0 : index
    %c0_7 = arith.constant 0 : index
    %10 = vector.load %arg10[%c0_6, %c0_7] : memref<16x128xbf16, #tpu.memory_space<vmem>>, vector<16x128xbf16>
    tpu.vector_store %arg10[%c0_6, %c0_7], %9 {strides = array<i32>} : memref<16x128xbf16, #tpu.memory_space<vmem>>, vector<16x128xbf16>,
    return
  }
  func.func @transform_0(%arg0: i32, %arg1: i32) -> (i32, i32) {
    %c0_i32 = arith.constant 0 : i32
    %c0_i32_0 = arith.constant 0 : i32
    return %arg0, %c0_i32 : i32, i32
  }
  func.func @transform_1(%arg0: i32, %arg1: i32) -> (i32, i32, i32) {
    %c0_i32 = arith.constant 0 : i32
    %c0_i32_0 = arith.constant 0 : i32
    %c0_i32_1 = arith.constant 0 : i32
    %c0_i32_2 = arith.constant 0 : i32
    return %c0_i32, %c0_i32_0, %c0_i32_1 : i32, i32, i32
  }
  func.func @transform_2(%arg0: i32, %arg1: i32) -> (i32, i32) {
    %c0_i32 = arith.constant 0 : i32
    %c0_i32_0 = arith.constant 0 : i32
    %c0_i32_1 = arith.constant 0 : i32
    return %c0_i32, %c0_i32_0 : i32, i32
  }
  func.func @transform_3(%arg0: i32, %arg1: i32) -> (i32, i32) {
    %c0_i32 = arith.constant 0 : i32
    %c0_i32_0 = arith.constant 0 : i32
    %c0_i32_1 = arith.constant 0 : i32
    return %c0_i32, %c0_i32_0 : i32, i32
  }
  func.func @transform_4(%arg0: i32, %arg1: i32) -> (i32, i32) {
    %c0_i32 = arith.constant 0 : i32
    %c0_i32_0 = arith.constant 0 : i32
    %c0_i32_1 = arith.constant 0 : i32
    return %c0_i32, %c0_i32_0 : i32, i32
  }
  func.func @transform_5(%arg0: i32, %arg1: i32) -> (i32, i32) {
    %c0_i32 = arith.constant 0 : i32
    %c0_i32_0 = arith.constant 0 : i32
    %c0_i32_1 = arith.constant 0 : i32
    return %c0_i32, %c0_i32_0 : i32, i32
  }
  func.func @transform_6(%arg0: i32, %arg1: i32) -> (i32, i32) {
    %c0_i32 = arith.constant 0 : i32
    %c0_i32_0 = arith.constant 0 : i32
    return %c0_i32, %arg1 : i32, i32
  }
  func.func @transform_7(%arg0: i32, %arg1: i32) -> (i32, i32) {
    %c0_i32 = arith.constant 0 : i32
    %c0_i32_0 = arith.constant 0 : i32
    return %c0_i32, %arg1 : i32, i32
  }
  func.func @transform_8(%arg0: i32, %arg1: i32) -> (i32, i32) {
    %c0_i32 = arith.constant 0 : i32
    return %arg0, %arg1 : i32, i32
  }
}

</mosaic_0001>

<bundles_post_ra>
// kernel: tpu_custom_call.1
= control target key start
LH: loop header
LB: loop body
LE: loop exit
PB: predicated region body
PF: predicated region fallthrough
CT: control target
= control target key end

     0   :  { %s7882_s0 = inlined_call_operand.hbm [shape: bf16[32,64], index: 0, kind: input, shape index: {}]   ;;  %s7883_s1 = inlined_call_operand.hbm [shape: bf16[3,64,512], index: 1, kind: input, shape index: {}]   ;;  %s7884_s2 = inlined_call_operand.vmem [shape: f32[1,512], index: 2, kind: input, shape index: {}]   ;;  %s7885_s3 = inlined_call_operand.hbm [shape: bf16[512,1024], index: 3, kind: input, shape index: {}]   ;;  %s7886_s4 = inlined_call_operand.hbm [shape: bf16[256,1024], index: 4, kind: input, shape index: {}]   ;;  %s7887_s5 = inlined_call_operand.vmem [shape: f32[1,1024], index: 5, kind: input, shape index: {}]   ;;  %s7888_s6 = inlined_call_operand.hbm [shape: bf16[256,256], index: 6, kind: input, shape index: {}]   ;;  %s7889_s7 = inlined_call_operand.vmem [shape: f32[1,256], index: 7, kind: input, shape index: {}]   ;;  %s7890_s8 = inlined_call_operand.hbm [shape: bf16[32,256], index: 8, kind: output, shape index: {}]  }
   0x1   :  { %8112 = sst [smem:[#allocation145_spill]] %s7882_s0 }
   0x2   :  { %8113 = sst [smem:[#allocation146_spill]] %s7883_s1 }
   0x3   :  { %8114 = sst [smem:[#allocation147_spill]] %s7884_s2 }
   0x4   :  { %8115 = sst [smem:[#allocation148_spill]] %s7887_s5 }
   0x5   :  { %8116 = sst [smem:[#allocation149_spill]] %s7889_s7 }
   0x6   :  { %8117 = sst [smem:[#allocation150_spill]] %s7890_s8 }
   0x7   :  { %13 = vsyncpa [#allocation6], 0 }
   0x8   :  { %15 = vsyncpa [#allocation6 + $0x1], 0 }
   0x9   :  { %16 = vsyncpa [#allocation9], 0 }
   0xa   :  { %17 = vsyncpa [#allocation12], 0 }
   0xb   :  { %18 = vsyncpa [#allocation7], 0 }
   0xc   :  { %20 = vsyncpa [#allocation7 + $0x1], 0  ;;  %s6465_s27 = smov 0   ;;  %s6467_s28 = smov 0  }
   0xd   :  { %s6469_s29 = smov 0   ;;  %s6471_s30 = smov 0  }
   0xe   :  { %s6473_s9 = smov 0   ;;  %s6475_s10 = smov 0  }
   0xf   :  { %s6477_s11 = smov 0   ;;  %s6479_s12 = smov 0  }
  0x10   :  { %s6481_s13 = smov 0   ;;  %s6483_s14 = smov 0  }
  0x11   :  { %s6485_s15 = smov 0   ;;  %s6487_s16 = smov 0  }
  0x12   :  { %s6489_s17 = smov 0   ;;  %s6491_s18 = smov 0  }
  0x13 LB: > { %8118 = sst [smem:[#allocation20_spill]] %s6335_s27  ;;  %s6532_s19 = sadd.s32 4294967295, %s6387_s18   ;;  %s6387_s18 = sphi %s6491_s18, %s26_s18   ;;  %s6383_s17 = sphi %s6489_s17, %s8435_s17   ;;  %s6379_s16 = sphi %s6487_s16, %s8434_s16   ;;  %s6375_s15 = sphi %s6485_s15, %s8423_s15   ;;  %s6371_s14 = sphi %s6483_s14, %s8433_s14   ;;  %s6367_s13 = sphi %s6481_s13, %s8422_s13   ;;  %s6363_s12 = sphi %s6479_s12, %s8432_s12   ;;  %s6359_s11 = sphi %s6477_s11, %s8431_s11   ;;  %s6355_s10 = sphi %s6475_s10, %s8430_s10   ;;  %s6351_s9 = sphi %s6473_s9, %s8429_s9   ;;  %s6347_s30 = sphi %s6471_s30, %s8419_s30   ;;  %s6343_s29 = sphi %s6469_s29, %s8428_s29   ;;  %s6339_s28 = sphi %s6467_s28, %s8427_s28   ;;  %s6335_s27 = sphi %s6465_s27, %s8418_s27  }
  0x14   : > { %8119 = sst [smem:[#allocation21_spill]] %s6339_s28  ;;  %s5214_s20 = sadd.s32 4294967294, %s6387_s18  }
  0x15   : > { %8120 = sst [smem:[#allocation22_spill]] %s6351_s9  ;;  %p58_p0 = scmp.ne.s32.totalorder %s6363_s12, %s6359_s11 }
  0x16   : > { %8121 = sst [smem:[#allocation23_spill]] %s6367_s13  ;;  %p7896_p1 = scmp.eq.s32.totalorder %s6532_s19, 0 }
  0x17   : > { %8122 = sst [smem:[#allocation24_spill]] %s6371_s14  ;;  %p189_p3 = scmp.ne.s32.totalorder %s6351_s9, %s6347_s30 }
  0x18   : > { %8123 = sst [smem:[#allocation25_spill]] %s6375_s15  ;;  %p6542_p4 = por %p7896_p1, %p58_p0 }
  0x19   : > { %8124 = sst [smem:[#allocation26_spill]] %s6383_s17  ;;  %p240_p5 = scmp.ne.s32.totalorder %s6343_s29, %s6339_s28 }
  0x1a   : > { %s8125_s21 = scalar_select %p6542_p4, 1, 0 }
  0x1b   : > { %p6550_p6 = por %p189_p3, %p7896_p1  ;;  %p241_p7 = scmp.eq.s32.totalorder %s6532_s19, 3 }
  0x1c   : > { %8126 = sst [smem:[#allocation27_spill]] %s8125_s21  ;;  %p246_p8 = scmp.ne.s32.totalorder %s6339_s28, %s6335_s27 }
  0x1d   : > { %s8127_s22 = scalar_select %p6550_p6, 1, 0 }
  0x1e   : > { %p247_p9 = scmp.eq.s32.totalorder %s5214_s20, 3  ;;  %p6557_p10 = por %p241_p7, %p240_p5 }
  0x1f   : > { %8128 = sst [smem:[#allocation28_spill]] %s8127_s22  ;;  %p5215_p11 = scmp.ge.s32.totalorder %s6387_s18, 1 }
  0x20   : > { %s8129_s23 = scalar_select %p6557_p10, 1, 0 }
  0x21   : > { %p6562_p12 = por %p247_p9, %p246_p8  ;;  %p254_p13 = scmp.lt.s32.totalorder %s6387_s18, 5 }
  0x22   : > { %8130 = sst [smem:[#allocation29_spill]] %s8129_s23  ;;  %s6401_s26 = smov [#allocation8]  }
  0x23   : > { %s8131_s24 = scalar_select %p6562_p12, 1, 0 }
  0x24   : > { %p6567_p0 = pnand %p5215_p11, %p254_p13  ;;  %s266_s30 = sshll.u32 %s6401_s26, 4  ;;  %s267_s30 = int_to_ptr.vmem [resolvable:$true] %s266_s30 }
  0x25   : > { %8132 = sst [smem:[#allocation30_spill]] %s8131_s24  ;;  %s8135_s1 = sld [smem:[#allocation146_spill]] }
  0x26   : > { %s8133_s25 = scalar_select %p6567_p0, 1, 0 }
  0x27   : > { %p5787_p3 = pneg %p6567_p0 }
  0x29   : > { %p6575_p5 = pnand %p5787_p3, %p7896_p1 }
  0x2b   : > { %s8134_s11 = scalar_select %p6575_p5, 1, 0 }
  0x2c   : > { %s6073_s24 = scalar_lea.hbm %s8135_s1, 6144  ;;  %p6587_p8 = pneg %p6575_p5 }
  0x2d   : > { %p6074_p7 = scmp.ne.s32.totalorder %s8135_s1, %s6073_s24  ;;  %p6080_p13 = scmp.lt.u32.totalorder %s6073_s24, %s8135_s1 }
  0x2e   : > { %s8136_s26 = scalar_select %p6587_p8, 1, 0 }
  0x2f   : > { %p6076_p9 = pnand %p6587_p8, %p6074_p7 }
  0x31   : > { %p6077_p11 = pneg %p6076_p9 }
  0x33   : > { %p6082_p3 = pnand %p6080_p13, %p6077_p11 }
  0x35   : > { %6085 = shalt.err (!%p6082_p3)
}
  0x36   : > { %s6086_s27 = scalar_lea.vmem %s267_s30, 6144  ;;  %p6094_p10 = scmp.lt.s32.totalorder %s267_s30, %s267_s30 }
  0x37   : > { %p6087_p1 = scmp.ne.s32.totalorder %s267_s30, %s6086_s27  ;;  %p6095_p6 = scmp.lt.s32.totalorder %s6086_s27, %s6086_s27 }
  0x39   : > { %p6089_p2 = pnand %p6087_p1, %p6587_p8  ;;  %p6096_p4 = por %p6095_p6, %p6094_p10 }
  0x3b   : > { %p6090_p12 = pneg %p6089_p2 }
  0x3d   : > { %p6097_p0 = pnand %p6096_p4, %p6090_p12 }
  0x3f   : > { %6100 = shalt.err (!%p6097_p0)
}
  0x40   : > { %s6402_s8 = smov 256   ;;  %s6403_s5 = smov 16  }
  0x41   : > { %5790 = dma.hbm_to_vmem [thread:$0]  (!%p6575_p5), %s8135_s1, 6144, %s267_s30, [#allocation9], %s6402_s8, %s6402_s8, %s6403_s5  }
  0x42   : > { %s35_s24 = sadd.s32 1, %s6379_s16  ;;  %s38_s20 = sadd.s32 1, %s6383_s17 }
  0x43   : > { %p36_p1 = scmp.ge.s32.totalorder %s35_s24, 2  ;;  %s45_s27 = sadd.s32 1, %s6367_s13 }
  0x44   : > { %p52_p2 = scmp.ne.s32.totalorder %s6367_s13, %s6363_s12  ;;  %p53_p4 = scmp.eq.s32.totalorder %s6387_s18, 0 }
  0x45   : > { %s8437_s24 = smov (%p36_p1, %s35_s24), 0  ;;  %s8439_s20 = smov (!%p36_p1, %s38_s20), %s6383_s17 }
  0x46   : > { %8137 = sst [smem:[#allocation31_spill]] %s8437_s24  ;;  %s173_s15 = ssub.s32 %s6379_s16, %s8437_s24 }
  0x47   : > { %p40_p6 = scmp.ge.s32.totalorder %s8439_s20, 2  ;;  %p174_p10 = scmp.eq.s32.totalorder %s173_s15, 0 }
  0x48   : > { %p6614_p12 = por %p53_p4, %p52_p2  ;;  %s176_s8 = sadd.s32 1, %s6355_s10 }
  0x49   : > { %s8441_s20 = smov (%p40_p6, %s8439_s20), 0  ;;  %p8141_p0 = scmp.ne.s32.totalorder %s6355_s10, %s6351_s9 }
  0x4a   : > { %8139 = sst [smem:[#allocation32_spill]] %s8441_s20  ;;  %s42_s23 = ssub.s32 %s6383_s17, %s8441_s20 }
  0x4b   : > { %s6622_s5 = scalar_select %p174_p10, %s6355_s10, %s176_s8  }
  0x4c   : > { %p6629_p7 = por %p8141_p0, %p53_p4  ;;  %p43_p9 = scmp.eq.s32.totalorder %s42_s23, 0 }
  0x4d   : > { %8140 = sst [smem:[#allocation33_spill]] %s6622_s5  ;;  %s227_s24 = sor.u32 %s173_s15, %s42_s23 }
  0x4e   : > { %p228_p11 = scmp.eq.s32.totalorder %s227_s24, 0  ;;  %s230_s2 = sadd.s32 1, %s6343_s29 }
  0x4f   : > { %s6635_s7 = scalar_select %p43_p9, %s6367_s13, %s45_s27  }
  0x50   : > { %s6638_s14 = scalar_select %p228_p11, %s6343_s29, %s230_s2  }
  0x51   : > { %8143 = sst [smem:[#allocation34_spill]] %s6635_s7  ;;  %p7911_p13 = scmp.lt.s32.totalorder %s6387_s18, 4 }
  0x52   : > { %s312_s28 = sand.u32 1, %s6387_s18   ;;  %s314_s8 = sand.u32 1, %s6367_s13  }
  0x53   : > { %s5220_s5 = sshll.u32 %s314_s8, 3  ;;  %s5704_s20 = sshll.u32 %s6383_s17, 7 }
  0x54   : > { %s8144_s0 = sld [smem:[#allocation145_spill]]  ;;  %s316_s24 = scalar_lea.vmem [#allocation5], %s5220_s5 }
  0x55   : > { %s323_s15 = sshll.u32 %s316_s24, 4  ;;  %p6653_p3 = pnand %p7911_p13, %p6614_p12  ;;  %s6657_s15 = int_to_ptr.vmem [resolvable:$true] %s323_s15 }
  0x56   : > { %s6659_s27 = scalar_lea.sflag [#allocation6], %s312_s28 }
  0x57   : > { %p6103_p2 = pneg %p6653_p3 }
  0x5a   : > { %s6647_s21 = scalar_lea.hbm %s8144_s0, %s5704_s20  ;;  %s6106_s30 = scalar_lea.hbm %s8144_s0, 256 }
  0x5b   : > { %s6101_s9 = scalar_lea.hbm %s6647_s21, 128  ;;  %p6107_p10 = scmp.lt.u32.totalorder %s6647_s21, %s8144_s0 }
  0x5c   : > { %p6102_p1 = scmp.ne.s32.totalorder %s6647_s21, %s6101_s9  ;;  %p6108_p12 = scmp.lt.u32.totalorder %s6106_s30, %s6101_s9 }
  0x5d   : > { %p6110_p9 = scmp.lt.u32.totalorder %s6101_s9, %s6647_s21 }
  0x5e   : > { %p6104_p4 = pnand %p6103_p2, %p6102_p1  ;;  %p6109_p0 = por %p6108_p12, %p6107_p10 }
  0x60   : > { %p6105_p6 = pneg %p6104_p4  ;;  %p6111_p11 = por %p6110_p9, %p6109_p0 }
  0x62   : > { %p6112_p13 = pnand %p6111_p11, %p6105_p6 }
  0x64   : > { %6115 = shalt.err (!%p6112_p13)
}
  0x65   : > { %s6116_s28 = scalar_lea.vmem %s6657_s15, 128  ;;  %s6404_s8 = smov [#allocation5]  }
  0x66   : > { %p6117_p1 = scmp.ne.s32.totalorder %s6657_s15, %s6116_s28  ;;  %s6121_s24 = sshll.u32 %s6404_s8, 4  ;;  %s6122_s24 = int_to_ptr.vmem [resolvable:$false] %s6121_s24 }
  0x67   : > { %s6123_s22 = scalar_lea.vmem %s6122_s24, 256  ;;  %p6124_p8 = scmp.lt.s32.totalorder %s6657_s15, %s6122_s24 }
  0x68   : > { %p6119_p4 = pnand %p6117_p1, %p6103_p2  ;;  %p6125_p10 = scmp.lt.s32.totalorder %s6123_s22, %s6116_s28 }
  0x6a   : > { %p6120_p5 = pneg %p6119_p4  ;;  %p6126_p12 = por %p6125_p10, %p6124_p8 }
  0x6c   : > { %p6127_p0 = pnand %p6126_p12, %p6120_p5 }
  0x6e   : > { %6130 = shalt.err (!%p6127_p0)
}
  0x6f   : > { %s7916_s9 = smov 64   ;;  %s7917_s20 = smov 4  }
  0x70   : > { %5800 = dma.hbm_to_vmem [thread:$0]  (!%p6653_p3), %s6647_s21, 128, %s6657_s15, %s6659_s27, %s7916_s9, %s7916_s9, %s7917_s20  }
  0x71   : > { %p8146_p13 = scmp.lt.s32.totalorder %s6387_s18, 4  ;;  %s6407_s5 = smov [#allocation10]  }
  0x72   : > { %s282_s23 = sshll.u32 %s6407_s5, 4  ;;  %s6131_s24 = scalar_lea.hbm %s7885_s3, 32768  ;;  %s283_s23 = int_to_ptr.vmem [resolvable:$true] %s282_s23 }
  0x73   : > { %p6694_p2 = pnand %p8146_p13, %p6629_p7  ;;  %p6132_p5 = scmp.ne.s32.totalorder %s7885_s3, %s6131_s24 }
  0x74   : > { %p8148_p8 = scmp.ne.s32.totalorder %s8136_s26, 0  ;;  %p6138_p7 = scmp.lt.u32.totalorder %s6131_s24, %s7885_s3 }
  0x75   : > { %s8147_s30 = scalar_select %p6694_p2, 1, 0 }
  0x76   : > { %p6134_p6 = pnand %p6132_p5, %p8148_p8 }
  0x78   : > { %p6135_p3 = pneg %p6134_p6 }
  0x7a   : > { %p6140_p9 = pnand %p6138_p7, %p6135_p3 }
  0x7c   : > { %6143 = shalt.err (!%p6140_p9)
}
  0x7d   : > { %s6144_s15 = scalar_lea.vmem %s283_s23, 32768  ;;  %p6152_p10 = scmp.lt.s32.totalorder %s283_s23, %s283_s23 }
  0x7e   : > { %p6145_p11 = scmp.ne.s32.totalorder %s283_s23, %s6144_s15  ;;  %p6153_p12 = scmp.lt.s32.totalorder %s6144_s15, %s6144_s15 }
  0x80   : > { %p6147_p1 = pnand %p6145_p11, %p8148_p8  ;;  %p6154_p0 = por %p6153_p12, %p6152_p10 }
  0x82   : > { %p6148_p4 = pneg %p6147_p1 }
  0x84   : > { %p6155_p13 = pnand %p6154_p0, %p6148_p4 }
  0x86   : > { %6158 = shalt.err (!%p6155_p13)
}
  0x87   : > { %s6408_s0 = smov 512   ;;  %s6409_s2 = smov 32  }
  0x88   : > { %p8149_p5 = scmp.ne.s32.totalorder %s8134_s11, 0  ;;  %s6410_s8 = smov [#allocation11]  }
  0x89   : > { %s295_s24 = sshll.u32 %s6410_s8, 4  ;;  %s335_s22 = sand.u32 1, %s6355_s10   ;;  %s296_s24 = int_to_ptr.vmem [resolvable:$true] %s295_s24 }
  0x8a   : > { %5793 = dma.hbm_to_vmem [thread:$0]  (!%p8149_p5), %s7885_s3, 32768, %s283_s23, [#allocation9], %s6408_s0, %s6408_s0, %s6409_s2  }
  0x8b   : > { %s5223_s1 = sshll.u32 %s335_s22, 7  ;;  %s6159_s9 = scalar_lea.hbm %s7886_s4, 16384 }
  0x8c   : > { %p6160_p6 = scmp.ne.s32.totalorder %s7886_s4, %s6159_s9  ;;  %p6166_p9 = scmp.lt.u32.totalorder %s6159_s9, %s7886_s4 }
  0x8e   : > { %p6162_p3 = pnand %p6160_p6, %p8148_p8 }
  0x90   : > { %p6163_p7 = pneg %p6162_p3 }
  0x92   : > { %p6168_p11 = pnand %p6166_p9, %p6163_p7 }
  0x94   : > { %6171 = shalt.err (!%p6168_p11)
}
  0x95   : > { %s6172_s23 = scalar_lea.vmem %s296_s24, 16384  ;;  %p6180_p12 = scmp.lt.s32.totalorder %s296_s24, %s296_s24 }
  0x96   : > { %p6173_p1 = scmp.ne.s32.totalorder %s296_s24, %s6172_s23  ;;  %p6181_p0 = scmp.lt.s32.totalorder %s6172_s23, %s6172_s23 }
  0x98   : > { %p6175_p4 = pnand %p6173_p1, %p8148_p8  ;;  %p6182_p13 = por %p6181_p0, %p6180_p12 }
  0x9a   : > { %p6176_p10 = pneg %p6175_p4 }
  0x9c   : > { %p6183_p2 = pnand %p6182_p13, %p6176_p10 }
  0x9e   : > { %6186 = shalt.err (!%p6183_p2)
}
  0x9f   : > { %5796 = dma.hbm_to_vmem [thread:$0]  (!%p8149_p5), %s7886_s4, 16384, %s296_s24, [#allocation12], %s6408_s0, %s6408_s0, %s6409_s2  }
  0xa0   : > { %s5224_s7 = sshll.u32 %s6379_s16, 6  ;;  %s337_s5 = scalar_lea.vmem [#allocation13], %s5223_s1 }
  0xa1   : > { %s6739_s26 = scalar_lea.hbm %s7888_s6, %s5224_s7  ;;  %s343_s28 = sshll.u32 %s337_s5, 4  ;;  %s6741_s28 = int_to_ptr.vmem [resolvable:$true] %s343_s28 }
  0xa2   : > { %s6187_s11 = scalar_lea.hbm %s6739_s26, 2048  ;;  %p8150_p8 = scmp.ne.s32.totalorder %s8147_s30, 0 }
  0xa3   : > { %p6188_p2 = scmp.ne.s32.totalorder %s6739_s26, %s6187_s11  ;;  %s6192_s8 = scalar_lea.hbm %s7888_s6, 4096 }
  0xa4   : > { %p6189_p6 = pneg %p8150_p8  ;;  %p6193_p7 = scmp.lt.u32.totalorder %s6739_s26, %s7888_s6 }
  0xa5   : > { %p6194_p9 = scmp.lt.u32.totalorder %s6192_s8, %s6187_s11  ;;  %p6196_p1 = scmp.lt.u32.totalorder %s6187_s11, %s6739_s26 }
  0xa6   : > { %p6190_p5 = pnand %p6189_p6, %p6188_p2 }
  0xa7   : > { %p6195_p11 = por %p6194_p9, %p6193_p7 }
  0xa8   : > { %p6191_p3 = pneg %p6190_p5 }
  0xa9   : > { %p6197_p4 = por %p6196_p1, %p6195_p11 }
  0xab   : > { %p6198_p10 = pnand %p6197_p4, %p6191_p3 }
  0xad   : > { %6201 = shalt.err (!%p6198_p10)
}
  0xae   : > { %s6202_s1 = scalar_lea.vmem %s6741_s28, 2048  ;;  %s6411_s21 = smov [#allocation13]  }
  0xaf   : > { %p6203_p12 = scmp.ne.s32.totalorder %s6741_s28, %s6202_s1  ;;  %s6207_s15 = sshll.u32 %s6411_s21, 4  ;;  %s6208_s15 = int_to_ptr.vmem [resolvable:$false] %s6207_s15 }
  0xb0   : > { %s6209_s23 = scalar_lea.vmem %s6208_s15, 4096  ;;  %p6210_p2 = scmp.lt.s32.totalorder %s6741_s28, %s6208_s15 }
  0xb1   : > { %p6205_p0 = pnand %p6203_p12, %p6189_p6  ;;  %p6211_p5 = scmp.lt.s32.totalorder %s6209_s23, %s6202_s1 }
  0xb3   : > { %p6206_p13 = pneg %p6205_p0  ;;  %p6212_p7 = por %p6211_p5, %p6210_p2 }
  0xb5   : > { %p6213_p9 = pnand %p6212_p7, %p6206_p13 }
  0xb7   : > { %6216 = shalt.err (!%p6213_p9)
}
  0xb8   : > { %s6412_s17 = smov 128   ;;  %s8151_s20 = smov 4  }
  0xb9   : > { %s8152_s7 = smov 64   ;;  %p8153_p6 = scmp.ne.s32.totalorder %s8133_s25, 0 }
  0xba   : > { %5803 = dma.hbm_to_vmem [thread:$0]  (!%p8150_p8), %s6739_s26, 2048, %s6741_s28, %s6659_s27, %s6412_s17, %s8152_s7, %s8151_s20  }
  0xbb   : > { %361 = sbr.rel (%p8153_p6) target bundleno = 1640 (0x668), region = 52  ;;  %s8154_s13 = sld [smem:[#allocation27_spill]] (!%p8153_p6) }
  0xbc   : > { %s363_s9 = sand.u32 (!%p8153_p6), 1, %s6532_s19   ;;  %s365_s5 = sand.u32 (!%p8153_p6), 1, %s6363_s12  }
  0xbd   : > { %s6775_s11 = sshll.u32 (!%p8153_p6), %s365_s5, 3  ;;  %s364_s0 = scalar_lea.sflag (!%p8153_p6), [#allocation6], %s363_s9 }
  0xbe   : > { %s367_s2 = scalar_lea.vmem (!%p8153_p6), [#allocation5], %s6775_s11 }
  0xc1   : > { %p8155_p3 = scmp.ne.s32.totalorder (!%p8153_p6), %s8154_s13, 0 }
  0xc3   : > { %6314 = dma.done.wait (%p8155_p3), %s364_s0, 128  }
  0xc4   : > { %6316 = vsyncadd (%p8155_p3), %s364_s0, 4294967168  ;;  %p8156_p8 = scmp.eq.s32.totalorder %s6532_s19, 0 }
  0xc6   : > { %6318 = dma.done.wait (%p8156_p8), [#allocation9], 38912   ;;  %p8157_p11 = pmov %p8156_p8 }
  0xc7   : > { %p8158_p1 = pmov %p8156_p8 }
  0xc8   : > { %6320 = vsyncadd (%p8157_p11), [#allocation9], 4294928384 }
  0xc9   : > { %6322 = dma.done.wait (%p8158_p1), [#allocation12], 16384   ;;  %p8159_p4 = pmov %p8158_p1 }
  0xca   : > { %s8160_s25 = sld [smem:[#allocation22_spill]]  ;;  %s8161_s27 = sld [smem:[#allocation28_spill]] }
  0xcb   : > { %6324 = vsyncadd (%p8159_p4), [#allocation12], 4294950912 }
  0xd0   : > { %s386_s30 = sand.u32 1, %s8160_s25   ;;  %p8162_p10 = scmp.ne.s32.totalorder %s8161_s27, 0 }
  0xd1   : > { %s5230_s26 = sshll.u32 %s386_s30, 7 }
  0xd2   : > { %s6791_s28 = scalar_lea.vmem [#allocation13], %s5230_s26 }
  0xd3   : > { %6326 = dma.done.wait (%p8162_p10), %s364_s0, 2048  }
  0xd4   : > { %6328 = vsyncadd (%p8162_p10), %s364_s0, 4294965248  ;;  %s8163_s8 = sld [smem:[#allocation21_spill]]  ;;  %s8164_s24 = sld [smem:[#allocation24_spill]] }
  0xd5   : > { %s8165_s23 = sld [smem:[#allocation149_spill]] }
  0xda   : > { %s426_s22 = sand.u32 1, %s8163_s8   ;;  %p430_p12 = scmp.lt.s32.totalorder %s8164_s24, 1 }
  0xdb   : > { %s6801_s19 = sshll.u32 %s426_s22, 3  ;;  %p5232_p0 = scmp.ne.s32.totalorder %s8164_s24, 0 }
  0xdc   : > { %s6804_s1 = scalar_select %p430_p12, %s8164_s24, 1 }
  0xdd   : > { %s428_s20 = scalar_lea.vmem [#allocation14], %s6801_s19  ;;  %438 = sbr.rel (%p5232_p0) target bundleno = 1370 (0x55a), region = 76 }
  0xde   : > { %s432_s17 = scalar_lea.vmem %s8165_s23, %s6804_s1 }
  0xe4   : > { %v5968_v0 = vld [vmem:[#allocation8 + $0x4] ss:$16 sps:$4 sm:$0xff]   ;;  %v5970_v1 = vld [vmem:[#allocation8] ss:$16 sps:$4 sm:$0xff]   ;;  %v6413_v2 = vmov 0   ;;  %vm576_vm0 = vcmask 523264  }
  0xe5   : > { %612 = vmatprep.mubr.bf16.mxu0 %v6413_v2  ;;  %655 = vmatprep.mubr.bf16.mxu1 %v6413_v2  ;;  %v5971_v3 = vld [vmem:[#allocation8 + $0x24] ss:$16 sps:$4 sm:$0xff]   ;;  %v5973_v4 = vld [vmem:[#allocation8 + $0x20] ss:$16 sps:$4 sm:$0xff]   ;;  %v5993_v10 = vld [vmem:[#allocation8 + $0xc] ss:$16 sps:$4 sm:$0xff]  }
  0xe6   : > { %580 = vmatprep.subr.bf16.mxu0 %v5968_v0  ;;  %v5974_v5 = vld [vmem:[#allocation8 + $0x44] ss:$16 sps:$4 sm:$0xff]   ;;  %v5976_v6 = vld [vmem:[#allocation8 + $0x40] ss:$16 sps:$4 sm:$0xff]   ;;  %623 = vmatprep.subr.bf16.mxu1 %v5993_v10  ;;  %v5998_v13 = vld [vmem:[#allocation8 + $0x8] ss:$16 sps:$4 sm:$0xff]  }
  0xe7   : > { %581 = vmatpush1.bf16.msra.mxu0 %v5970_v1  ;;  %v5977_v7 = vld [vmem:[#allocation8 + $0x64] ss:$16 sps:$4 sm:$0xff]   ;;  %v5979_v8 = vld [vmem:[#allocation8 + $0x60] ss:$16 sps:$4 sm:$0xff]   ;;  %v5999_v14 = vld [vmem:[#allocation8 + $0x2c] ss:$16 sps:$4 sm:$0xff]   ;;  %624 = vmatpush1.bf16.msra.mxu1 %v5998_v13 }
  0xe8   : > { %582 = vmatprep.subr.bf16.mxu0 %v5971_v3  ;;  %v5983_v9 = vld [vmem:[#allocation8 + $0x84] ss:$16 sps:$4 sm:$0xff]   ;;  %v5981_v12 = vld [vmem:[#allocation8 + $0x80] ss:$16 sps:$4 sm:$0xff]   ;;  %v6004_v16 = vld [vmem:[#allocation8 + $0x28] ss:$16 sps:$4 sm:$0xff]   ;;  %625 = vmatprep.subr.bf16.mxu1 %v5999_v14 }
  0xe9   : > { %v6816_v11 = vld [vmem:[%s367_s2] sm:$0xff]   ;;  %v1177_v42 = vld [vmem:[#allocation10] sm:$0xff]  ;;  %v1178_v62 = vld [vmem:[#allocation10 + $0x8] sm:$0xff]  ;;  %vm1006_vm1 = vcmask 1040384   ;;  %vm1039_vm4 = vcmask 1046528   ;;  %s8173_s9 = sld [smem:[#allocation147_spill]] }
  0xea   : > { %v5986_v15 = vld [vmem:[#allocation8 + $0xa4] ss:$16 sps:$4 sm:$0xff]   ;;  %v6005_v17 = vld [vmem:[#allocation8 + $0x4c] ss:$16 sps:$4 sm:$0xff]   ;;  %v5984_v18 = vld [vmem:[#allocation8 + $0xa0] ss:$16 sps:$4 sm:$0xff]  }
  0xeb   : > { %583 = vmatpush1.bf16.msra.mxu0 %v5973_v4  ;;  %v5989_v19 = vld [vmem:[#allocation8 + $0xc4] ss:$16 sps:$4 sm:$0xff]   ;;  %626 = vmatpush1.bf16.msra.mxu1 %v6004_v16  ;;  %v6010_v20 = vld [vmem:[#allocation8 + $0x48] ss:$16 sps:$4 sm:$0xff]   ;;  %v6011_v21 = vld [vmem:[#allocation8 + $0x6c] ss:$16 sps:$4 sm:$0xff]  }
  0xec   : > { %584 = vmatprep.subr.bf16.mxu0 %v5974_v5  ;;  %627 = vmatprep.subr.bf16.mxu1 %v6005_v17  ;;  %v5987_v22 = vld [vmem:[#allocation8 + $0xc0] ss:$16 sps:$4 sm:$0xff]   ;;  %v5992_v23 = vld [vmem:[#allocation8 + $0xe4] ss:$16 sps:$4 sm:$0xff]   ;;  %v6016_v24 = vld [vmem:[#allocation8 + $0x68] ss:$16 sps:$4 sm:$0xff]  }
  0xed   : > { %v6019_v25 = vld [vmem:[#allocation8 + $0x8c] ss:$16 sps:$4 sm:$0xff]   ;;  %v5990_v26 = vld [vmem:[#allocation8 + $0xe0] ss:$16 sps:$4 sm:$0xff]   ;;  %v5997_v27 = vld [vmem:[#allocation8 + $0x104] ss:$16 sps:$4 sm:$0xff]  }
  0xee   : > { %v6017_v28 = vld [vmem:[#allocation8 + $0x88] ss:$16 sps:$4 sm:$0xff]   ;;  %v6022_v29 = vld [vmem:[#allocation8 + $0xac] ss:$16 sps:$4 sm:$0xff]   ;;  %v5995_v30 = vld [vmem:[#allocation8 + $0x100] ss:$16 sps:$4 sm:$0xff]  }
  0xef   : > { %585 = vmatpush1.bf16.msra.mxu0 %v5976_v6  ;;  %628 = vmatpush1.bf16.msra.mxu1 %v6010_v20  ;;  %v6003_v31 = vld [vmem:[#allocation8 + $0x124] ss:$16 sps:$4 sm:$0xff]   ;;  %v6020_v32 = vld [vmem:[#allocation8 + $0xa8] ss:$16 sps:$4 sm:$0xff]   ;;  %v6025_v33 = vld [vmem:[#allocation8 + $0xcc] ss:$16 sps:$4 sm:$0xff]  }
  0xf0   : > { %586 = vmatprep.subr.bf16.mxu0 %v5977_v7  ;;  %629 = vmatprep.subr.bf16.mxu1 %v6011_v21  ;;  %v6001_v34 = vld [vmem:[#allocation8 + $0x120] ss:$16 sps:$4 sm:$0xff]   ;;  %v6009_v35 = vld [vmem:[#allocation8 + $0x144] ss:$16 sps:$4 sm:$0xff]   ;;  %v6023_v36 = vld [vmem:[#allocation8 + $0xc8] ss:$16 sps:$4 sm:$0xff]  }
  0xf1   : > { %v6028_v37 = vld [vmem:[#allocation8 + $0xec] ss:$16 sps:$4 sm:$0xff]   ;;  %v6007_v38 = vld [vmem:[#allocation8 + $0x140] ss:$16 sps:$4 sm:$0xff]   ;;  %v6015_v39 = vld [vmem:[#allocation8 + $0x164] ss:$16 sps:$4 sm:$0xff]  }
  0xf2   : > { %v6026_v40 = vld [vmem:[#allocation8 + $0xe8] ss:$16 sps:$4 sm:$0xff]   ;;  %v6031_v41 = vld [vmem:[#allocation8 + $0x10c] ss:$16 sps:$4 sm:$0xff]   ;;  %v1181_v43 = vld [vmem:[#allocation10 + $0x20] sm:$0xff]  ;;  %s8178_s0 = sld [smem:[#allocation148_spill]] }
  0xf3   : > { %587 = vmatpush1.bf16.msra.mxu0 %v5979_v8  ;;  %630 = vmatpush1.bf16.msra.mxu1 %v6016_v24  ;;  %v6013_v44 = vld [vmem:[#allocation8 + $0x160] ss:$16 sps:$4 sm:$0xff]   ;;  %v6029_v45 = vld [vmem:[#allocation8 + $0x108] ss:$16 sps:$4 sm:$0xff]   ;;  %v6034_v46 = vld [vmem:[#allocation8 + $0x12c] ss:$16 sps:$4 sm:$0xff]   ;;  %v5289_v47 = vcombine.high %v1177_v42, %v1181_v43  ;;  %v5288_v50 = vcombine.low %v1177_v42, %v1181_v43 }
  0xf4   : > { %746 = vmatprep.subr.bf16.mxu0 %v5983_v9  ;;  %789 = vmatprep.subr.bf16.mxu1 %v6019_v25  ;;  %v1185_v48 = vld [vmem:[#allocation10 + $0x40] sm:$0xff]  ;;  %v6032_v51 = vld [vmem:[#allocation8 + $0x128] ss:$16 sps:$4 sm:$0xff]   ;;  %v6037_v53 = vld [vmem:[#allocation8 + $0x14c] ss:$16 sps:$4 sm:$0xff]   ;;  %s7373_s2 = smov 0  }
  0xf5   : > { %v1189_v49 = vld [vmem:[#allocation10 + $0x60] sm:$0xff]  ;;  %v6035_v57 = vld [vmem:[#allocation8 + $0x148] ss:$16 sps:$4 sm:$0xff]   ;;  %v6040_v59 = vld [vmem:[#allocation8 + $0x16c] ss:$16 sps:$4 sm:$0xff]  }
  0xf6   : > { %5250 = vmatmul.mubr.msk.bf16.vlgmr.msra.gmra.mrb[0].mxu0 %vm576_vm0, %v6816_v11  ;;  %5251 = vmatmul.mubr.msk.bf16.vlgmr.msra.gmra.mrb[0].mxu1 %vm576_vm0, %v6816_v11  ;;  %v5297_v52 = vcombine.high %v1185_v48, %v1189_v49  ;;  %v1193_v54 = vld [vmem:[#allocation10 + $0x80] sm:$0xff]  ;;  %v5296_v56 = vcombine.low %v1185_v48, %v1189_v49  ;;  %v1182_v63 = vld [vmem:[#allocation10 + $0x28] sm:$0xff] }
  0xf7   : > { %747 = vmatpush1.bf16.msra.mxu0 %v5981_v12  ;;  %778 = vmatprep.mubr.bf16.mxu0 %v6413_v2  ;;  %v1197_v55 = vld [vmem:[#allocation10 + $0xa0] sm:$0xff]  ;;  %v6038_v1 = vld [vmem:[#allocation8 + $0x168] ss:$16 sps:$4 sm:$0xff]   ;;  %v5291_v3 = vcombine.high %v1178_v62, %v1182_v63  ;;  %v5290_v7 = vcombine.low %v1178_v62, %v1182_v63 }
  0xf8   : > { %748 = vmatprep.subr.bf16.mxu0 %v5986_v15  ;;  %790 = vmatpush1.bf16.msra.mxu1 %v6017_v28  ;;  %v5305_v58 = vcombine.high %v1193_v54, %v1197_v55  ;;  %v1201_v60 = vld [vmem:[#allocation10 + $0xc0] sm:$0xff]  ;;  %v5304_v0 = vcombine.low %v1193_v54, %v1197_v55  ;;  %v1186_v4 = vld [vmem:[#allocation10 + $0x48] sm:$0xff] }
  0xf9   : > { %791 = vmatprep.subr.bf16.mxu1 %v6022_v29  ;;  %821 = vmatprep.mubr.bf16.mxu1 %v6413_v2  ;;  %v1205_v61 = vld [vmem:[#allocation10 + $0xe0] sm:$0xff]  ;;  %v1190_v5 = vld [vmem:[#allocation10 + $0x68] sm:$0xff] }
  0xfa   : > { %v5312_v6 = vcombine.low %v1201_v60, %v1205_v61  ;;  %v5299_v8 = vcombine.high %v1186_v4, %v1190_v5  ;;  %v1194_v9 = vld [vmem:[#allocation10 + $0x88] sm:$0xff]  ;;  %v5298_v12 = vcombine.low %v1186_v4, %v1190_v5  ;;  %v1213_v20 = vld [vmem:[#allocation10 + $0x120] sm:$0xff] }
  0xfb   : > { %749 = vmatpush1.bf16.msra.mxu0 %v5984_v18  ;;  %v1198_v10 = vld [vmem:[#allocation10 + $0xa8] sm:$0xff] }
  0xfc   : > { %750 = vmatprep.subr.bf16.mxu0 %v5989_v19  ;;  %792 = vmatpush1.bf16.msra.mxu1 %v6020_v32  ;;  %v5307_v13 = vcombine.high %v1194_v9, %v1198_v10  ;;  %v1202_v14 = vld [vmem:[#allocation10 + $0xc8] sm:$0xff]  ;;  %v5306_v16 = vcombine.low %v1194_v9, %v1198_v10  ;;  %v1209_v19 = vld [vmem:[#allocation10 + $0x100] sm:$0xff] }
  0xfd   : > { %793 = vmatprep.subr.bf16.mxu1 %v6025_v33  ;;  %v1206_v15 = vld [vmem:[#allocation10 + $0xe8] sm:$0xff]  ;;  %v1269_v9 = vld [vmem:[#allocation10 + $0x2e0] sm:$0xff] }
  0xfe   : > { %v5315_v17 = vcombine.high %v1202_v14, %v1206_v15  ;;  %v5314_v18 = vcombine.low %v1202_v14, %v1206_v15  ;;  %v1210_v21 = vld [vmem:[#allocation10 + $0x108] sm:$0xff] }
  0xff   : > { %751 = vmatpush1.bf16.msra.mxu0 %v5987_v22  ;;  %v5321_v22 = vcombine.high %v1209_v19, %v1213_v20  ;;  %v1218_v28 = vld [vmem:[#allocation10 + $0x148] sm:$0xff] }
 0x100   : > { %752 = vmatprep.subr.bf16.mxu0 %v5992_v23  ;;  %794 = vmatpush1.bf16.msra.mxu1 %v6023_v36  ;;  %v5320_v23 = vcombine.low %v1209_v19, %v1213_v20  ;;  %v1226_v36 = vld [vmem:[#allocation10 + $0x188] sm:$0xff]  ;;  %v1273_v19 = vld [vmem:[#allocation10 + $0x300] sm:$0xff] }
 0x101   : > { %795 = vmatprep.subr.bf16.mxu1 %v6028_v37  ;;  %v1246_v54 = vld [vmem:[#allocation10 + $0x228] sm:$0xff]  ;;  %v1277_v20 = vld [vmem:[#allocation10 + $0x320] sm:$0xff] }
 0x102   : > { %v1254_v62 = vld [vmem:[#allocation10 + $0x268] sm:$0xff] }
 0x103   : > { %753 = vmatpush1.bf16.msra.mxu0 %v5990_v26  ;;  %v1217_v26 = vld [vmem:[#allocation10 + $0x140] sm:$0xff]  ;;  %v1258_v4 = vld [vmem:[#allocation10 + $0x288] sm:$0xff] }
 0x104   : > { %912 = vmatprep.subr.bf16.mxu0 %v5997_v27  ;;  %796 = vmatpush1.bf16.msra.mxu1 %v6026_v40  ;;  %v1221_v27 = vld [vmem:[#allocation10 + $0x160] sm:$0xff]  ;;  %v1270_v14 = vld [vmem:[#allocation10 + $0x2e8] sm:$0xff] }
 0x105   : > { %955 = vmatprep.subr.bf16.mxu1 %v6031_v41  ;;  %v5329_v29 = vcombine.high %v1217_v26, %v1221_v27  ;;  %v1233_v40 = vld [vmem:[#allocation10 + $0x1c0] sm:$0xff] }
 0x106   : > { %5268 = vmatmul.mubr.msk.bf16.vlgmr.msra.gmra.mrb[4].mxu0 %vm576_vm0, %v6816_v11  ;;  %v1237_v41 = vld [vmem:[#allocation10 + $0x1e0] sm:$0xff] }
 0x107   : > { %913 = vmatpush1.bf16.msra.mxu0 %v5995_v30  ;;  %944 = vmatprep.mubr.bf16.mxu0 %v6413_v2  ;;  %v1222_v30 = vld [vmem:[#allocation10 + $0x168] sm:$0xff]  ;;  %v5344_v48 = vcombine.low %v1233_v40, %v1237_v41 }
 0x108   : > { %914 = vmatprep.subr.bf16.mxu0 %v6003_v31  ;;  %5269 = vmatmul.mubr.msk.bf16.vlgmr.msra.gmra.mrb[4].mxu1 %vm576_vm0, %v6816_v11  ;;  %v5328_v31 = vcombine.low %v1217_v26, %v1221_v27  ;;  %v5330_v32 = vcombine.low %v1218_v28, %v1222_v30  ;;  %v5331_v33 = vcombine.high %v1218_v28, %v1222_v30  ;;  %v1281_v26 = vld [vmem:[#allocation10 + $0x340] sm:$0xff]  ;;  %v1282_v28 = vld [vmem:[#allocation10 + $0x348] sm:$0xff] }
 0x109   : > { %956 = vmatpush1.bf16.msra.mxu1 %v6029_v45  ;;  %987 = vmatprep.mubr.bf16.mxu1 %v6413_v2  ;;  %v5313_v2 = vcombine.high %v1201_v60, %v1205_v61  ;;  %v1234_v45 = vld [vmem:[#allocation10 + $0x1c8] sm:$0xff]  ;;  %v1285_v27 = vld [vmem:[#allocation10 + $0x360] sm:$0xff] }
 0x10a   : > { %957 = vmatprep.subr.bf16.mxu1 %v6034_v46  ;;  %v1238_v46 = vld [vmem:[#allocation10 + $0x1e8] sm:$0xff] }
 0x10b   : > { %915 = vmatpush1.bf16.msra.mxu0 %v6001_v34  ;;  %v1225_v34 = vld [vmem:[#allocation10 + $0x180] sm:$0xff]  ;;  %v5346_v49 = vcombine.low %v1234_v45, %v1238_v46  ;;  %v1250_v60 = vld [vmem:[#allocation10 + $0x248] sm:$0xff] }
 0x10c   : > { %916 = vmatprep.subr.bf16.mxu0 %v6009_v35  ;;  %v1229_v35 = vld [vmem:[#allocation10 + $0x1a0] sm:$0xff]  ;;  %v1286_v30 = vld [vmem:[#allocation10 + $0x368] sm:$0xff] }
 0x10d   : > { %958 = vmatpush1.bf16.msra.mxu1 %v6032_v51  ;;  %v5336_v37 = vcombine.low %v1225_v34, %v1229_v35  ;;  %v1245_v51 = vld [vmem:[#allocation10 + $0x220] sm:$0xff] }
 0x10e   : > { %959 = vmatprep.subr.bf16.mxu1 %v6037_v53 }
 0x10f   : > { %917 = vmatpush1.bf16.msra.mxu0 %v6007_v38  ;;  %v5337_v38 = vcombine.high %v1225_v34, %v1229_v35  ;;  %v1289_v34 = vld [vmem:[#allocation10 + $0x380] sm:$0xff] }
 0x110   : > { %918 = vmatprep.subr.bf16.mxu0 %v6015_v39  ;;  %v1230_v39 = vld [vmem:[#allocation10 + $0x1a8] sm:$0xff]  ;;  %v1293_v35 = vld [vmem:[#allocation10 + $0x3a0] sm:$0xff] }
 0x111   : > { %960 = vmatpush1.bf16.msra.mxu1 %v6035_v57  ;;  %v5338_v42 = vcombine.low %v1226_v36, %v1230_v39  ;;  %v5339_v43 = vcombine.high %v1226_v36, %v1230_v39  ;;  %v1290_v36 = vld [vmem:[#allocation10 + $0x388] sm:$0xff]  ;;  %v5400_v39 = vcombine.low %v1289_v34, %v1293_v35 }
 0x112   : > { %961 = vmatprep.subr.bf16.mxu1 %v6040_v59  ;;  %v1253_v59 = vld [vmem:[#allocation10 + $0x260] sm:$0xff] }
 0x113   : > { %919 = vmatpush1.bf16.msra.mxu0 %v6013_v44  ;;  %v5345_v44 = vcombine.high %v1233_v40, %v1237_v41 }
 0x114   : > { %2755 = vmatprep.subr.bf16.mxu0 %v5289_v47  ;;  %v5347_v47 = vcombine.high %v1234_v45, %v1238_v46  ;;  %v1302_v46 = vld [vmem:[#allocation10 + $0x3e8] sm:$0xff] }
 0x115   : > { %962 = vmatpush1.bf16.msra.mxu1 %v6038_v1  ;;  %v5363_v1 = vcombine.high %v1250_v60, %v1254_v62 }
 0x116   : > { %5286 = vmatmul.mubr.msk.bf16.vlgmr.msra.gmra.mrb[8].mxu0 %vm576_vm0, %v6816_v11  ;;  %2841 = vmatprep.subr.bf16.mxu1 %v5291_v3  ;;  %v1261_v3 = vld [vmem:[#allocation10 + $0x2a0] sm:$0xff] }
 0x117   : > { %2756 = vmatpush1.bf16.msra.mxu0 %v5288_v50  ;;  %v1241_v50 = vld [vmem:[#allocation10 + $0x200] sm:$0xff] }
 0x118   : > { %2757 = vmatprep.subr.bf16.mxu0 %v5297_v52  ;;  %5287 = vmatmul.mubr.msk.bf16.vlgmr.msra.gmra.mrb[8].mxu1 %vm576_vm0, %v6816_v11  ;;  %v1214_v11 = vld [vmem:[#allocation10 + $0x128] sm:$0xff]  ;;  %v5353_v53 = vcombine.high %v1241_v50, %v1245_v51  ;;  %v5352_v55 = vcombine.low %v1241_v50, %v1245_v51  ;;  %v6834_v50 = vld [vmem:[#allocation10 + $0x400] sm:$0xff] }
 0x119   : > { %2842 = vmatpush1.bf16.msra.mxu1 %v5290_v7  ;;  %v5322_v24 = vcombine.low %v1210_v21, %v1214_v11  ;;  %v5323_v25 = vcombine.high %v1210_v21, %v1214_v11  ;;  %v1242_v52 = vld [vmem:[#allocation10 + $0x208] sm:$0xff]  ;;  %v6836_v51 = vld [vmem:[#allocation10 + $0x420] sm:$0xff] }
 0x11a   : > { %2843 = vmatprep.subr.bf16.mxu1 %v5299_v8  ;;  %v5355_v57 = vcombine.high %v1242_v52, %v1246_v54  ;;  %v1262_v7 = vld [vmem:[#allocation10 + $0x2a8] sm:$0xff]  ;;  %v1265_v8 = vld [vmem:[#allocation10 + $0x2c0] sm:$0xff] }
 0x11b   : > { %2758 = vmatpush1.bf16.msra.mxu0 %v5296_v56  ;;  %v5354_v56 = vcombine.low %v1242_v52, %v1246_v54  ;;  %v5370_v10 = vcombine.low %v1258_v4, %v1262_v7  ;;  %v5377_v15 = vcombine.high %v1265_v8, %v1269_v9  ;;  %v1274_v21 = vld [vmem:[#allocation10 + $0x308] sm:$0xff] }
 0x11c   : > { %2759 = vmatprep.subr.bf16.mxu0 %v5305_v58  ;;  %v1249_v58 = vld [vmem:[#allocation10 + $0x240] sm:$0xff]  ;;  %v1278_v11 = vld [vmem:[#allocation10 + $0x328] sm:$0xff] }
 0x11d   : > { %2844 = vmatpush1.bf16.msra.mxu1 %v5298_v12  ;;  %v5361_v61 = vcombine.high %v1249_v58, %v1253_v59  ;;  %v5360_v63 = vcombine.low %v1249_v58, %v1253_v59  ;;  %v5371_v12 = vcombine.high %v1258_v4, %v1262_v7  ;;  %v6838_v52 = vld [vmem:[#allocation10 + $0x408] sm:$0xff]  ;;  %v1064_v58 = vlaneseq }
 0x11e   : > { %2845 = vmatprep.subr.bf16.mxu1 %v5307_v13  ;;  %v1266_v13 = vld [vmem:[#allocation10 + $0x2c8] sm:$0xff] }
 0x11f   : > { %2760 = vmatpush1.bf16.msra.mxu0 %v5304_v0  ;;  %v5362_v0 = vcombine.low %v1250_v60, %v1254_v62  ;;  %v6842_v54 = vld [vmem:[#allocation10 + $0x428] sm:$0xff] }
 0x120   : > { %2761 = vmatprep.subr.bf16.mxu0 %v5313_v2  ;;  %v1257_v2 = vld [vmem:[#allocation10 + $0x280] sm:$0xff] }
 0x121   : > { %2846 = vmatpush1.bf16.msra.mxu1 %v5306_v16  ;;  %v5368_v5 = vcombine.low %v1257_v2, %v1261_v3  ;;  %v5379_v16 = vcombine.high %v1266_v13, %v1270_v14 }
 0x122   : > { %2847 = vmatprep.subr.bf16.mxu1 %v5315_v17  ;;  %v5376_v17 = vcombine.low %v1265_v8, %v1269_v9 }
 0x123   : > { %2762 = vmatpush1.bf16.msra.mxu0 %v5312_v6  ;;  %v5369_v6 = vcombine.high %v1257_v2, %v1261_v3 }
 0x124   : > { %2763 = vmatprep.subr.bf16.mxu0 %v5321_v22  ;;  %v5385_v22 = vcombine.high %v1273_v19, %v1277_v20 }
 0x125   : > { %2848 = vmatpush1.bf16.msra.mxu1 %v5314_v18  ;;  %v5378_v18 = vcombine.low %v1266_v13, %v1270_v14 }
 0x126   : > { %2849 = vmatprep.subr.bf16.mxu1 %v5323_v25  ;;  %v5387_v25 = vcombine.high %v1274_v21, %v1278_v11 }
 0x127   : > { %2764 = vmatpush1.bf16.msra.mxu0 %v5320_v23  ;;  %v5384_v23 = vcombine.low %v1273_v19, %v1277_v20 }
 0x128   : > { %2765 = vmatprep.subr.bf16.mxu0 %v5329_v29  ;;  %v5393_v29 = vcombine.high %v1281_v26, %v1285_v27 }
 0x129   : > { %2850 = vmatpush1.bf16.msra.mxu1 %v5322_v24  ;;  %v5386_v24 = vcombine.low %v1274_v21, %v1278_v11 }
 0x12a   : > { %2851 = vmatprep.subr.bf16.mxu1 %v5331_v33  ;;  %v5395_v33 = vcombine.high %v1282_v28, %v1286_v30 }
 0x12b   : > { %2766 = vmatpush1.bf16.msra.mxu0 %v5328_v31  ;;  %v5392_v31 = vcombine.low %v1281_v26, %v1285_v27 }
 0x12c   : > { %2767 = vmatprep.subr.bf16.mxu0 %v5337_v38  ;;  %v1294_v38 = vld [vmem:[#allocation10 + $0x3a8] sm:$0xff] }
 0x12d   : > { %2852 = vmatpush1.bf16.msra.mxu1 %v5330_v32  ;;  %v5394_v32 = vcombine.low %v1282_v28, %v1286_v30  ;;  %v5402_v40 = vcombine.low %v1290_v36, %v1294_v38  ;;  %v5403_v41 = vcombine.high %v1290_v36, %v1294_v38 }
 0x12e   : > { %2853 = vmatprep.subr.bf16.mxu1 %v5339_v43  ;;  %v1301_v43 = vld [vmem:[#allocation10 + $0x3e0] sm:$0xff] }
 0x12f   : > { %2768 = vmatpush1.bf16.msra.mxu0 %v5336_v37  ;;  %v5401_v37 = vcombine.high %v1289_v34, %v1293_v35 }
 0x130   : > { %2769 = vmatprep.subr.bf16.mxu0 %v5345_v44  ;;  %v1298_v44 = vld [vmem:[#allocation10 + $0x3c8] sm:$0xff] }
 0x131   : > { %2854 = vmatpush1.bf16.msra.mxu1 %v5338_v42  ;;  %v1297_v42 = vld [vmem:[#allocation10 + $0x3c0] sm:$0xff] }
 0x132   : > { %2855 = vmatprep.subr.bf16.mxu1 %v5347_v47  ;;  %v5409_v45 = vcombine.high %v1297_v42, %v1301_v43  ;;  %v5408_v47 = vcombine.low %v1297_v42, %v1301_v43 }
 0x133   : > { %2770 = vmatpush1.bf16.msra.mxu0 %v5344_v48  ;;  %v5410_v48 = vcombine.low %v1298_v44, %v1302_v46 }
 0x134   : > { %2771 = vmatprep.subr.bf16.mxu0 %v5353_v53  ;;  %v5417_v53 = vcombine.high %v6834_v50, %v6836_v51 }
 0x135   : > { %2856 = vmatpush1.bf16.msra.mxu1 %v5346_v49  ;;  %v5411_v49 = vcombine.high %v1298_v44, %v1302_v46 }
 0x136   : > { %2857 = vmatprep.subr.bf16.mxu1 %v5355_v57  ;;  %v5419_v57 = vcombine.high %v6838_v52, %v6842_v54 }
 0x137   : > { %2772 = vmatpush1.bf16.msra.mxu0 %v5352_v55  ;;  %v5416_v55 = vcombine.low %v6834_v50, %v6836_v51  ;;  %v1329_v50 = vld [vmem:[#allocation10 + $0x4c0] sm:$0xff] }
 0x138   : > { %2773 = vmatprep.subr.bf16.mxu0 %v5361_v61  ;;  %v1333_v51 = vld [vmem:[#allocation10 + $0x4e0] sm:$0xff] }
 0x139   : > { %2858 = vmatpush1.bf16.msra.mxu1 %v5354_v56  ;;  %v5418_v56 = vcombine.low %v6838_v52, %v6842_v54 }
 0x13a   : > { %2859 = vmatprep.subr.bf16.mxu1 %v5363_v1  ;;  %v6850_v1 = vshrl.u32 %v1064_v58, 7 }
 0x13b   : > { %2774 = vmatpush1.bf16.msra.mxu0 %v5360_v63 }
 0x13c   : > { %2775 = vmatprep.subr.bf16.mxu0 %v5369_v6  ;;  %8166 = vst [vmem:[#allocation35_spill] sm:$0xff] %v6850_v1  ;;  %v1066_v6 = vadd.s32 8, %v6850_v1  ;;  %v1071_v7 = vand.u32 7, %v6850_v1 }
 0x13d   : > { %2860 = vmatpush1.bf16.msra.mxu1 %v5362_v0 }
 0x13e   : > { %2861 = vmatprep.subr.bf16.mxu1 %v5371_v12  ;;  %v1078_v8 = vand.u32 7, %v1066_v6  ;;  %vm6857_vm2 = vcmp.eq.s32.totalorder %v1071_v7, 0  ;;  %vm6905_vm5 = vcmp.eq.s32.totalorder %v1071_v7, 7 }
 0x13f   : > { %2776 = vmatpush1.bf16.msra.mxu0 %v5368_v5 }
 0x140   : > { %2777 = vmatprep.subr.bf16.mxu0 %v5377_v15  ;;  %vm6862_vm3 = vcmp.eq.s32.totalorder %v1078_v8, 0  ;;  %vm6909_vm6 = vcmp.eq.s32.totalorder %v1078_v8, 7 }
 0x141   : > { %2862 = vmatpush1.bf16.msra.mxu1 %v5370_v10 }
 0x142   : > { %2863 = vmatprep.subr.bf16.mxu1 %v5379_v16 }
 0x143   : > { %2778 = vmatpush1.bf16.msra.mxu0 %v5376_v17 }
 0x144   : > { %2779 = vmatprep.subr.bf16.mxu0 %v5385_v22 }
 0x145   : > { %2864 = vmatpush1.bf16.msra.mxu1 %v5378_v18 }
 0x146   : > { %2865 = vmatprep.subr.bf16.mxu1 %v5387_v25 }
 0x147   : > { %2780 = vmatpush1.bf16.msra.mxu0 %v5384_v23 }
 0x148   : > { %2781 = vmatprep.subr.bf16.mxu0 %v5393_v29 }
 0x149   : > { %2866 = vmatpush1.bf16.msra.mxu1 %v5386_v24 }
 0x14a   : > { %2867 = vmatprep.subr.bf16.mxu1 %v5395_v33 }
 0x14b   : > { %2782 = vmatpush1.bf16.msra.mxu0 %v5392_v31 }
 0x14c   : > { %2783 = vmatprep.subr.bf16.mxu0 %v5401_v37 }
 0x14d   : > { %2868 = vmatpush1.bf16.msra.mxu1 %v5394_v32 }
 0x14e   : > { %2869 = vmatprep.subr.bf16.mxu1 %v5403_v41 }
 0x14f   : > { %2784 = vmatpush1.bf16.msra.mxu0 %v5400_v39 }
 0x150   : > { %2785 = vmatprep.subr.bf16.mxu0 %v5409_v45 }
 0x151   : > { %2870 = vmatpush1.bf16.msra.mxu1 %v5402_v40 }
 0x152   : > { %2871 = vmatprep.subr.bf16.mxu1 %v5411_v49 }
 0x153   : > { %2786 = vmatpush1.bf16.msra.mxu0 %v5408_v47 }
 0x154   : > { %2798 = vmatprep.subr.bf16.mxu0 %v5417_v53  ;;  %v6893_v53 = vsub.s32 0, %v6850_v1 }
 0x155   : > { %2872 = vmatpush1.bf16.msra.mxu1 %v5410_v48 }
 0x156   : > { %2884 = vmatprep.subr.bf16.mxu1 %v5419_v57  ;;  %8171 = vst [vmem:[#allocation36_spill] sm:$0xff] %v6893_v53  ;;  %v6896_v57 = vsub.s32 1, %v6850_v1 }
 0x158   : > { %8172 = vst [vmem:[#allocation37_spill] sm:$0xff] %v6896_v57 }
 0x1c9   : > { %v614_v59 = vpop.f32.mrb[0].mxu0  ;;  %v657_v12 = vpop.f32.mrb[0].mxu1 }
 0x1ca   : > { %v1007_v60 = vrot.slane %v614_v59, 7  ;;  %v616_v61 = vpop.f32.mrb[1].mxu0  ;;  %v1009_v14 = vrot.slane %v657_v12, 7  ;;  %v659_v15 = vpop.f32.mrb[1].mxu1 }
 0x1cb   : > { %v618_v62 = vpop.f32.mrb[2].mxu0  ;;  %v1008_v2 = vrot.slane %v616_v61, 7  ;;  %v1010_v17 = vrot.slane %v659_v15, 7  ;;  %v661_v18 = vpop.f32.mrb[2].mxu1 }
 0x1cc   : > { %v1011_v63 = vrot.slane %v618_v62, 7  ;;  %v620_v0 = vpop.f32.mrb[3].mxu0  ;;  %v1027_v9 = vsel %vm1006_vm1, 0.0, %v1007_v60  ;;  %v1015_v21 = vrot.slane %v661_v18, 7  ;;  %v663_v22 = vpop.f32.mrb[3].mxu1  ;;  %v1029_v11 = vsel %vm1006_vm1, 0.0, %v1009_v14 }
 0x1cd   : > { %v1013_v3 = vrot.slane %v620_v0, 7  ;;  %v1028_v13 = vsel %vm1006_vm1, 0.0, %v1008_v2  ;;  %v1097_v20 = vsel %vm6857_vm2, 0.0, %v1027_v9  ;;  %v1017_v26 = vrot.slane %v663_v22, 7  ;;  %v1337_v0 = vld [vmem:[#allocation10 + $0x500] sm:$0xff] }
 0x1ce   : > { %v1012_v4 = vsel %vm1006_vm1, %v1007_v60, %v1011_v63  ;;  %v1098_v25 = vsel %vm6857_vm2, 0.0, %v1028_v13  ;;  %v1099_v27 = vsel %vm6857_vm2, 0.0, %v1029_v11  ;;  %v1016_v31 = vsel %vm1006_vm1, %v1009_v14, %v1015_v21  ;;  %v6903_v60 = vld [vmem:[%s8173_s9] sm:$0xf] }
 0x1cf   : > { %v1014_v5 = vsel %vm1006_vm1, %v1008_v2, %v1013_v3  ;;  %v1101_v30 = vsel %vm6862_vm3, 0.0, %v1012_v4  ;;  %v1103_v35 = vsel %vm6862_vm3, 0.0, %v1016_v31  ;;  %v1018_v36 = vsel %vm1006_vm1, %v1010_v17, %v1017_v26  ;;  %v1313_v26 = vld [vmem:[#allocation10 + $0x440] sm:$0xff]  ;;  %v1318_v31 = vld [vmem:[#allocation10 + $0x468] sm:$0xff] }
 0x1d0   : > { %v1102_v34 = vsel %vm6862_vm3, 0.0, %v1014_v5  ;;  %v1030_v38 = vsel %vm1006_vm1, 0.0, %v1010_v17  ;;  %v1104_v43 = vsel %vm6862_vm3, 0.0, %v1018_v36  ;;  %v1140_v9 = vrot.slane %v6903_v60, %v6893_v53  ;;  %v6937_v36 = vld [vmem:[#allocation10 + $0x488] sm:$0xff] }
 0x1d1   : > { %v1100_v39 = vsel %vm6857_vm2, 0.0, %v1030_v38  ;;  %v1144_v7 = vrot.slane %v6903_v60, %v6896_v57 }
 0x1d9   : > { %v780_v19 = vpop.f32.mrb[4].mxu0 }
 0x1da   : > { %v1119_v23 = vadd.f32 %v1097_v20, %v780_v19  ;;  %v782_v24 = vpop.f32.mrb[5].mxu0 }
 0x1db   : > { %v1120_v28 = vadd.f32 %v1098_v25, %v782_v24  ;;  %v784_v29 = vpop.f32.mrb[6].mxu0  ;;  %v823_v40 = vpop.f32.mrb[4].mxu1 }
 0x1dc   : > { %v1123_v32 = vadd.f32 %v1101_v30, %v784_v29  ;;  %v786_v33 = vpop.f32.mrb[7].mxu0  ;;  %v6884_v41 = vadd.f32 %v1099_v27, %v823_v40  ;;  %v825_v42 = vpop.f32.mrb[5].mxu1  ;;  %v1317_v30 = vld [vmem:[#allocation10 + $0x460] sm:$0xff]  ;;  %v1147_v40 = vsub.s32 2, %v6850_v1 }
 0x1dd   : > { %v1124_v37 = vadd.f32 %v1102_v34, %v786_v33  ;;  %v6888_v44 = vadd.f32 %v1100_v39, %v825_v42  ;;  %v827_v45 = vpop.f32.mrb[6].mxu1  ;;  %v6931_v33 = vld [vmem:[#allocation10 + $0x480] sm:$0xff]  ;;  %v1151_v42 = vsub.s32 3, %v6850_v1 }
 0x1de   : > { %v6890_v47 = vadd.f32 %v1103_v35, %v827_v45  ;;  %v829_v48 = vpop.f32.mrb[7].mxu1  ;;  %v6933_v34 = vld [vmem:[#allocation10 + $0x4a0] sm:$0xff] }
 0x1df   : > { %v6898_v58 = vadd.f32 %v1104_v43, %v829_v48  ;;  %v5425_v43 = vcombine.high %v1313_v26, %v1317_v30 }
 0x1e9   : > { %v946_v46 = vpop.f32.mrb[8].mxu0 }
 0x1ea   : > { %v948_v49 = vpop.f32.mrb[9].mxu0  ;;  %v1040_v62 = vrot.slane %v946_v46, 1 }
 0x1eb   : > { %v950_v59 = vpop.f32.mrb[10].mxu0  ;;  %v1043_v3 = vrot.slane %v948_v49, 1  ;;  %v5424_v49 = vcombine.low %v1313_v26, %v1317_v30 }
 0x1ec   : > { %v1041_v63 = vrot.slane %v950_v59, 1  ;;  %v952_v2 = vpop.f32.mrb[11].mxu0 }
 0x1ed   : > { %v1044_v4 = vrot.slane %v952_v2, 1  ;;  %v5433_v2 = vcombine.high %v6931_v33, %v6933_v34 }
 0x1ee   : > { %v1042_v5 = vsel %vm1039_vm4, %v1040_v62, %v1041_v63  ;;  %v1060_v6 = vsel %vm1039_vm4, %v1041_v63, 0.0 }
 0x1ef   : > { %v1111_v10 = vsel %vm6905_vm5, 0.0, %v1042_v5  ;;  %v1115_v8 = vsel %vm6909_vm6, 0.0, %v1060_v6  ;;  %v1045_v12 = vsel %vm1039_vm4, %v1043_v3, %v1044_v4  ;;  %v1061_v13 = vsel %vm1039_vm4, %v1044_v4, 0.0 }
 0x1f0   : > { %v1127_v14 = vadd.f32 %v1119_v23, %v1111_v10  ;;  %v1131_v15 = vadd.f32 %v1123_v32, %v1115_v8  ;;  %v1112_v16 = vsel %vm6905_vm5, 0.0, %v1045_v12  ;;  %v1116_v17 = vsel %vm6909_vm6, 0.0, %v1061_v13  ;;  %v1314_v23 = vld [vmem:[#allocation10 + $0x448] sm:$0xff] }
 0x1f1   : > { %v1128_v18 = vadd.f32 %v1120_v28, %v1112_v16  ;;  %v1132_v19 = vadd.f32 %v1124_v37, %v1116_v17  ;;  %v989_v28 = vpop.f32.mrb[8].mxu1  ;;  %v6939_v37 = vld [vmem:[#allocation10 + $0x4a8] sm:$0xff]  ;;  %v5427_v45 = vcombine.high %v1314_v23, %v1318_v31  ;;  %v5426_v63 = vcombine.low %v1314_v23, %v1318_v31 }
 0x1f2   : > { %v1157_v20 = vadd.f32 %v1140_v9, %v1127_v14  ;;  %v1161_v21 = vadd.f32 %v1140_v9, %v1131_v15  ;;  %v1046_v38 = vrot.slane %v989_v28, 1  ;;  %v991_v39 = vpop.f32.mrb[9].mxu1  ;;  %v5435_v3 = vcombine.high %v6937_v36, %v6939_v37  ;;  %v1330_v10 = vld [vmem:[#allocation10 + $0x4c8] sm:$0xff]  ;;  %v1349_v28 = vld [vmem:[#allocation10 + $0x560] sm:$0xff] }
 0x1f3   : > { %v1158_v22 = vadd.f32 %v1144_v7, %v1128_v18  ;;  %v1162_v11 = vadd.f32 %v1144_v7, %v1132_v19  ;;  %v1049_v46 = vrot.slane %v991_v39, 1  ;;  %v993_v48 = vpop.f32.mrb[10].mxu1  ;;  %v1148_v9 = vrot.slane %v6903_v60, %v1147_v40  ;;  %v1334_v8 = vld [vmem:[#allocation10 + $0x4e8] sm:$0xff] }
 0x1f4   : > { %v1169_v24 = vmax.f32 %v1161_v21, 0.0  ;;  %v1165_v25 = vmax.f32 %v1157_v20, 0.0  ;;  %v1047_v59 = vrot.slane %v993_v48, 1  ;;  %v995_v62 = vpop.f32.mrb[11].mxu1  ;;  %v1152_v7 = vrot.slane %v6903_v60, %v1151_v42  ;;  %v1357_v48 = vld [vmem:[#allocation10 + $0x5a0] sm:$0xff] }
 0x1f5   : > { %v1170_v27 = vmax.f32 %v1162_v11, 0.0  ;;  %v1166_v29 = vmax.f32 %v1158_v22, 0.0  ;;  %v1050_v4 = vrot.slane %v995_v62, 1  ;;  %v5432_v15 = vcombine.low %v6931_v33, %v6933_v34  ;;  %v1341_v22 = vld [vmem:[#allocation10 + $0x520] sm:$0xff]  ;;  %v1338_v11 = vld [vmem:[#allocation10 + $0x508] sm:$0xff] }
 0x1f6   : > { %v6929_v32 = vpack.c.bf16 %v1169_v24, %v1165_v25  ;;  %v1048_v5 = vsel %vm1039_vm4, %v1046_v38, %v1047_v59  ;;  %v1062_v6 = vsel %vm1039_vm4, %v1047_v59, 0.0  ;;  %v5434_v16 = vcombine.low %v6937_v36, %v6939_v37  ;;  %v1342_v24 = vld [vmem:[#allocation10 + $0x528] sm:$0xff]  ;;  %v1345_v33 = vld [vmem:[#allocation10 + $0x540] sm:$0xff] }
 0x1f7   : > { %v6935_v35 = vpack.c.bf16 %v1170_v27, %v1166_v29  ;;  %v1113_v52 = vsel %vm6905_vm5, 0.0, %v1048_v5  ;;  %v1117_v54 = vsel %vm6909_vm6, 0.0, %v1062_v6  ;;  %v5443_v61 = vcombine.high %v1330_v10, %v1334_v8  ;;  %v1346_v36 = vld [vmem:[#allocation10 + $0x548] sm:$0xff]  ;;  %v1365_v5 = vld [vmem:[#allocation10 + $0x5e0] sm:$0xff] }
 0x1f8   : > { %v1129_v12 = vadd.f32 %v6884_v41, %v1113_v52  ;;  %v1133_v60 = vadd.f32 %v6890_v47, %v1117_v54  ;;  %v5441_v41 = vcombine.high %v1329_v50, %v1333_v51  ;;  %v5442_v29 = vcombine.low %v1330_v10, %v1334_v8  ;;  %v1350_v37 = vld [vmem:[#allocation10 + $0x568] sm:$0xff]  ;;  %v1369_v54 = vld [vmem:[#allocation10 + $0x600] sm:$0xff] }
 0x1f9   : > { %2787 = vmatprep.mubr.bf16.mxu0 %v6935_v35  ;;  %2873 = vmatprep.mubr.bf16.mxu1 %v6935_v35  ;;  %v5449_v23 = vcombine.high %v1337_v0, %v1341_v22  ;;  %v5451_v31 = vcombine.high %v1338_v11, %v1342_v24  ;;  %v5448_v38 = vcombine.low %v1337_v0, %v1341_v22  ;;  %v1358_v59 = vld [vmem:[#allocation10 + $0x5a8] sm:$0xff]  ;;  %v1389_v0 = vld [vmem:[#allocation10 + $0x6a0] sm:$0xff] }
 0x1fa   : > { %2788 = vmatmul.mubr.bf16.vlgmr.msra.gmra.mrb[12].mxu0 %v6929_v32  ;;  %2874 = vmatmul.mubr.bf16.vlgmr.msra.gmra.mrb[12].mxu1 %v6929_v32  ;;  %v1159_v47 = vadd.f32 %v1148_v9, %v1129_v12  ;;  %v1163_v19 = vadd.f32 %v1148_v9, %v1133_v60  ;;  %v5450_v39 = vcombine.low %v1338_v11, %v1342_v24  ;;  %v1362_v6 = vld [vmem:[#allocation10 + $0x5c8] sm:$0xff] }
 0x1fb   : > { %2799 = vmatpush1.bf16.msra.mxu0 %v5416_v55  ;;  %2885 = vmatpush1.bf16.msra.mxu1 %v5418_v56  ;;  %v1051_v55 = vsel %vm1039_vm4, %v1049_v46, %v1050_v4  ;;  %v1063_v56 = vsel %vm1039_vm4, %v1050_v4, 0.0  ;;  %v1353_v46 = vld [vmem:[#allocation10 + $0x580] sm:$0xff]  ;;  %v5456_v62 = vcombine.low %v1345_v33, %v1349_v28  ;;  %v1366_v9 = vld [vmem:[#allocation10 + $0x5e8] sm:$0xff] }
 0x1fc   : > { %2800 = vmatprep.subr.bf16.mxu0 %v5425_v43  ;;  %2886 = vmatprep.subr.bf16.mxu1 %v5427_v45  ;;  %v1114_v13 = vsel %vm6905_vm5, 0.0, %v1051_v55  ;;  %v1118_v14 = vsel %vm6909_vm6, 0.0, %v1063_v56  ;;  %v1171_v25 = vmax.f32 %v1163_v19, 0.0  ;;  %v1167_v26 = vmax.f32 %v1159_v47, 0.0  ;;  %v1361_v4 = vld [vmem:[#allocation10 + $0x5c0] sm:$0xff]  ;;  %v1370_v56 = vld [vmem:[#allocation10 + $0x608] sm:$0xff] }
 0x1fd   : > { %v1130_v17 = vadd.f32 %v6888_v44, %v1114_v13  ;;  %v1134_v18 = vadd.f32 %v6898_v58, %v1118_v14  ;;  %v5440_v58 = vcombine.low %v1329_v50, %v1333_v51  ;;  %v5457_v43 = vcombine.high %v1345_v33, %v1349_v28  ;;  %v1373_v55 = vld [vmem:[#allocation10 + $0x620] sm:$0xff]  ;;  %v1374_v10 = vld [vmem:[#allocation10 + $0x628] sm:$0xff] }
 0x1fe   : > { %v6983_v30 = vpack.c.bf16 %v1171_v25, %v1167_v26  ;;  %v5459_v45 = vcombine.high %v1346_v36, %v1350_v37  ;;  %v5473_v51 = vcombine.high %v1361_v4, %v1365_v5  ;;  %v5475_v52 = vcombine.high %v1362_v6, %v1366_v9  ;;  %v1377_v14 = vld [vmem:[#allocation10 + $0x640] sm:$0xff] }
 0x1ff   : > { %2801 = vmatpush1.bf16.msra.mxu0 %v5424_v49  ;;  %2887 = vmatpush1.bf16.msra.mxu1 %v5426_v63  ;;  %v1160_v20 = vadd.f32 %v1152_v7, %v1130_v17  ;;  %v1164_v21 = vadd.f32 %v1152_v7, %v1134_v18  ;;  %v1354_v49 = vld [vmem:[#allocation10 + $0x588] sm:$0xff]  ;;  %v5458_v63 = vcombine.low %v1346_v36, %v1350_v37  ;;  %v1393_v26 = vld [vmem:[#allocation10 + $0x6c0] sm:$0xff] }
 0x200   : > { %2802 = vmatprep.subr.bf16.mxu0 %v5433_v2  ;;  %2888 = vmatprep.subr.bf16.mxu1 %v5435_v3  ;;  %v5465_v2 = vcombine.high %v1353_v46, %v1357_v48  ;;  %v5467_v3 = vcombine.high %v1354_v49, %v1358_v59  ;;  %v5464_v7 = vcombine.low %v1353_v46, %v1357_v48  ;;  %v1382_v17 = vld [vmem:[#allocation10 + $0x668] sm:$0xff]  ;;  %v1401_v28 = vld [vmem:[#allocation10 + $0x700] sm:$0xff] }
 0x201   : > { %v1172_v27 = vmax.f32 %v1164_v21, 0.0  ;;  %v1168_v44 = vmax.f32 %v1160_v20, 0.0  ;;  %v5466_v50 = vcombine.low %v1354_v49, %v1358_v59  ;;  %v5472_v8 = vcombine.low %v1361_v4, %v1365_v5  ;;  %v1386_v20 = vld [vmem:[#allocation10 + $0x688] sm:$0xff]  ;;  %v1405_v36 = vld [vmem:[#allocation10 + $0x720] sm:$0xff] }
 0x202   : > { %v5474_v12 = vcombine.low %v1362_v6, %v1366_v9  ;;  %v5481_v60 = vcombine.high %v1369_v54, %v1373_v55  ;;  %v5483_v13 = vcombine.high %v1370_v56, %v1374_v10  ;;  %v5480_v18 = vcombine.low %v1369_v54, %v1373_v55  ;;  %v1390_v21 = vld [vmem:[#allocation10 + $0x6a8] sm:$0xff]  ;;  %v1409_v48 = vld [vmem:[#allocation10 + $0x740] sm:$0xff] }
 0x203   : > { %2803 = vmatpush1.bf16.msra.mxu0 %v5432_v15  ;;  %2889 = vmatpush1.bf16.msra.mxu1 %v5434_v16  ;;  %v6985_v34 = vpack.c.bf16 %v1172_v27, %v1168_v44  ;;  %v1381_v15 = vld [vmem:[#allocation10 + $0x660] sm:$0xff]  ;;  %v1378_v16 = vld [vmem:[#allocation10 + $0x648] sm:$0xff]  ;;  %v5499_v25 = vcombine.high %v1386_v20, %v1390_v21 }
 0x204   : > { %2804 = vmatprep.subr.bf16.mxu0 %v5441_v41  ;;  %2890 = vmatprep.subr.bf16.mxu1 %v5443_v61  ;;  %v5482_v41 = vcombine.low %v1370_v56, %v1374_v10  ;;  %v5489_v47 = vcombine.high %v1377_v14, %v1381_v15  ;;  %v5491_v19 = vcombine.high %v1378_v16, %v1382_v17  ;;  %v1385_v61 = vld [vmem:[#allocation10 + $0x680] sm:$0xff]  ;;  %v1394_v44 = vld [vmem:[#allocation10 + $0x6c8] sm:$0xff] }
 0x205   : > { %2830 = vmatprep.mubr.bf16.mxu0 %v6985_v34  ;;  %2916 = vmatprep.mubr.bf16.mxu1 %v6985_v34  ;;  %v5488_v22 = vcombine.low %v1377_v14, %v1381_v15  ;;  %v5490_v11 = vcombine.low %v1378_v16, %v1382_v17  ;;  %v5497_v24 = vcombine.high %v1385_v61, %v1389_v0  ;;  %v1397_v27 = vld [vmem:[#allocation10 + $0x6e0] sm:$0xff]  ;;  %v1402_v37 = vld [vmem:[#allocation10 + $0x708] sm:$0xff]  ;;  %v1179_v15 = vld [vmem:[#allocation10 + $0x10] sm:$0xff] }
 0x206   : > { %v1413_v49 = vld [vmem:[#allocation10 + $0x760] sm:$0xff]  ;;  %v1410_v59 = vld [vmem:[#allocation10 + $0x748] sm:$0xff]  ;;  %v1183_v16 = vld [vmem:[#allocation10 + $0x30] sm:$0xff] }
 0x207   : > { %2805 = vmatpush1.bf16.msra.mxu0 %v5440_v58  ;;  %2891 = vmatpush1.bf16.msra.mxu1 %v5442_v29  ;;  %v1398_v58 = vld [vmem:[#allocation10 + $0x6e8] sm:$0xff]  ;;  %v5496_v29 = vcombine.low %v1385_v61, %v1389_v0  ;;  %v1417_v5 = vld [vmem:[#allocation10 + $0x780] sm:$0xff]  ;;  %v1180_v17 = vld [vmem:[#allocation10 + $0x18] sm:$0xff] }
 0x208   : > { %2806 = vmatprep.subr.bf16.mxu0 %v5449_v23  ;;  %2892 = vmatprep.subr.bf16.mxu1 %v5451_v31  ;;  %v5498_v23 = vcombine.low %v1386_v20, %v1390_v21  ;;  %v5505_v31 = vcombine.high %v1393_v26, %v1397_v27  ;;  %v5507_v33 = vcombine.high %v1394_v44, %v1398_v58  ;;  %v1421_v6 = vld [vmem:[#allocation10 + $0x7a0] sm:$0xff]  ;;  %v1418_v9 = vld [vmem:[#allocation10 + $0x788] sm:$0xff]  ;;  %v1187_v0 = vld [vmem:[#allocation10 + $0x50] sm:$0xff] }
 0x209   : > { %v1425_v55 = vld [vmem:[#allocation10 + $0x7c0] sm:$0xff]  ;;  %v1426_v10 = vld [vmem:[#allocation10 + $0x7c8] sm:$0xff]  ;;  %v1191_v20 = vld [vmem:[#allocation10 + $0x70] sm:$0xff] }
 0x20a   : > { %v1429_v56 = vld [vmem:[#allocation10 + $0x7e0] sm:$0xff]  ;;  %v1188_v21 = vld [vmem:[#allocation10 + $0x58] sm:$0xff] }
 0x20b   : > { %2807 = vmatpush1.bf16.msra.mxu0 %v5448_v38  ;;  %2893 = vmatpush1.bf16.msra.mxu1 %v5450_v39  ;;  %v1406_v38 = vld [vmem:[#allocation10 + $0x728] sm:$0xff]  ;;  %v5504_v39 = vcombine.low %v1393_v26, %v1397_v27  ;;  %v1195_v27 = vld [vmem:[#allocation10 + $0x90] sm:$0xff] }
 0x20c   : > { %2808 = vmatprep.subr.bf16.mxu0 %v5457_v43  ;;  %2894 = vmatprep.subr.bf16.mxu1 %v5459_v45  ;;  %v5506_v43 = vcombine.low %v1394_v44, %v1398_v58  ;;  %v5513_v45 = vcombine.high %v1401_v28, %v1405_v36  ;;  %v5515_v46 = vcombine.high %v1402_v37, %v1406_v38  ;;  %v1199_v44 = vld [vmem:[#allocation10 + $0xb0] sm:$0xff]  ;;  %v1196_v58 = vld [vmem:[#allocation10 + $0x98] sm:$0xff] }
 0x20f   : > { %2809 = vmatpush1.bf16.msra.mxu0 %v5456_v62  ;;  %2895 = vmatpush1.bf16.msra.mxu1 %v5458_v63  ;;  %v1414_v62 = vld [vmem:[#allocation10 + $0x768] sm:$0xff]  ;;  %v5512_v63 = vcombine.low %v1401_v28, %v1405_v36  ;;  %v1203_v36 = vld [vmem:[#allocation10 + $0xd0] sm:$0xff] }
 0x210   : > { %2810 = vmatprep.subr.bf16.mxu0 %v5465_v2  ;;  %2896 = vmatprep.subr.bf16.mxu1 %v5467_v3  ;;  %v5514_v2 = vcombine.low %v1402_v37, %v1406_v38  ;;  %v5521_v3 = vcombine.high %v1409_v48, %v1413_v49  ;;  %v5523_v4 = vcombine.high %v1410_v59, %v1414_v62  ;;  %v1207_v37 = vld [vmem:[#allocation10 + $0xf0] sm:$0xff]  ;;  %v1204_v38 = vld [vmem:[#allocation10 + $0xd8] sm:$0xff] }
 0x213   : > { %2811 = vmatpush1.bf16.msra.mxu0 %v5464_v7  ;;  %2897 = vmatpush1.bf16.msra.mxu1 %v5466_v50  ;;  %v1422_v7 = vld [vmem:[#allocation10 + $0x7a8] sm:$0xff]  ;;  %v5520_v50 = vcombine.low %v1409_v48, %v1413_v49  ;;  %v1211_v49 = vld [vmem:[#allocation10 + $0x110] sm:$0xff] }
 0x214   : > { %2812 = vmatprep.subr.bf16.mxu0 %v5473_v51  ;;  %2898 = vmatprep.subr.bf16.mxu1 %v5475_v52  ;;  %v5522_v51 = vcombine.low %v1410_v59, %v1414_v62  ;;  %v5529_v52 = vcombine.high %v1417_v5, %v1421_v6  ;;  %v5531_v54 = vcombine.high %v1418_v9, %v1422_v7  ;;  %v1215_v59 = vld [vmem:[#allocation10 + $0x130] sm:$0xff]  ;;  %v1216_v62 = vld [vmem:[#allocation10 + $0x138] sm:$0xff] }
 0x217   : > { %2813 = vmatpush1.bf16.msra.mxu0 %v5472_v8  ;;  %2899 = vmatpush1.bf16.msra.mxu1 %v5474_v12  ;;  %v1430_v8 = vld [vmem:[#allocation10 + $0x7e8] sm:$0xff]  ;;  %v5528_v12 = vcombine.low %v1417_v5, %v1421_v6  ;;  %v1219_v5 = vld [vmem:[#allocation10 + $0x150] sm:$0xff] }
 0x218   : > { %2814 = vmatprep.subr.bf16.mxu0 %v5481_v60  ;;  %2900 = vmatprep.subr.bf16.mxu1 %v5483_v13  ;;  %v5530_v60 = vcombine.low %v1418_v9, %v1422_v7  ;;  %v5537_v13 = vcombine.high %v1425_v55, %v1429_v56  ;;  %v5539_v14 = vcombine.high %v1426_v10, %v1430_v8  ;;  %v1223_v6 = vld [vmem:[#allocation10 + $0x170] sm:$0xff]  ;;  %v1220_v9 = vld [vmem:[#allocation10 + $0x158] sm:$0xff] }
 0x219   : > { %v1224_v7 = vld [vmem:[#allocation10 + $0x178] sm:$0xff] }
 0x21b   : > { %2815 = vmatpush1.bf16.msra.mxu0 %v5480_v18  ;;  %2901 = vmatpush1.bf16.msra.mxu1 %v5482_v41  ;;  %v1184_v18 = vld [vmem:[#allocation10 + $0x38] sm:$0xff]  ;;  %v5536_v41 = vcombine.low %v1425_v55, %v1429_v56  ;;  %v1227_v55 = vld [vmem:[#allocation10 + $0x190] sm:$0xff] }
 0x21c   : > { %2816 = vmatprep.subr.bf16.mxu0 %v5489_v47  ;;  %2902 = vmatprep.subr.bf16.mxu1 %v5491_v19  ;;  %v5538_v47 = vcombine.low %v1426_v10, %v1430_v8  ;;  %v5293_v19 = vcombine.high %v1179_v15, %v1183_v16  ;;  %v5295_v61 = vcombine.high %v1180_v17, %v1184_v18  ;;  %v1231_v56 = vld [vmem:[#allocation10 + $0x1b0] sm:$0xff]  ;;  %v1228_v10 = vld [vmem:[#allocation10 + $0x198] sm:$0xff] }
 0x21d   : > { %v1232_v8 = vld [vmem:[#allocation10 + $0x1b8] sm:$0xff] }
 0x21f   : > { %2817 = vmatpush1.bf16.msra.mxu0 %v5488_v22  ;;  %2903 = vmatpush1.bf16.msra.mxu1 %v5490_v11  ;;  %v1192_v22 = vld [vmem:[#allocation10 + $0x78] sm:$0xff]  ;;  %v5292_v11 = vcombine.low %v1179_v15, %v1183_v16  ;;  %v1235_v15 = vld [vmem:[#allocation10 + $0x1d0] sm:$0xff] }
 0x220   : > { %2818 = vmatprep.subr.bf16.mxu0 %v5497_v24  ;;  %2904 = vmatprep.subr.bf16.mxu1 %v5499_v25  ;;  %v5294_v24 = vcombine.low %v1180_v17, %v1184_v18  ;;  %v5301_v25 = vcombine.high %v1187_v0, %v1191_v20  ;;  %v5303_v26 = vcombine.high %v1188_v21, %v1192_v22  ;;  %v1239_v16 = vld [vmem:[#allocation10 + $0x1f0] sm:$0xff]  ;;  %v1236_v17 = vld [vmem:[#allocation10 + $0x1d8] sm:$0xff] }
 0x221   : > { %v1240_v18 = vld [vmem:[#allocation10 + $0x1f8] sm:$0xff] }
 0x223   : > { %2819 = vmatpush1.bf16.msra.mxu0 %v5496_v29  ;;  %2905 = vmatpush1.bf16.msra.mxu1 %v5498_v23  ;;  %v1200_v29 = vld [vmem:[#allocation10 + $0xb8] sm:$0xff]  ;;  %v5300_v23 = vcombine.low %v1187_v0, %v1191_v20  ;;  %v1243_v0 = vld [vmem:[#allocation10 + $0x210] sm:$0xff] }
 0x224   : > { %2820 = vmatprep.subr.bf16.mxu0 %v5505_v31  ;;  %2906 = vmatprep.subr.bf16.mxu1 %v5507_v33  ;;  %v5302_v31 = vcombine.low %v1188_v21, %v1192_v22  ;;  %v5309_v33 = vcombine.high %v1195_v27, %v1199_v44  ;;  %v5311_v28 = vcombine.high %v1196_v58, %v1200_v29  ;;  %v1247_v20 = vld [vmem:[#allocation10 + $0x230] sm:$0xff]  ;;  %v1244_v21 = vld [vmem:[#allocation10 + $0x218] sm:$0xff] }
 0x225   : > { %v1248_v22 = vld [vmem:[#allocation10 + $0x238] sm:$0xff] }
 0x227   : > { %2821 = vmatpush1.bf16.msra.mxu0 %v5504_v39  ;;  %2907 = vmatpush1.bf16.msra.mxu1 %v5506_v43  ;;  %v1208_v39 = vld [vmem:[#allocation10 + $0xf8] sm:$0xff]  ;;  %v5308_v43 = vcombine.low %v1195_v27, %v1199_v44  ;;  %v1251_v27 = vld [vmem:[#allocation10 + $0x250] sm:$0xff] }
 0x228   : > { %2822 = vmatprep.subr.bf16.mxu0 %v5513_v45  ;;  %2908 = vmatprep.subr.bf16.mxu1 %v5515_v46  ;;  %v5310_v45 = vcombine.low %v1196_v58, %v1200_v29  ;;  %v5317_v46 = vcombine.high %v1203_v36, %v1207_v37  ;;  %v5319_v48 = vcombine.high %v1204_v38, %v1208_v39  ;;  %v1255_v44 = vld [vmem:[#allocation10 + $0x270] sm:$0xff]  ;;  %v1252_v58 = vld [vmem:[#allocation10 + $0x258] sm:$0xff] }
 0x229   : > { %v1256_v29 = vld [vmem:[#allocation10 + $0x278] sm:$0xff] }
 0x22b   : > { %2823 = vmatpush1.bf16.msra.mxu0 %v5512_v63  ;;  %2909 = vmatpush1.bf16.msra.mxu1 %v5514_v2  ;;  %v5316_v63 = vcombine.low %v1203_v36, %v1207_v37  ;;  %v5318_v2 = vcombine.low %v1204_v38, %v1208_v39  ;;  %v1259_v36 = vld [vmem:[#allocation10 + $0x290] sm:$0xff]  ;;  %v1260_v38 = vld [vmem:[#allocation10 + $0x298] sm:$0xff] }
 0x22c   : > { %2824 = vmatprep.subr.bf16.mxu0 %v5521_v3  ;;  %2910 = vmatprep.subr.bf16.mxu1 %v5523_v4  ;;  %v5325_v3 = vcombine.high %v1211_v49, %v1215_v59  ;;  %v1263_v37 = vld [vmem:[#allocation10 + $0x2b0] sm:$0xff]  ;;  %v1264_v39 = vld [vmem:[#allocation10 + $0x2b8] sm:$0xff] }
 0x22f   : > { %2825 = vmatpush1.bf16.msra.mxu0 %v5520_v50  ;;  %2911 = vmatpush1.bf16.msra.mxu1 %v5522_v51  ;;  %v5324_v50 = vcombine.low %v1211_v49, %v1215_v59  ;;  %v1267_v49 = vld [vmem:[#allocation10 + $0x2d0] sm:$0xff] }
 0x230   : > { %2826 = vmatprep.subr.bf16.mxu0 %v5529_v52  ;;  %2912 = vmatprep.subr.bf16.mxu1 %v5531_v54  ;;  %v5333_v52 = vcombine.high %v1219_v5, %v1223_v6  ;;  %v5335_v54 = vcombine.high %v1220_v9, %v1224_v7  ;;  %v1271_v59 = vld [vmem:[#allocation10 + $0x2f0] sm:$0xff] }
 0x233   : > { %2827 = vmatpush1.bf16.msra.mxu0 %v5528_v12  ;;  %2913 = vmatpush1.bf16.msra.mxu1 %v5530_v60  ;;  %v5332_v12 = vcombine.low %v1219_v5, %v1223_v6  ;;  %v5334_v60 = vcombine.low %v1220_v9, %v1224_v7  ;;  %v1275_v5 = vld [vmem:[#allocation10 + $0x310] sm:$0xff]  ;;  %v1276_v9 = vld [vmem:[#allocation10 + $0x318] sm:$0xff] }
 0x234   : > { %2828 = vmatprep.subr.bf16.mxu0 %v5537_v13  ;;  %2914 = vmatprep.subr.bf16.mxu1 %v5539_v14  ;;  %v5341_v13 = vcombine.high %v1227_v55, %v1231_v56  ;;  %v5343_v14 = vcombine.high %v1228_v10, %v1232_v8  ;;  %v1279_v6 = vld [vmem:[#allocation10 + $0x330] sm:$0xff]  ;;  %v1280_v7 = vld [vmem:[#allocation10 + $0x338] sm:$0xff] }
 0x237   : > { %2829 = vmatpush1.bf16.msra.mxu0 %v5536_v41  ;;  %2915 = vmatpush1.bf16.msra.mxu1 %v5538_v47  ;;  %v5340_v41 = vcombine.low %v1227_v55, %v1231_v56  ;;  %v5342_v47 = vcombine.low %v1228_v10, %v1232_v8  ;;  %v1283_v55 = vld [vmem:[#allocation10 + $0x350] sm:$0xff]  ;;  %v1284_v10 = vld [vmem:[#allocation10 + $0x358] sm:$0xff] }
 0x238   : > { %2927 = vmatprep.subr.bf16.mxu0 %v5293_v19  ;;  %3013 = vmatprep.subr.bf16.mxu1 %v5295_v61  ;;  %v5349_v19 = vcombine.high %v1235_v15, %v1239_v16  ;;  %v5351_v61 = vcombine.high %v1236_v17, %v1240_v18  ;;  %v1287_v56 = vld [vmem:[#allocation10 + $0x370] sm:$0xff]  ;;  %v1288_v8 = vld [vmem:[#allocation10 + $0x378] sm:$0xff] }
 0x23a   : > { %2831 = vmatmul.mubr.bf16.vlgmr.msra.gmra.mrb[12].mxu0 %v6983_v30  ;;  %2917 = vmatmul.mubr.bf16.vlgmr.msra.gmra.mrb[12].mxu1 %v6983_v30 }
 0x23b   : > { %2928 = vmatpush1.bf16.msra.mxu0 %v5292_v11  ;;  %2959 = vmatprep.mubr.bf16.mxu0 %v6935_v35  ;;  %v5348_v11 = vcombine.low %v1235_v15, %v1239_v16  ;;  %v1291_v15 = vld [vmem:[#allocation10 + $0x390] sm:$0xff] }
 0x23c   : > { %3014 = vmatpush1.bf16.msra.mxu1 %v5294_v24  ;;  %3045 = vmatprep.mubr.bf16.mxu1 %v6935_v35  ;;  %v1212_v35 = vld [vmem:[#allocation10 + $0x118] sm:$0xff]  ;;  %v5350_v24 = vcombine.low %v1236_v17, %v1240_v18  ;;  %v1295_v16 = vld [vmem:[#allocation10 + $0x3b0] sm:$0xff] }
 0x23d   : > { %2929 = vmatprep.subr.bf16.mxu0 %v5301_v25  ;;  %3015 = vmatprep.subr.bf16.mxu1 %v5303_v26  ;;  %v5327_v4 = vcombine.high %v1212_v35, %v1216_v62  ;;  %v5326_v51 = vcombine.low %v1212_v35, %v1216_v62  ;;  %v5357_v25 = vcombine.high %v1243_v0, %v1247_v20  ;;  %v1268_v35 = vld [vmem:[#allocation10 + $0x2d8] sm:$0xff] }
 0x23e   : > { %v5359_v26 = vcombine.high %v1244_v21, %v1248_v22  ;;  %v1272_v62 = vld [vmem:[#allocation10 + $0x2f8] sm:$0xff] }
 0x23f   : > { %2930 = vmatpush1.bf16.msra.mxu0 %v5300_v23  ;;  %v5356_v23 = vcombine.low %v1243_v0, %v1247_v20  ;;  %v1292_v17 = vld [vmem:[#allocation10 + $0x398] sm:$0xff]  ;;  %v1299_v0 = vld [vmem:[#allocation10 + $0x3d0] sm:$0xff] }
 0x240   : > { %3016 = vmatpush1.bf16.msra.mxu1 %v5302_v31  ;;  %2931 = vmatprep.subr.bf16.mxu0 %v5309_v33  ;;  %v5358_v31 = vcombine.low %v1244_v21, %v1248_v22  ;;  %v5365_v33 = vcombine.high %v1251_v27, %v1255_v44  ;;  %v1296_v18 = vld [vmem:[#allocation10 + $0x3b8] sm:$0xff]  ;;  %v1303_v20 = vld [vmem:[#allocation10 + $0x3f0] sm:$0xff] }
 0x241   : > { %3017 = vmatprep.subr.bf16.mxu1 %v5311_v28  ;;  %v5367_v28 = vcombine.high %v1252_v58, %v1256_v29  ;;  %v1300_v21 = vld [vmem:[#allocation10 + $0x3d8] sm:$0xff] }
 0x242   : > { %v1304_v22 = vld [vmem:[#allocation10 + $0x3f8] sm:$0xff] }
 0x243   : > { %2932 = vmatpush1.bf16.msra.mxu0 %v5308_v43  ;;  %v5364_v43 = vcombine.low %v1251_v27, %v1255_v44  ;;  %v1307_v27 = vld [vmem:[#allocation10 + $0x410] sm:$0xff] }
 0x244   : > { %3018 = vmatpush1.bf16.msra.mxu1 %v5310_v45  ;;  %2933 = vmatprep.subr.bf16.mxu0 %v5317_v46  ;;  %v5366_v45 = vcombine.low %v1252_v58, %v1256_v29  ;;  %v5373_v46 = vcombine.high %v1259_v36, %v1263_v37  ;;  %v1311_v44 = vld [vmem:[#allocation10 + $0x430] sm:$0xff]  ;;  %v1308_v58 = vld [vmem:[#allocation10 + $0x418] sm:$0xff] }
 0x245   : > { %3019 = vmatprep.subr.bf16.mxu1 %v5319_v48  ;;  %v5375_v48 = vcombine.high %v1260_v38, %v1264_v39  ;;  %v1312_v29 = vld [vmem:[#allocation10 + $0x438] sm:$0xff] }
 0x247   : > { %2934 = vmatpush1.bf16.msra.mxu0 %v5316_v63  ;;  %v5372_v63 = vcombine.low %v1259_v36, %v1263_v37  ;;  %v1315_v36 = vld [vmem:[#allocation10 + $0x450] sm:$0xff] }
 0x248   : > { %3020 = vmatpush1.bf16.msra.mxu1 %v5318_v2  ;;  %2935 = vmatprep.subr.bf16.mxu0 %v5325_v3  ;;  %v5374_v2 = vcombine.low %v1260_v38, %v1264_v39  ;;  %v5381_v3 = vcombine.high %v1267_v49, %v1271_v59  ;;  %v1319_v37 = vld [vmem:[#allocation10 + $0x470] sm:$0xff]  ;;  %v5420_v38 = vcombine.low %v1307_v27, %v1311_v44  ;;  %v1316_v39 = vld [vmem:[#allocation10 + $0x458] sm:$0xff] }
 0x249   : > { %3021 = vmatprep.subr.bf16.mxu1 %v5327_v4  ;;  %v5383_v4 = vcombine.high %v1268_v35, %v1272_v62 }
 0x24b   : > { %2936 = vmatpush1.bf16.msra.mxu0 %v5324_v50  ;;  %v5380_v50 = vcombine.low %v1267_v49, %v1271_v59  ;;  %v1327_v49 = vld [vmem:[#allocation10 + $0x4b0] sm:$0xff] }
 0x24c   : > { %3022 = vmatpush1.bf16.msra.mxu1 %v5326_v51  ;;  %2937 = vmatprep.subr.bf16.mxu0 %v5333_v52  ;;  %v5382_v51 = vcombine.low %v1268_v35, %v1272_v62  ;;  %v5389_v52 = vcombine.high %v1275_v5, %v1279_v6  ;;  %v1324_v35 = vld [vmem:[#allocation10 + $0x498] sm:$0xff] }
 0x24d   : > { %3023 = vmatprep.subr.bf16.mxu1 %v5335_v54  ;;  %v5391_v54 = vcombine.high %v1276_v9, %v1280_v7  ;;  %v1328_v62 = vld [vmem:[#allocation10 + $0x4b8] sm:$0xff] }
 0x24f   : > { %2938 = vmatpush1.bf16.msra.mxu0 %v5332_v12  ;;  %v5388_v12 = vcombine.low %v1275_v5, %v1279_v6  ;;  %v1331_v5 = vld [vmem:[#allocation10 + $0x4d0] sm:$0xff] }
 0x250   : > { %3024 = vmatpush1.bf16.msra.mxu1 %v5334_v60  ;;  %2939 = vmatprep.subr.bf16.mxu0 %v5341_v13  ;;  %v5390_v60 = vcombine.low %v1276_v9, %v1280_v7  ;;  %v5397_v13 = vcombine.high %v1283_v55, %v1287_v56  ;;  %v1335_v6 = vld [vmem:[#allocation10 + $0x4f0] sm:$0xff]  ;;  %v1332_v9 = vld [vmem:[#allocation10 + $0x4d8] sm:$0xff] }
 0x251   : > { %3025 = vmatprep.subr.bf16.mxu1 %v5343_v14  ;;  %v5399_v14 = vcombine.high %v1284_v10, %v1288_v8  ;;  %v1336_v7 = vld [vmem:[#allocation10 + $0x4f8] sm:$0xff] }
 0x253   : > { %2940 = vmatpush1.bf16.msra.mxu0 %v5340_v41  ;;  %v5396_v41 = vcombine.low %v1283_v55, %v1287_v56  ;;  %v1343_v55 = vld [vmem:[#allocation10 + $0x530] sm:$0xff]  ;;  %v1340_v56 = vld [vmem:[#allocation10 + $0x518] sm:$0xff] }
 0x254   : > { %3026 = vmatpush1.bf16.msra.mxu1 %v5342_v47  ;;  %2941 = vmatprep.subr.bf16.mxu0 %v5349_v19  ;;  %v5398_v47 = vcombine.low %v1284_v10, %v1288_v8  ;;  %v5405_v19 = vcombine.high %v1291_v15, %v1295_v16  ;;  %v1344_v10 = vld [vmem:[#allocation10 + $0x538] sm:$0xff]  ;;  %v5446_v8 = vcombine.low %v1332_v9, %v1336_v7 }
 0x255   : > { %3027 = vmatprep.subr.bf16.mxu1 %v5351_v61  ;;  %v5407_v61 = vcombine.high %v1292_v17, %v1296_v18 }
 0x257   : > { %2942 = vmatpush1.bf16.msra.mxu0 %v5348_v11  ;;  %v5404_v11 = vcombine.low %v1291_v15, %v1295_v16  ;;  %v1348_v15 = vld [vmem:[#allocation10 + $0x558] sm:$0xff] }
 0x258   : > { %3028 = vmatpush1.bf16.msra.mxu1 %v5350_v24  ;;  %2943 = vmatprep.subr.bf16.mxu0 %v5357_v25  ;;  %v5406_v24 = vcombine.low %v1292_v17, %v1296_v18  ;;  %v5413_v25 = vcombine.high %v1299_v0, %v1303_v20  ;;  %v1352_v16 = vld [vmem:[#allocation10 + $0x578] sm:$0xff]  ;;  %v5454_v18 = vcombine.low %v1340_v56, %v1344_v10 }
 0x259   : > { %3029 = vmatprep.subr.bf16.mxu1 %v5359_v26  ;;  %v5415_v26 = vcombine.high %v1300_v21, %v1304_v22 }
 0x25b   : > { %2944 = vmatpush1.bf16.msra.mxu0 %v5356_v23  ;;  %v5412_v23 = vcombine.low %v1299_v0, %v1303_v20  ;;  %v1356_v0 = vld [vmem:[#allocation10 + $0x598] sm:$0xff] }
 0x25c   : > { %3030 = vmatpush1.bf16.msra.mxu1 %v5358_v31  ;;  %2945 = vmatprep.subr.bf16.mxu0 %v5365_v33  ;;  %v5414_v31 = vcombine.low %v1300_v21, %v1304_v22  ;;  %v5421_v33 = vcombine.high %v1307_v27, %v1311_v44  ;;  %v1360_v20 = vld [vmem:[#allocation10 + $0x5b8] sm:$0xff]  ;;  %v5462_v22 = vcombine.low %v1348_v15, %v1352_v16 }
 0x25d   : > { %3031 = vmatprep.subr.bf16.mxu1 %v5367_v28  ;;  %v5423_v28 = vcombine.high %v1308_v58, %v1312_v29  ;;  %v1364_v27 = vld [vmem:[#allocation10 + $0x5d8] sm:$0xff] }
 0x25e   : > { %v1368_v44 = vld [vmem:[#allocation10 + $0x5f8] sm:$0xff] }
 0x25f   : > { %2946 = vmatpush1.bf16.msra.mxu0 %v5364_v43  ;;  %v1320_v43 = vld [vmem:[#allocation10 + $0x478] sm:$0xff] }
 0x260   : > { %3032 = vmatpush1.bf16.msra.mxu1 %v5366_v45  ;;  %2947 = vmatprep.subr.bf16.mxu0 %v5373_v46  ;;  %v5422_v45 = vcombine.low %v1308_v58, %v1312_v29  ;;  %v5429_v46 = vcombine.high %v1315_v36, %v1319_v37  ;;  %v5431_v59 = vcombine.high %v1316_v39, %v1320_v43 }
 0x261   : > { %3033 = vmatprep.subr.bf16.mxu1 %v5375_v48  ;;  %v1323_v48 = vld [vmem:[#allocation10 + $0x490] sm:$0xff]  ;;  %v5470_v29 = vcombine.low %v1356_v0, %v1360_v20 }
 0x263   : > { %2948 = vmatpush1.bf16.msra.mxu0 %v5372_v63  ;;  %v5428_v63 = vcombine.low %v1315_v36, %v1319_v37  ;;  %v1372_v36 = vld [vmem:[#allocation10 + $0x618] sm:$0xff] }
 0x264   : > { %3034 = vmatpush1.bf16.msra.mxu1 %v5374_v2  ;;  %2949 = vmatprep.subr.bf16.mxu0 %v5381_v3  ;;  %v5430_v2 = vcombine.low %v1316_v39, %v1320_v43  ;;  %v5437_v3 = vcombine.high %v1323_v48, %v1327_v49  ;;  %v1376_v37 = vld [vmem:[#allocation10 + $0x638] sm:$0xff]  ;;  %v5478_v39 = vcombine.low %v1364_v27, %v1368_v44 }
 0x265   : > { %3035 = vmatprep.subr.bf16.mxu1 %v5383_v4  ;;  %v5439_v4 = vcombine.high %v1324_v35, %v1328_v62 }
 0x267   : > { %2950 = vmatpush1.bf16.msra.mxu0 %v5380_v50  ;;  %v5436_v50 = vcombine.low %v1323_v48, %v1327_v49  ;;  %v1383_v48 = vld [vmem:[#allocation10 + $0x670] sm:$0xff]  ;;  %v1380_v49 = vld [vmem:[#allocation10 + $0x658] sm:$0xff] }
 0x268   : > { %3036 = vmatpush1.bf16.msra.mxu1 %v5382_v51  ;;  %2951 = vmatprep.subr.bf16.mxu0 %v5389_v52  ;;  %v5445_v51 = vcombine.high %v1331_v5, %v1335_v6  ;;  %v5447_v52 = vcombine.high %v1332_v9, %v1336_v7 }
 0x269   : > { %3037 = vmatprep.subr.bf16.mxu1 %v5391_v54  ;;  %v1339_v54 = vld [vmem:[#allocation10 + $0x510] sm:$0xff] }
 0x26a   : > { %v5452_v17 = vcombine.low %v1339_v54, %v1343_v55 }
 0x26b   : > { %2952 = vmatpush1.bf16.msra.mxu0 %v5388_v12  ;;  %v5453_v12 = vcombine.high %v1339_v54, %v1343_v55  ;;  %v1396_v54 = vld [vmem:[#allocation10 + $0x6d8] sm:$0xff] }
 0x26c   : > { %3038 = vmatpush1.bf16.msra.mxu1 %v5390_v60  ;;  %2953 = vmatprep.subr.bf16.mxu0 %v5397_v13  ;;  %v5455_v60 = vcombine.high %v1340_v56, %v1344_v10  ;;  %v1347_v13 = vld [vmem:[#allocation10 + $0x550] sm:$0xff]  ;;  %v1400_v55 = vld [vmem:[#allocation10 + $0x6f8] sm:$0xff] }
 0x26d   : > { %3039 = vmatprep.subr.bf16.mxu1 %v5399_v14  ;;  %v1351_v14 = vld [vmem:[#allocation10 + $0x570] sm:$0xff] }
 0x26e   : > { %v5460_v21 = vcombine.low %v1347_v13, %v1351_v14 }
 0x26f   : > { %2954 = vmatpush1.bf16.msra.mxu0 %v5396_v41  ;;  %v5461_v41 = vcombine.high %v1347_v13, %v1351_v14  ;;  %v1404_v13 = vld [vmem:[#allocation10 + $0x718] sm:$0xff] }
 0x270   : > { %3040 = vmatpush1.bf16.msra.mxu1 %v5398_v47  ;;  %2955 = vmatprep.subr.bf16.mxu0 %v5405_v19  ;;  %v5463_v47 = vcombine.high %v1348_v15, %v1352_v16  ;;  %v1355_v19 = vld [vmem:[#allocation10 + $0x590] sm:$0xff]  ;;  %v1408_v14 = vld [vmem:[#allocation10 + $0x738] sm:$0xff]  ;;  %v5510_v16 = vcombine.low %v1396_v54, %v1400_v55 }
 0x271   : > { %3041 = vmatprep.subr.bf16.mxu1 %v5407_v61  ;;  %v1359_v61 = vld [vmem:[#allocation10 + $0x5b0] sm:$0xff] }
 0x272   : > { %v5468_v58 = vcombine.low %v1355_v19, %v1359_v61 }
 0x273   : > { %2956 = vmatpush1.bf16.msra.mxu0 %v5404_v11  ;;  %v5469_v11 = vcombine.high %v1355_v19, %v1359_v61  ;;  %v1412_v19 = vld [vmem:[#allocation10 + $0x758] sm:$0xff] }
 0x274   : > { %3042 = vmatpush1.bf16.msra.mxu1 %v5406_v24  ;;  %2957 = vmatprep.subr.bf16.mxu0 %v5413_v25  ;;  %v5471_v24 = vcombine.high %v1356_v0, %v1360_v20  ;;  %v1363_v25 = vld [vmem:[#allocation10 + $0x5d0] sm:$0xff]  ;;  %v1416_v61 = vld [vmem:[#allocation10 + $0x778] sm:$0xff]  ;;  %v5518_v20 = vcombine.low %v1404_v13, %v1408_v14 }
 0x275   : > { %3043 = vmatprep.subr.bf16.mxu1 %v5415_v26  ;;  %v1367_v26 = vld [vmem:[#allocation10 + $0x5f0] sm:$0xff] }
 0x277   : > { %2958 = vmatpush1.bf16.msra.mxu0 %v5412_v23  ;;  %v5477_v23 = vcombine.high %v1363_v25, %v1367_v26 }
 0x278   : > { %3044 = vmatpush1.bf16.msra.mxu1 %v5414_v31  ;;  %2970 = vmatprep.subr.bf16.mxu0 %v5421_v33  ;;  %v5479_v31 = vcombine.high %v1364_v27, %v1368_v44  ;;  %v1371_v33 = vld [vmem:[#allocation10 + $0x610] sm:$0xff]  ;;  %v5526_v44 = vcombine.low %v1412_v19, %v1416_v61 }
 0x279   : > { %3056 = vmatprep.subr.bf16.mxu1 %v5423_v28  ;;  %v1375_v28 = vld [vmem:[#allocation10 + $0x630] sm:$0xff] }
 0x27a   : > { %2960 = vmatmul.mubr.bf16.vlgmr.msra.gmra.mrb[16].mxu0 %v6929_v32  ;;  %v5485_v43 = vcombine.high %v1371_v33, %v1375_v28 }
 0x27b   : > { %3046 = vmatmul.mubr.bf16.vlgmr.msra.gmra.mrb[16].mxu1 %v6929_v32  ;;  %2971 = vmatpush1.bf16.msra.mxu0 %v5420_v38  ;;  %v5438_v32 = vcombine.low %v1324_v35, %v1328_v62  ;;  %v5476_v38 = vcombine.low %v1363_v25, %v1367_v26  ;;  %v5484_v35 = vcombine.low %v1371_v33, %v1375_v28  ;;  %v1420_v25 = vld [vmem:[#allocation10 + $0x798] sm:$0xff] }
 0x27c   : > { %3002 = vmatprep.mubr.bf16.mxu0 %v6985_v34  ;;  %3057 = vmatpush1.bf16.msra.mxu1 %v5422_v45  ;;  %v5487_v45 = vcombine.high %v1372_v36, %v1376_v37  ;;  %v5486_v62 = vcombine.low %v1372_v36, %v1376_v37  ;;  %v1424_v26 = vld [vmem:[#allocation10 + $0x7b8] sm:$0xff] }
 0x27d   : > { %3088 = vmatprep.mubr.bf16.mxu1 %v6985_v34  ;;  %2972 = vmatprep.subr.bf16.mxu0 %v5429_v46  ;;  %v5444_v34 = vcombine.low %v1331_v5, %v1335_v6  ;;  %v1379_v46 = vld [vmem:[#allocation10 + $0x650] sm:$0xff]  ;;  %v1388_v5 = vld [vmem:[#allocation10 + $0x698] sm:$0xff]  ;;  %v5534_v37 = vcombine.low %v1420_v25, %v1424_v26 }
 0x27e   : > { %3058 = vmatprep.subr.bf16.mxu1 %v5431_v59  ;;  %v1384_v59 = vld [vmem:[#allocation10 + $0x678] sm:$0xff]  ;;  %v5492_v9 = vcombine.low %v1379_v46, %v1383_v48 }
 0x27f   : > { %2973 = vmatpush1.bf16.msra.mxu0 %v5428_v63  ;;  %v5493_v63 = vcombine.high %v1379_v46, %v1383_v48  ;;  %v1392_v6 = vld [vmem:[#allocation10 + $0x6b8] sm:$0xff]  ;;  %v5494_v7 = vcombine.low %v1380_v49, %v1384_v59  ;;  %v6414_v46 = vmov 1966171168  }
 0x280   : > { %3059 = vmatpush1.bf16.msra.mxu1 %v5430_v2  ;;  %2974 = vmatprep.subr.bf16.mxu0 %v5437_v3  ;;  %v5495_v2 = vcombine.high %v1380_v49, %v1384_v59  ;;  %v1387_v3 = vld [vmem:[#allocation10 + $0x690] sm:$0xff]  ;;  %v5502_v10 = vcombine.low %v1388_v5, %v1392_v6  ;;  %v1428_v33 = vld [vmem:[#allocation10 + $0x7d8] sm:$0xff]  ;;  %v3116_v48 = vunpack.c.l.s4 %v6414_v46  ;;  %v7002_v49 = vld [vmem:[%s8178_s0] sm:$0xff] }
 0x281   : > { %3060 = vmatprep.subr.bf16.mxu1 %v5439_v4  ;;  %v1391_v4 = vld [vmem:[#allocation10 + $0x6b0] sm:$0xff]  ;;  %v1432_v28 = vld [vmem:[#allocation10 + $0x7f8] sm:$0xff]  ;;  %v1438_v59 = vrot.slane %v7002_v49, %v6893_v53  ;;  %v7081_v46 = vld [vmem:[#allocation11 + $0x60] sm:$0xff] }
 0x282   : > { %v5500_v56 = vcombine.low %v1387_v3, %v1391_v4  ;;  %v7161_v53 = vld [vmem:[#allocation11 + $0x1a0] sm:$0xff] }
 0x283   : > { %2975 = vmatpush1.bf16.msra.mxu0 %v5436_v50  ;;  %v5501_v50 = vcombine.high %v1387_v3, %v1391_v4 }
 0x284   : > { %3061 = vmatpush1.bf16.msra.mxu1 %v5438_v32  ;;  %2976 = vmatprep.subr.bf16.mxu0 %v5445_v51  ;;  %v5503_v32 = vcombine.high %v1388_v5, %v1392_v6  ;;  %v1395_v51 = vld [vmem:[#allocation10 + $0x6d0] sm:$0xff] }
 0x285   : > { %3062 = vmatprep.subr.bf16.mxu1 %v5447_v52  ;;  %v1399_v52 = vld [vmem:[#allocation10 + $0x6f0] sm:$0xff] }
 0x286   : > { %v5508_v15 = vcombine.low %v1395_v51, %v1399_v52 }
 0x287   : > { %2977 = vmatpush1.bf16.msra.mxu0 %v5444_v34  ;;  %v5509_v34 = vcombine.high %v1395_v51, %v1399_v52 }
 0x288   : > { %3063 = vmatpush1.bf16.msra.mxu1 %v5446_v8  ;;  %2978 = vmatprep.subr.bf16.mxu0 %v5453_v12  ;;  %v5511_v8 = vcombine.high %v1396_v54, %v1400_v55  ;;  %v1403_v12 = vld [vmem:[#allocation10 + $0x710] sm:$0xff] }
 0x289   : > { %3064 = vmatprep.subr.bf16.mxu1 %v5455_v60  ;;  %v1407_v60 = vld [vmem:[#allocation10 + $0x730] sm:$0xff] }
 0x28a   : > { %v5516_v0 = vcombine.low %v1403_v12, %v1407_v60 }
 0x28b   : > { %2979 = vmatpush1.bf16.msra.mxu0 %v5452_v17  ;;  %v5517_v17 = vcombine.high %v1403_v12, %v1407_v60 }
 0x28c   : > { %3065 = vmatpush1.bf16.msra.mxu1 %v5454_v18  ;;  %2980 = vmatprep.subr.bf16.mxu0 %v5461_v41  ;;  %v5519_v18 = vcombine.high %v1404_v13, %v1408_v14  ;;  %v1411_v41 = vld [vmem:[#allocation10 + $0x750] sm:$0xff] }
 0x28d   : > { %3066 = vmatprep.subr.bf16.mxu1 %v5463_v47  ;;  %v1415_v47 = vld [vmem:[#allocation10 + $0x770] sm:$0xff] }
 0x28e   : > { %v5524_v27 = vcombine.low %v1411_v41, %v1415_v47 }
 0x28f   : > { %2981 = vmatpush1.bf16.msra.mxu0 %v5460_v21  ;;  %v5525_v21 = vcombine.high %v1411_v41, %v1415_v47 }
 0x290   : > { %3067 = vmatpush1.bf16.msra.mxu1 %v5462_v22  ;;  %2982 = vmatprep.subr.bf16.mxu0 %v5469_v11  ;;  %v5527_v22 = vcombine.high %v1412_v19, %v1416_v61  ;;  %v1419_v11 = vld [vmem:[#allocation10 + $0x790] sm:$0xff]  ;;  %v7153_v61 = vld [vmem:[#allocation11 + $0x180] sm:$0xff] }
 0x291   : > { %3068 = vmatprep.subr.bf16.mxu1 %v5471_v24  ;;  %v1423_v24 = vld [vmem:[#allocation10 + $0x7b0] sm:$0xff] }
 0x292   : > { %v5532_v36 = vcombine.low %v1419_v11, %v1423_v24  ;;  %v7157_v19 = vld [vmem:[#allocation11 + $0x190] sm:$0xff] }
 0x293   : > { %2983 = vmatpush1.bf16.msra.mxu0 %v5468_v58  ;;  %v5533_v58 = vcombine.high %v1419_v11, %v1423_v24  ;;  %8210 = vst [vmem:[#allocation69_spill] sm:$0xff] %v7157_v19  ;;  %v7179_v19 = vld [vmem:[#allocation11 + $0x1e8] sm:$0xff] }
 0x294   : > { %3069 = vmatpush1.bf16.msra.mxu1 %v5470_v29  ;;  %2984 = vmatprep.subr.bf16.mxu0 %v5477_v23  ;;  %v5535_v29 = vcombine.high %v1420_v25, %v1424_v26  ;;  %v1427_v23 = vld [vmem:[#allocation10 + $0x7d0] sm:$0xff]  ;;  %v7145_v26 = vld [vmem:[#allocation11 + $0x160] sm:$0xff]  ;;  %8219 = vst [vmem:[#allocation78_spill] sm:$0xff] %v7179_v19 }
 0x295   : > { %3070 = vmatprep.subr.bf16.mxu1 %v5479_v31  ;;  %v1431_v31 = vld [vmem:[#allocation10 + $0x7f0] sm:$0xff] }
 0x296   : > { %v7149_v25 = vld [vmem:[#allocation11 + $0x170] sm:$0xff] }
 0x297   : > { %2985 = vmatpush1.bf16.msra.mxu0 %v5476_v38  ;;  %v5541_v38 = vcombine.high %v1427_v23, %v1431_v31  ;;  %8207 = vst [vmem:[#allocation66_spill] sm:$0xff] %v7149_v25  ;;  %v7171_v25 = vld [vmem:[#allocation11 + $0x1c8] sm:$0xff] }
 0x298   : > { %3071 = vmatpush1.bf16.msra.mxu1 %v5478_v39  ;;  %2986 = vmatprep.subr.bf16.mxu0 %v5485_v43  ;;  %v5543_v39 = vcombine.high %v1428_v33, %v1432_v28  ;;  %v5540_v43 = vcombine.low %v1427_v23, %v1431_v31  ;;  %v7061_v23 = vld [vmem:[#allocation11 + $0x10] sm:$0xff]  ;;  %v7063_v31 = vld [vmem:[#allocation11 + $0x18] sm:$0xff]  ;;  %8215 = vst [vmem:[#allocation74_spill] sm:$0xff] %v7171_v25 }
 0x299   : > { %3072 = vmatprep.subr.bf16.mxu1 %v5487_v45  ;;  %v5542_v45 = vcombine.low %v1428_v33, %v1432_v28  ;;  %8179 = vst [vmem:[#allocation38_spill] sm:$0xff] %v7061_v23  ;;  %8180 = vst [vmem:[#allocation39_spill] sm:$0xff] %v7063_v31  ;;  %v7065_v33 = vld [vmem:[#allocation11 + $0x20] sm:$0xff]  ;;  %v7067_v28 = vld [vmem:[#allocation11 + $0x28] sm:$0xff] }
 0x29a   : > { %v7231_v31 = vld [vmem:[#allocation11 + $0x2b8] sm:$0xff] }
 0x29b   : > { %2987 = vmatpush1.bf16.msra.mxu0 %v5484_v35  ;;  %v1446_v35 = vrot.slane %v7002_v49, %v1147_v40  ;;  %8245 = vst [vmem:[#allocation104_spill] sm:$0xff] %v7231_v31  ;;  %v7239_v23 = vld [vmem:[#allocation11 + $0x2d8] sm:$0xff]  ;;  %v7253_v31 = vld [vmem:[#allocation11 + $0x310] sm:$0xff] }
 0x29c   : > { %3073 = vmatpush1.bf16.msra.mxu1 %v5486_v62  ;;  %2988 = vmatprep.subr.bf16.mxu0 %v5493_v63  ;;  %v3117_v62 = vunpack.c.0.s8 %v3116_v48  ;;  %v1442_v63 = vrot.slane %v7002_v49, %v6896_v57  ;;  %v7083_v48 = vld [vmem:[#allocation11 + $0x68] sm:$0xff]  ;;  %v7159_v57 = vld [vmem:[#allocation11 + $0x198] sm:$0xff]  ;;  %8249 = vst [vmem:[#allocation108_spill] sm:$0xff] %v7239_v23  ;;  %8256 = vst [vmem:[#allocation115_spill] sm:$0xff] %v7253_v31 }
 0x29d   : > { %3074 = vmatprep.subr.bf16.mxu1 %v5495_v2  ;;  %8211 = vst [vmem:[#allocation70_spill] sm:$0xff] %v7159_v57  ;;  %v7181_v57 = vld [vmem:[#allocation11 + $0x1f0] sm:$0xff]  ;;  %v7275_v31 = vld [vmem:[#allocation11 + $0x368] sm:$0xff] }
 0x29e   : > { %8220 = vst [vmem:[#allocation79_spill] sm:$0xff] %v7181_v57  ;;  %v7203_v57 = vld [vmem:[#allocation11 + $0x248] sm:$0xff]  ;;  %v7261_v23 = vld [vmem:[#allocation11 + $0x330] sm:$0xff]  ;;  %8267 = vst [vmem:[#allocation126_spill] sm:$0xff] %v7275_v31 }
 0x29f   : > { %2989 = vmatpush1.bf16.msra.mxu0 %v5492_v9  ;;  %8231 = vst [vmem:[#allocation90_spill] sm:$0xff] %v7203_v57  ;;  %8260 = vst [vmem:[#allocation119_spill] sm:$0xff] %v7261_v23  ;;  %v7283_v23 = vld [vmem:[#allocation11 + $0x388] sm:$0xff]  ;;  %v7297_v31 = vld [vmem:[#allocation11 + $0x3c0] sm:$0xff] }
 0x2a0   : > { %3075 = vmatpush1.bf16.msra.mxu1 %v5494_v7  ;;  %2990 = vmatprep.subr.bf16.mxu0 %v5501_v50  ;;  %v7015_v7 = vsub.s32 %v3117_v62, %v6850_v1  ;;  %v7089_v62 = vld [vmem:[#allocation11 + $0x80] sm:$0xff]  ;;  %8271 = vst [vmem:[#allocation130_spill] sm:$0xff] %v7283_v23  ;;  %8278 = vst [vmem:[#allocation137_spill] sm:$0xff] %v7297_v31  ;;  %v1457_v31 = vsub.s32 5, %v6850_v1 }
 0x2a1   : > { %3076 = vmatprep.subr.bf16.mxu1 %v5503_v32  ;;  %v7305_v23 = vld [vmem:[#allocation11 + $0x3e0] sm:$0xff] }
 0x2a2   : > { %8282 = vst [vmem:[#allocation141_spill] sm:$0xff] %v7305_v23  ;;  %v1458_v23 = vrot.slane %v7002_v49, %v1457_v31 }
 0x2a3   : > { %2991 = vmatpush1.bf16.msra.mxu0 %v5500_v56 }
 0x2a4   : > { %3077 = vmatpush1.bf16.msra.mxu1 %v5502_v10  ;;  %2992 = vmatprep.subr.bf16.mxu0 %v5509_v34 }
 0x2a5   : > { %3078 = vmatprep.subr.bf16.mxu1 %v5511_v8 }
 0x2a7   : > { %2993 = vmatpush1.bf16.msra.mxu0 %v5508_v15 }
 0x2a8   : > { %3079 = vmatpush1.bf16.msra.mxu1 %v5510_v16  ;;  %2994 = vmatprep.subr.bf16.mxu0 %v5517_v17 }
 0x2a9   : > { %3080 = vmatprep.subr.bf16.mxu1 %v5519_v18 }
 0x2ab   : > { %2995 = vmatpush1.bf16.msra.mxu0 %v5516_v0  ;;  %v7155_v0 = vld [vmem:[#allocation11 + $0x188] sm:$0xff] }
 0x2ac   : > { %3081 = vmatpush1.bf16.msra.mxu1 %v5518_v20  ;;  %2996 = vmatprep.subr.bf16.mxu0 %v5525_v21  ;;  %v7151_v20 = vld [vmem:[#allocation11 + $0x178] sm:$0xff]  ;;  %8209 = vst [vmem:[#allocation68_spill] sm:$0xff] %v7155_v0 }
 0x2ad   : > { %3082 = vmatprep.subr.bf16.mxu1 %v5527_v22  ;;  %8208 = vst [vmem:[#allocation67_spill] sm:$0xff] %v7151_v20  ;;  %v7173_v20 = vld [vmem:[#allocation11 + $0x1d0] sm:$0xff] }
 0x2ae   : > { %8216 = vst [vmem:[#allocation75_spill] sm:$0xff] %v7173_v20  ;;  %v7195_v20 = vld [vmem:[#allocation11 + $0x228] sm:$0xff] }
 0x2af   : > { %2997 = vmatpush1.bf16.msra.mxu0 %v5524_v27  ;;  %v7147_v27 = vld [vmem:[#allocation11 + $0x168] sm:$0xff]  ;;  %8227 = vst [vmem:[#allocation86_spill] sm:$0xff] %v7195_v20 }
 0x2b0   : > { %3083 = vmatpush1.bf16.msra.mxu1 %v5526_v44  ;;  %2998 = vmatprep.subr.bf16.mxu0 %v5533_v58  ;;  %v7057_v58 = vld [vmem:[#allocation11] sm:$0xff]  ;;  %v7143_v44 = vld [vmem:[#allocation11 + $0x158] sm:$0xff] }
 0x2b1   : > { %3084 = vmatprep.subr.bf16.mxu1 %v5535_v29  ;;  %v7059_v29 = vld [vmem:[#allocation11 + $0x8] sm:$0xff]  ;;  %8206 = vst [vmem:[#allocation65_spill] sm:$0xff] %v7143_v44  ;;  %v7165_v44 = vld [vmem:[#allocation11 + $0x1b0] sm:$0xff] }
 0x2b2   : > { %8212 = vst [vmem:[#allocation71_spill] sm:$0xff] %v7165_v44  ;;  %v7187_v44 = vld [vmem:[#allocation11 + $0x208] sm:$0xff] }
 0x2b3   : > { %2999 = vmatpush1.bf16.msra.mxu0 %v5532_v36  ;;  %v7069_v36 = vld [vmem:[#allocation11 + $0x30] sm:$0xff]  ;;  %8223 = vst [vmem:[#allocation82_spill] sm:$0xff] %v7187_v44 }
 0x2b4   : > { %3085 = vmatpush1.bf16.msra.mxu1 %v5534_v37  ;;  %3000 = vmatprep.subr.bf16.mxu0 %v5541_v38  ;;  %8181 = vst [vmem:[#allocation40_spill] sm:$0xff] %v7069_v36  ;;  %v7071_v37 = vld [vmem:[#allocation11 + $0x38] sm:$0xff]  ;;  %v7073_v38 = vld [vmem:[#allocation11 + $0x40] sm:$0xff] }
 0x2b5   : > { %3086 = vmatprep.subr.bf16.mxu1 %v5543_v39  ;;  %8182 = vst [vmem:[#allocation41_spill] sm:$0xff] %v7071_v37  ;;  %v7075_v39 = vld [vmem:[#allocation11 + $0x48] sm:$0xff]  ;;  %v7233_v37 = vld [vmem:[#allocation11 + $0x2c0] sm:$0xff] }
 0x2b6   : > { %8246 = vst [vmem:[#allocation105_spill] sm:$0xff] %v7233_v37  ;;  %v7241_v36 = vld [vmem:[#allocation11 + $0x2e0] sm:$0xff]  ;;  %v7255_v37 = vld [vmem:[#allocation11 + $0x318] sm:$0xff] }
 0x2b7   : > { %3001 = vmatpush1.bf16.msra.mxu0 %v5540_v43  ;;  %v7077_v43 = vld [vmem:[#allocation11 + $0x50] sm:$0xff]  ;;  %8250 = vst [vmem:[#allocation109_spill] sm:$0xff] %v7241_v36  ;;  %8257 = vst [vmem:[#allocation116_spill] sm:$0xff] %v7255_v37  ;;  %v7263_v36 = vld [vmem:[#allocation11 + $0x338] sm:$0xff] }
 0x2b8   : > { %3087 = vmatpush1.bf16.msra.mxu1 %v5542_v45  ;;  %8183 = vst [vmem:[#allocation42_spill] sm:$0xff] %v7077_v43  ;;  %v7079_v45 = vld [vmem:[#allocation11 + $0x58] sm:$0xff]  ;;  %8261 = vst [vmem:[#allocation120_spill] sm:$0xff] %v7263_v36  ;;  %v7277_v37 = vld [vmem:[#allocation11 + $0x370] sm:$0xff] }
 0x2b9   : > { %8184 = vst [vmem:[#allocation43_spill] sm:$0xff] %v7079_v45  ;;  %v7215_v45 = vld [vmem:[#allocation11 + $0x278] sm:$0xff]  ;;  %8268 = vst [vmem:[#allocation127_spill] sm:$0xff] %v7277_v37  ;;  %v7285_v36 = vld [vmem:[#allocation11 + $0x390] sm:$0xff] }
 0x2ba   : > { %3003 = vmatmul.mubr.bf16.vlgmr.msra.gmra.mrb[16].mxu0 %v6983_v30  ;;  %8237 = vst [vmem:[#allocation96_spill] sm:$0xff] %v7215_v45  ;;  %v7223_v43 = vld [vmem:[#allocation11 + $0x298] sm:$0xff]  ;;  %v7237_v45 = vld [vmem:[#allocation11 + $0x2d0] sm:$0xff]  ;;  %8272 = vst [vmem:[#allocation131_spill] sm:$0xff] %v7285_v36 }
 0x2bb   : > { %3089 = vmatmul.mubr.bf16.vlgmr.msra.gmra.mrb[16].mxu1 %v6983_v30  ;;  %v1450_v30 = vrot.slane %v7002_v49, %v1151_v42  ;;  %8241 = vst [vmem:[#allocation100_spill] sm:$0xff] %v7223_v43  ;;  %8248 = vst [vmem:[#allocation107_spill] sm:$0xff] %v7237_v45  ;;  %v7245_v43 = vld [vmem:[#allocation11 + $0x2f0] sm:$0xff]  ;;  %v7259_v45 = vld [vmem:[#allocation11 + $0x328] sm:$0xff] }
 0x2bc   : > { %8252 = vst [vmem:[#allocation111_spill] sm:$0xff] %v7245_v43  ;;  %8259 = vst [vmem:[#allocation118_spill] sm:$0xff] %v7259_v45  ;;  %v7267_v43 = vld [vmem:[#allocation11 + $0x348] sm:$0xff]  ;;  %v7281_v45 = vld [vmem:[#allocation11 + $0x380] sm:$0xff] }
 0x2bd   : > { %8263 = vst [vmem:[#allocation122_spill] sm:$0xff] %v7267_v43  ;;  %8270 = vst [vmem:[#allocation129_spill] sm:$0xff] %v7281_v45  ;;  %v7289_v43 = vld [vmem:[#allocation11 + $0x3a0] sm:$0xff]  ;;  %v7299_v37 = vld [vmem:[#allocation11 + $0x3c8] sm:$0xff] }
 0x2be   : > { %8274 = vst [vmem:[#allocation133_spill] sm:$0xff] %v7289_v43  ;;  %8279 = vst [vmem:[#allocation138_spill] sm:$0xff] %v7299_v37  ;;  %v7303_v45 = vld [vmem:[#allocation11 + $0x3d8] sm:$0xff]  ;;  %v7307_v36 = vld [vmem:[#allocation11 + $0x3e8] sm:$0xff]  ;;  %v1465_v37 = vsub.s32 7, %v6850_v1 }
 0x2bf   : > { %8281 = vst [vmem:[#allocation140_spill] sm:$0xff] %v7303_v45  ;;  %8283 = vst [vmem:[#allocation142_spill] sm:$0xff] %v7307_v36  ;;  %v7311_v43 = vld [vmem:[#allocation11 + $0x3f8] sm:$0xff] }
 0x2c0   : > { %8285 = vst [vmem:[#allocation144_spill] sm:$0xff] %v7311_v43  ;;  %v1466_v36 = vrot.slane %v7002_v49, %v1465_v37 }
 0x30d   : > { %v2832_v2 = vpop.f32.mrb[12].mxu0  ;;  %v2918_v3 = vpop.f32.mrb[12].mxu1 }
 0x30e   : > { %v5737_v4 = vadd.f32 %v2832_v2, %v1438_v59  ;;  %v5741_v5 = vadd.f32 %v2918_v3, %v1446_v35  ;;  %v2834_v6 = vpop.f32.mrb[13].mxu0  ;;  %v2920_v9 = vpop.f32.mrb[13].mxu1  ;;  %v7095_v2 = vld [vmem:[#allocation11 + $0x98] sm:$0xff]  ;;  %v7097_v3 = vld [vmem:[#allocation11 + $0xa0] sm:$0xff] }
 0x30f   : > { %v5738_v50 = vadd.f32 %v2834_v6, %v1442_v63  ;;  %v5742_v32 = vadd.f32 %v2920_v9, %v1450_v30  ;;  %v2836_v40 = vpop.f32.mrb[14].mxu0  ;;  %v2922_v51 = vpop.f32.mrb[14].mxu1  ;;  %8188 = vst [vmem:[#allocation47_spill] sm:$0xff] %v7095_v2  ;;  %8189 = vst [vmem:[#allocation48_spill] sm:$0xff] %v7097_v3  ;;  %v7103_v6 = vld [vmem:[#allocation11 + $0xb8] sm:$0xff]  ;;  %v7105_v9 = vld [vmem:[#allocation11 + $0xc0] sm:$0xff] }
 0x310   : > { %v5739_v52 = vadd.f32 %v2836_v40, %v1438_v59  ;;  %v5743_v54 = vadd.f32 %v2922_v51, %v1446_v35  ;;  %v2838_v55 = vpop.f32.mrb[15].mxu0  ;;  %v2924_v56 = vpop.f32.mrb[15].mxu1  ;;  %v7085_v59 = vld [vmem:[#allocation11 + $0x70] sm:$0xff]  ;;  %v7087_v35 = vld [vmem:[#allocation11 + $0x78] sm:$0xff]  ;;  %8192 = vst [vmem:[#allocation51_spill] sm:$0xff] %v7103_v6  ;;  %8193 = vst [vmem:[#allocation52_spill] sm:$0xff] %v7105_v9 }
 0x311   : > { %v3107_v10 = vcombine.low %v5737_v4, %v5738_v50  ;;  %v3108_v34 = vcombine.high %v5737_v4, %v5738_v50  ;;  %v3109_v42 = vcombine.low %v5741_v5, %v5742_v32  ;;  %v3110_v8 = vcombine.high %v5741_v5, %v5742_v32  ;;  %8185 = vst [vmem:[#allocation44_spill] sm:$0xff] %v7085_v59  ;;  %v7099_v4 = vld [vmem:[#allocation11 + $0xa8] sm:$0xff]  ;;  %v7101_v5 = vld [vmem:[#allocation11 + $0xb0] sm:$0xff]  ;;  %v7111_v40 = vld [vmem:[#allocation11 + $0xd8] sm:$0xff] }
 0x312   : > { %v5740_v12 = vadd.f32 %v2838_v55, %v1442_v63  ;;  %v5744_v60 = vadd.f32 %v2924_v56, %v1450_v30  ;;  %8186 = vst [vmem:[#allocation45_spill] sm:$0xff] %v7087_v35  ;;  %v7091_v63 = vld [vmem:[#allocation11 + $0x88] sm:$0xff]  ;;  %v7093_v30 = vld [vmem:[#allocation11 + $0x90] sm:$0xff]  ;;  %8190 = vst [vmem:[#allocation49_spill] sm:$0xff] %v7099_v4 }
 0x313   : > { %v7018_v13 = vrot.slane %v3107_v10, %v7015_v7  ;;  %v7021_v14 = vrot.slane %v3108_v34, %v7015_v7  ;;  %v7024_v15 = vrot.slane %v3109_v42, %v7015_v7  ;;  %v7027_v16 = vrot.slane %v3110_v8, %v7015_v7  ;;  %8187 = vst [vmem:[#allocation46_spill] sm:$0xff] %v7093_v30  ;;  %v7107_v50 = vld [vmem:[#allocation11 + $0xc8] sm:$0xff]  ;;  %v7109_v32 = vld [vmem:[#allocation11 + $0xd0] sm:$0xff]  ;;  %v7113_v51 = vld [vmem:[#allocation11 + $0xe0] sm:$0xff] }
 0x314   : > { %v3274_v17 = vcombine.low %v5739_v52, %v5740_v12  ;;  %v3275_v18 = vcombine.high %v5739_v52, %v5740_v12  ;;  %v3276_v41 = vcombine.low %v5743_v54, %v5744_v60  ;;  %v3277_v47 = vcombine.high %v5743_v54, %v5744_v60  ;;  %8191 = vst [vmem:[#allocation50_spill] sm:$0xff] %v7101_v5  ;;  %v7115_v52 = vld [vmem:[#allocation11 + $0xe8] sm:$0xff]  ;;  %v7117_v54 = vld [vmem:[#allocation11 + $0xf0] sm:$0xff]  ;;  %v7119_v55 = vld [vmem:[#allocation11 + $0xf8] sm:$0xff] }
 0x315   : > { %8194 = vst [vmem:[#allocation53_spill] sm:$0xff] %v7109_v32  ;;  %8195 = vst [vmem:[#allocation54_spill] sm:$0xff] %v7111_v40  ;;  %v7121_v56 = vld [vmem:[#allocation11 + $0x100] sm:$0xff]  ;;  %v7123_v10 = vld [vmem:[#allocation11 + $0x108] sm:$0xff] }
 0x316   : > { %v7038_v21 = vrot.slane %v3274_v17, %v7015_v7  ;;  %v7041_v22 = vrot.slane %v3275_v18, %v7015_v7  ;;  %v7044_v11 = vrot.slane %v3276_v41, %v7015_v7  ;;  %v7047_v24 = vrot.slane %v3277_v47, %v7015_v7  ;;  %8196 = vst [vmem:[#allocation55_spill] sm:$0xff] %v7117_v54  ;;  %v7125_v34 = vld [vmem:[#allocation11 + $0x110] sm:$0xff]  ;;  %v7127_v42 = vld [vmem:[#allocation11 + $0x118] sm:$0xff]  ;;  %v7129_v8 = vld [vmem:[#allocation11 + $0x120] sm:$0xff] }
 0x317   : > { %8197 = vst [vmem:[#allocation56_spill] sm:$0xff] %v7119_v55  ;;  %8198 = vst [vmem:[#allocation57_spill] sm:$0xff] %v7123_v10  ;;  %v7131_v12 = vld [vmem:[#allocation11 + $0x128] sm:$0xff]  ;;  %v7133_v60 = vld [vmem:[#allocation11 + $0x130] sm:$0xff] }
 0x318   : > { %8199 = vst [vmem:[#allocation58_spill] sm:$0xff] %v7125_v34  ;;  %8200 = vst [vmem:[#allocation59_spill] sm:$0xff] %v7127_v42  ;;  %v7135_v17 = vld [vmem:[#allocation11 + $0x138] sm:$0xff]  ;;  %v7137_v18 = vld [vmem:[#allocation11 + $0x140] sm:$0xff] }
 0x319   : > { %8201 = vst [vmem:[#allocation60_spill] sm:$0xff] %v7129_v8  ;;  %8202 = vst [vmem:[#allocation61_spill] sm:$0xff] %v7131_v12  ;;  %v7139_v41 = vld [vmem:[#allocation11 + $0x148] sm:$0xff]  ;;  %v7141_v47 = vld [vmem:[#allocation11 + $0x150] sm:$0xff] }
 0x31a   : > { %8203 = vst [vmem:[#allocation62_spill] sm:$0xff] %v7133_v60  ;;  %8204 = vst [vmem:[#allocation63_spill] sm:$0xff] %v7135_v17  ;;  %v7167_v42 = vld [vmem:[#allocation11 + $0x1b8] sm:$0xff]  ;;  %v7169_v17 = vld [vmem:[#allocation11 + $0x1c0] sm:$0xff] }
 0x31b   : > { %8205 = vst [vmem:[#allocation64_spill] sm:$0xff] %v7141_v47  ;;  %v7163_v47 = vld [vmem:[#allocation11 + $0x1a8] sm:$0xff]  ;;  %8213 = vst [vmem:[#allocation72_spill] sm:$0xff] %v7167_v42  ;;  %v7175_v34 = vld [vmem:[#allocation11 + $0x1d8] sm:$0xff] }
 0x31c   : > { %8214 = vst [vmem:[#allocation73_spill] sm:$0xff] %v7169_v17  ;;  %8217 = vst [vmem:[#allocation76_spill] sm:$0xff] %v7175_v34  ;;  %v7177_v60 = vld [vmem:[#allocation11 + $0x1e0] sm:$0xff]  ;;  %v7183_v40 = vld [vmem:[#allocation11 + $0x1f8] sm:$0xff] }
 0x31d   : > { %8218 = vst [vmem:[#allocation77_spill] sm:$0xff] %v7177_v60  ;;  %8221 = vst [vmem:[#allocation80_spill] sm:$0xff] %v7183_v40  ;;  %v7185_v55 = vld [vmem:[#allocation11 + $0x200] sm:$0xff]  ;;  %v7189_v42 = vld [vmem:[#allocation11 + $0x210] sm:$0xff] }
 0x31e   : > { %8222 = vst [vmem:[#allocation81_spill] sm:$0xff] %v7185_v55  ;;  %8224 = vst [vmem:[#allocation83_spill] sm:$0xff] %v7189_v42  ;;  %v7191_v32 = vld [vmem:[#allocation11 + $0x218] sm:$0xff]  ;;  %v7193_v54 = vld [vmem:[#allocation11 + $0x220] sm:$0xff] }
 0x31f   : > { %8225 = vst [vmem:[#allocation84_spill] sm:$0xff] %v7191_v32  ;;  %8226 = vst [vmem:[#allocation85_spill] sm:$0xff] %v7193_v54  ;;  %v7197_v34 = vld [vmem:[#allocation11 + $0x230] sm:$0xff]  ;;  %v7199_v2 = vld [vmem:[#allocation11 + $0x238] sm:$0xff] }
 0x320   : > { %8228 = vst [vmem:[#allocation87_spill] sm:$0xff] %v7197_v34  ;;  %8229 = vst [vmem:[#allocation88_spill] sm:$0xff] %v7199_v2  ;;  %v7201_v6 = vld [vmem:[#allocation11 + $0x240] sm:$0xff]  ;;  %v7205_v40 = vld [vmem:[#allocation11 + $0x250] sm:$0xff] }
 0x321   : > { %8230 = vst [vmem:[#allocation89_spill] sm:$0xff] %v7201_v6  ;;  %8232 = vst [vmem:[#allocation91_spill] sm:$0xff] %v7205_v40  ;;  %v7207_v30 = vld [vmem:[#allocation11 + $0x258] sm:$0xff]  ;;  %v7209_v5 = vld [vmem:[#allocation11 + $0x260] sm:$0xff] }
 0x322   : > { %8233 = vst [vmem:[#allocation92_spill] sm:$0xff] %v7207_v30  ;;  %8234 = vst [vmem:[#allocation93_spill] sm:$0xff] %v7209_v5  ;;  %v7211_v42 = vld [vmem:[#allocation11 + $0x268] sm:$0xff]  ;;  %v7213_v32 = vld [vmem:[#allocation11 + $0x270] sm:$0xff]  ;;  %v8286_v5 = vcombine.low %v7018_v13, %v7024_v15 }
 0x323   : > { %8235 = vst [vmem:[#allocation94_spill] sm:$0xff] %v7211_v42  ;;  %8236 = vst [vmem:[#allocation95_spill] sm:$0xff] %v7213_v32  ;;  %v7217_v35 = vld [vmem:[#allocation11 + $0x280] sm:$0xff]  ;;  %v7219_v34 = vld [vmem:[#allocation11 + $0x288] sm:$0xff] }
 0x324   : > { %8238 = vst [vmem:[#allocation97_spill] sm:$0xff] %v7217_v35  ;;  %8239 = vst [vmem:[#allocation98_spill] sm:$0xff] %v7219_v34  ;;  %v7221_v2 = vld [vmem:[#allocation11 + $0x290] sm:$0xff]  ;;  %v7225_v59 = vld [vmem:[#allocation11 + $0x2a0] sm:$0xff]  ;;  %v3185_v44 = vrot.slane %v8286_v5, %v7015_v7 }
 0x325   : > { %8240 = vst [vmem:[#allocation99_spill] sm:$0xff] %v7221_v2  ;;  %8242 = vst [vmem:[#allocation101_spill] sm:$0xff] %v7225_v59  ;;  %v7227_v40 = vld [vmem:[#allocation11 + $0x2a8] sm:$0xff]  ;;  %v7229_v30 = vld [vmem:[#allocation11 + $0x2b0] sm:$0xff] }
 0x326   : > { %8243 = vst [vmem:[#allocation102_spill] sm:$0xff] %v7227_v40  ;;  %8244 = vst [vmem:[#allocation103_spill] sm:$0xff] %v7229_v30  ;;  %v7235_v32 = vld [vmem:[#allocation11 + $0x2c8] sm:$0xff]  ;;  %v7247_v34 = vld [vmem:[#allocation11 + $0x2f8] sm:$0xff] }
 0x327   : > { %8247 = vst [vmem:[#allocation106_spill] sm:$0xff] %v7235_v32  ;;  %v7243_v2 = vld [vmem:[#allocation11 + $0x2e8] sm:$0xff]  ;;  %8253 = vst [vmem:[#allocation112_spill] sm:$0xff] %v7247_v34  ;;  %v7249_v40 = vld [vmem:[#allocation11 + $0x300] sm:$0xff] }
 0x328   : > { %8251 = vst [vmem:[#allocation110_spill] sm:$0xff] %v7243_v2  ;;  %8254 = vst [vmem:[#allocation113_spill] sm:$0xff] %v7249_v40  ;;  %v7251_v30 = vld [vmem:[#allocation11 + $0x308] sm:$0xff]  ;;  %v7257_v32 = vld [vmem:[#allocation11 + $0x320] sm:$0xff] }
 0x329   : > { %8255 = vst [vmem:[#allocation114_spill] sm:$0xff] %v7251_v30  ;;  %8258 = vst [vmem:[#allocation117_spill] sm:$0xff] %v7257_v32  ;;  %v7265_v2 = vld [vmem:[#allocation11 + $0x340] sm:$0xff]  ;;  %v7269_v34 = vld [vmem:[#allocation11 + $0x350] sm:$0xff] }
 0x32a   : > { %8262 = vst [vmem:[#allocation121_spill] sm:$0xff] %v7265_v2  ;;  %8264 = vst [vmem:[#allocation123_spill] sm:$0xff] %v7269_v34  ;;  %v7271_v40 = vld [vmem:[#allocation11 + $0x358] sm:$0xff]  ;;  %v7273_v30 = vld [vmem:[#allocation11 + $0x360] sm:$0xff] }
 0x32b   : > { %8265 = vst [vmem:[#allocation124_spill] sm:$0xff] %v7271_v40  ;;  %8266 = vst [vmem:[#allocation125_spill] sm:$0xff] %v7273_v30  ;;  %v7279_v32 = vld [vmem:[#allocation11 + $0x378] sm:$0xff]  ;;  %v7291_v34 = vld [vmem:[#allocation11 + $0x3a8] sm:$0xff] }
 0x32c   : > { %8269 = vst [vmem:[#allocation128_spill] sm:$0xff] %v7279_v32  ;;  %v7287_v2 = vld [vmem:[#allocation11 + $0x398] sm:$0xff]  ;;  %8275 = vst [vmem:[#allocation134_spill] sm:$0xff] %v7291_v34  ;;  %v7293_v40 = vld [vmem:[#allocation11 + $0x3b0] sm:$0xff] }
 0x32d   : > { %8273 = vst [vmem:[#allocation132_spill] sm:$0xff] %v7287_v2  ;;  %8276 = vst [vmem:[#allocation135_spill] sm:$0xff] %v7293_v40  ;;  %v7295_v30 = vld [vmem:[#allocation11 + $0x3b8] sm:$0xff]  ;;  %v7301_v32 = vld [vmem:[#allocation11 + $0x3d0] sm:$0xff]  ;;  %v1453_v40 = vsub.s32 4, %v6850_v1 }
 0x32e   : > { %8277 = vst [vmem:[#allocation136_spill] sm:$0xff] %v7295_v30  ;;  %8280 = vst [vmem:[#allocation139_spill] sm:$0xff] %v7301_v32  ;;  %v7309_v2 = vld [vmem:[#allocation11 + $0x3f0] sm:$0xff]  ;;  %v1461_v30 = vsub.s32 6, %v6850_v1 }
 0x32f   : > { %8284 = vst [vmem:[#allocation143_spill] sm:$0xff] %v7309_v2  ;;  %v1454_v32 = vrot.slane %v7002_v49, %v1453_v40 }
 0x330   : > { %v1462_v45 = vrot.slane %v7002_v49, %v1461_v30 }
 0x38d   : > { %v3004_v34 = vpop.f32.mrb[16].mxu0 }
 0x38e   : > { %v5745_v2 = vadd.f32 %v3004_v34, %v1454_v32  ;;  %v3090_v35 = vpop.f32.mrb[16].mxu1  ;;  %v3006_v43 = vpop.f32.mrb[17].mxu0 }
 0x38f   : > { %v5749_v59 = vadd.f32 %v3090_v35, %v1462_v45  ;;  %v5746_v57 = vadd.f32 %v3006_v43, %v1458_v23  ;;  %v3092_v42 = vpop.f32.mrb[17].mxu1  ;;  %v3008_v6 = vpop.f32.mrb[18].mxu0  ;;  %v8287_v43 = vcombine.low %v7021_v14, %v7027_v16 }
 0x390   : > { %v5750_v40 = vadd.f32 %v3092_v42, %v1466_v36  ;;  %v5747_v20 = vadd.f32 %v3008_v6, %v1454_v32  ;;  %v3094_v30 = vpop.f32.mrb[18].mxu1  ;;  %v3010_v55 = vpop.f32.mrb[19].mxu0 }
 0x391   : > { %v3111_v31 = vcombine.low %v5745_v2, %v5746_v57  ;;  %v3112_v54 = vcombine.high %v5745_v2, %v5746_v57  ;;  %v5751_v49 = vadd.f32 %v3094_v30, %v1462_v45  ;;  %v5748_v37 = vadd.f32 %v3010_v55, %v1458_v23  ;;  %v3096_v34 = vpop.f32.mrb[19].mxu1 }
 0x392   : > { %v3192_v35 = vrot.slane %v8287_v43, %v7015_v7  ;;  %v3113_v25 = vcombine.low %v5749_v59, %v5750_v40  ;;  %v3114_v19 = vcombine.high %v5749_v59, %v5750_v40  ;;  %v5752_v17 = vadd.f32 %v3096_v34, %v1466_v36 }
 0x393   : > { %v3149_v60 = vrot.slane %v3111_v31, %v7015_v7  ;;  %v3156_v5 = vrot.slane %v3112_v54, %v7015_v7  ;;  %v3278_v6 = vcombine.low %v5747_v20, %v5748_v37  ;;  %v3279_v32 = vcombine.high %v5747_v20, %v5748_v37 }
 0x394   : > { %v3163_v42 = vrot.slane %v3113_v25, %v7015_v7  ;;  %v3170_v57 = vrot.slane %v3114_v19, %v7015_v7  ;;  %v3280_v23 = vcombine.low %v5751_v49, %v5752_v17  ;;  %v3281_v45 = vcombine.high %v5751_v49, %v5752_v17 }
 0x395   : > { %v8288_v2 = vcombine.high %v7018_v13, %v7024_v15  ;;  %v8289_v36 = vcombine.high %v7021_v14, %v7027_v16  ;;  %v3316_v54 = vrot.slane %v3278_v6, %v7015_v7  ;;  %v3323_v20 = vrot.slane %v3279_v32, %v7015_v7 }
 0x396   : > { %v3175_v40 = vcombine.low %v3149_v60, %v3163_v42  ;;  %v3176_v25 = vcombine.high %v3149_v60, %v3163_v42  ;;  %v3177_v30 = vcombine.low %v3156_v5, %v3170_v57  ;;  %v3178_v19 = vcombine.high %v3156_v5, %v3170_v57 }
 0x397   : > { %v3199_v55 = vrot.slane %v8288_v2, %v7015_v7  ;;  %v3206_v59 = vrot.slane %v8289_v36, %v7015_v7  ;;  %v8290_v17 = vcombine.low %v7038_v21, %v7044_v11  ;;  %v8291_v13 = vcombine.low %v7041_v22, %v7047_v24 }
 0x398   : > { %v3330_v14 = vrot.slane %v3280_v23, %v7015_v7  ;;  %v3337_v16 = vrot.slane %v3281_v45, %v7015_v7  ;;  %v3213_v49 = vrot.slane %v3175_v40, %v7015_v7  ;;  %v3220_v60 = vrot.slane %v3177_v30, %v7015_v7 }
 0x399   : > { %v3352_v31 = vrot.slane %v8290_v17, %v7015_v7  ;;  %v3359_v15 = vrot.slane %v8291_v13, %v7015_v7  ;;  %v3227_v37 = vrot.slane %v3176_v25, %v7015_v7  ;;  %v3234_v34 = vrot.slane %v3178_v19, %v7015_v7 }
 0x39a   : > { %v3342_v43 = vcombine.low %v3316_v54, %v3330_v14  ;;  %v3343_v5 = vcombine.high %v3316_v54, %v3330_v14  ;;  %v3344_v6 = vcombine.low %v3323_v20, %v3337_v16  ;;  %v3345_v32 = vcombine.high %v3323_v20, %v3337_v16 }
 0x39b   : > { %v3235_v42 = vcombine.low %v3185_v44, %v3213_v49  ;;  %v3236_v57 = vcombine.high %v3185_v44, %v3213_v49  ;;  %v3237_v2 = vcombine.low %v3192_v35, %v3220_v60  ;;  %v3238_v36 = vcombine.high %v3192_v35, %v3220_v60 }
 0x39c   : > { %v3239_v17 = vcombine.low %v3199_v55, %v3227_v37  ;;  %v3240_v23 = vcombine.high %v3199_v55, %v3227_v37  ;;  %v3241_v13 = vcombine.low %v3206_v59, %v3234_v34  ;;  %v3242_v45 = vcombine.high %v3206_v59, %v3234_v34 }
 0x39d   : > { %3251 = vst [vmem:[#allocation2] ss:$2 sm:$0xff] %v3235_v42  ;;  %3255 = vst [vmem:[#allocation2 + $0x20] ss:$2 sm:$0xff] %v3236_v57  ;;  %v3380_v40 = vrot.slane %v3342_v43, %v7015_v7  ;;  %v3387_v25 = vrot.slane %v3344_v6, %v7015_v7  ;;  %v3394_v54 = vrot.slane %v3343_v5, %v7015_v7 }
 0x39e   : > { %3259 = vst [vmem:[#allocation2 + $0x40] ss:$2 sm:$0xff] %v3237_v2  ;;  %3263 = vst [vmem:[#allocation2 + $0x60] ss:$2 sm:$0xff] %v3238_v36  ;;  %v3401_v20 = vrot.slane %v3345_v32, %v7015_v7  ;;  %v8292_v44 = vcombine.high %v7038_v21, %v7044_v11  ;;  %v8293_v55 = vcombine.high %v7041_v22, %v7047_v24  ;;  %v7371_v21 = vmov 0.0  }
 0x39f   : > { %3253 = vst [vmem:[#allocation2 + $0x10] ss:$2 sm:$0xff] %v3239_v17  ;;  %3257 = vst [vmem:[#allocation2 + $0x30] ss:$2 sm:$0xff] %v3240_v23  ;;  %v3402_v30 = vcombine.low %v3352_v31, %v3380_v40  ;;  %v3403_v19 = vcombine.high %v3352_v31, %v3380_v40  ;;  %v3404_v14 = vcombine.low %v3359_v15, %v3387_v25 }
 0x3a0   : > { %v3366_v35 = vrot.slane %v8292_v44, %v7015_v7  ;;  %v3373_v59 = vrot.slane %v8293_v55, %v7015_v7  ;;  %3261 = vst [vmem:[#allocation2 + $0x50] ss:$2 sm:$0xff] %v3241_v13  ;;  %3265 = vst [vmem:[#allocation2 + $0x70] ss:$2 sm:$0xff] %v3242_v45  ;;  %v3405_v16 = vcombine.high %v3359_v15, %v3387_v25  ;;  %v7369_v7 = vmov 0.0  }
 0x3a1   : > { %3419 = vst [vmem:[#allocation2 + $0x1] ss:$2 sm:$0xff] %v3402_v30  ;;  %3423 = vst [vmem:[#allocation2 + $0x21] ss:$2 sm:$0xff] %v3403_v19 }
 0x3a2   : > { %v3406_v49 = vcombine.low %v3366_v35, %v3394_v54  ;;  %v3407_v60 = vcombine.high %v3366_v35, %v3394_v54  ;;  %v3408_v37 = vcombine.low %v3373_v59, %v3401_v20  ;;  %v3409_v34 = vcombine.high %v3373_v59, %v3401_v20  ;;  %3427 = vst [vmem:[#allocation2 + $0x41] ss:$2 sm:$0xff] %v3404_v14 }
 0x3a3   : > { %3431 = vst [vmem:[#allocation2 + $0x61] ss:$2 sm:$0xff] %v3405_v16 }
 0x3a4   : > { %3421 = vst [vmem:[#allocation2 + $0x11] ss:$2 sm:$0xff] %v3406_v49  ;;  %3425 = vst [vmem:[#allocation2 + $0x31] ss:$2 sm:$0xff] %v3407_v60 }
 0x3a5   : > { %3429 = vst [vmem:[#allocation2 + $0x51] ss:$2 sm:$0xff] %v3408_v37  ;;  %3433 = vst [vmem:[#allocation2 + $0x71] ss:$2 sm:$0xff] %v3409_v34 }
 0x3a6 LB: >> { %v8294_v12 = vld [vmem:[#allocation61_spill] sm:$0xff]  ;;  %v8296_v9 = vld [vmem:[#allocation52_spill] sm:$0xff]  ;;  %v5547_v22 = vcombine.high %v7057_v58, %v7065_v33  ;;  %v5549_v11 = vcombine.high %v7059_v29, %v7067_v28  ;;  %v5546_v24 = vcombine.low %v7057_v58, %v7065_v33  ;;  %v5548_v31 = vcombine.low %v7059_v29, %v7067_v28  ;;  %v8301_v1 = vld [vmem:[#allocation35_spill] sm:$0xff]  ;;  %s5705_s25 = sshll.u32 %s6399_s2, 4  ;;  %s5706_s30 = sshll.u32 %s6399_s2, 2  ;;  %v6391_v7 = vphi %v7369_v7, %v4465_v7   ;;  %s6399_s2 = sphi %s7373_s2, %s3567_s2   ;;  %v6395_v21 = vphi %v7371_v21, %v4467_v21  }
 0x3a7   : >> { %v8295_v10 = vld [vmem:[#allocation57_spill] sm:$0xff]  ;;  %v8297_v8 = vld [vmem:[#allocation60_spill] sm:$0xff]  ;;  %v5555_v15 = vcombine.high %v7073_v38, %v7081_v46  ;;  %v5557_v43 = vcombine.high %v7075_v39, %v7083_v48  ;;  %v5554_v5 = vcombine.low %v7073_v38, %v7081_v46  ;;  %v5556_v6 = vcombine.low %v7075_v39, %v7083_v48  ;;  %s3572_s27 = scalar_lea.vmem [#allocation2], %s5705_s25  ;;  %s4470_s26 = scalar_lea.vmem [#allocation3], %s5706_s30 }
 0x3a8   : >> { %v8298_v4 = vld [vmem:[#allocation49_spill] sm:$0xff]  ;;  %v8299_v3 = vld [vmem:[#allocation48_spill] sm:$0xff]  ;;  %4228 = vmatprep.subr.bf16.mxu0 %v5547_v22  ;;  %4269 = vmatprep.subr.bf16.mxu1 %v5549_v11  ;;  %v5571_v36 = vcombine.high %v8296_v9, %v7113_v51  ;;  %v5573_v17 = vcombine.high %v7107_v50, %v7115_v52  ;;  %v6415_v23 = vmov 1983009808   ;;  %v5570_v45 = vcombine.low %v8296_v9, %v7113_v51  ;;  %s3567_s2 = sadd.s32 1, %s6399_s2  }
 0x3a9   : >> { %v8300_v0 = vld [vmem:[#allocation68_spill] sm:$0xff]  ;;  %4229 = vmatpush1.bf16.msra.mxu0 %v5546_v24  ;;  %4270 = vmatpush1.bf16.msra.mxu1 %v5548_v31  ;;  %v5563_v32 = vcombine.high %v7089_v62, %v8299_v3  ;;  %v5565_v42 = vcombine.high %v7091_v63, %v8298_v4  ;;  %v5562_v57 = vcombine.low %v7089_v62, %v8299_v3  ;;  %v3577_v13 = vunpack.c.l.s4 %v6415_v23  ;;  %v8302_v11 = vld [vmem:[#allocation77_spill] sm:$0xff]  ;;  %p3564_p13 = scmp.ge.s32.totalorder %s3567_s2, 8  }
 0x3aa   : >> { %4230 = vmatprep.subr.bf16.mxu0 %v5555_v15  ;;  %4271 = vmatprep.subr.bf16.mxu1 %v5557_v43  ;;  %v5564_v2 = vcombine.low %v7091_v63, %v8298_v4  ;;  %v5572_v40 = vcombine.low %v7107_v50, %v7115_v52  ;;  %v5579_v25 = vcombine.high %v7121_v56, %v8297_v8  ;;  %v8303_v24 = vld [vmem:[#allocation73_spill] sm:$0xff]  ;;  %v8304_v15 = vld [vmem:[#allocation78_spill] sm:$0xff]  ;;  %vm4624_vm7 = vcmask (%p3564_p13), 1041409  }
 0x3ab   : >> { %v5581_v54 = vcombine.high %v8295_v10, %v8294_v12  ;;  %v3578_v20 = vunpack.c.0.s8 %v3577_v13  ;;  %v5578_v44 = vcombine.low %v7121_v56, %v8297_v8  ;;  %v5580_v35 = vcombine.low %v8295_v10, %v8294_v12  ;;  %v8305_v43 = vld [vmem:[#allocation74_spill] sm:$0xff]  ;;  %v8329_v4 = vld [vmem:[#allocation121_spill] sm:$0xff] }
 0x3ac   : >> { %v5587_v55 = vcombine.high %v7137_v18, %v7145_v26  ;;  %v5589_v59 = vcombine.high %v7139_v41, %v7147_v27  ;;  %v5586_v19 = vcombine.low %v7137_v18, %v7145_v26  ;;  %v5588_v14 = vcombine.low %v7139_v41, %v7147_v27  ;;  %v8332_v9 = vld [vmem:[#allocation133_spill] sm:$0xff]  ;;  %v8335_v10 = vld [vmem:[#allocation130_spill] sm:$0xff] }
 0x3ad   : >> { %4231 = vmatpush1.bf16.msra.mxu0 %v5554_v5  ;;  %4272 = vmatpush1.bf16.msra.mxu1 %v5556_v6  ;;  %v7427_v30 = vsub.s32 %v3578_v20, %v8301_v1  ;;  %v5595_v16 = vcombine.high %v7153_v61, %v7161_v53  ;;  %v5597_v49 = vcombine.high %v8300_v0, %v7163_v47  ;;  %v8312_v20 = vld [vmem:[#allocation94_spill] sm:$0xff]  ;;  %vm4627_vm8 = vcmask (%p3564_p13), 1042434  }
 0x3ae   : >> { %4232 = vmatprep.subr.bf16.mxu0 %v5563_v32  ;;  %4273 = vmatprep.subr.bf16.mxu1 %v5565_v42  ;;  %v5594_v34 = vcombine.low %v7153_v61, %v7161_v53  ;;  %v5596_v22 = vcombine.low %v8300_v0, %v7163_v47  ;;  %v5603_v31 = vcombine.high %v8303_v24, %v8302_v11  ;;  %v8306_v42 = vld [vmem:[#allocation85_spill] sm:$0xff]  ;;  %v8326_v0 = vld [vmem:[#allocation114_spill] sm:$0xff]  ;;  %vm4630_vm9 = vcmask (%p3564_p13), 1043459  }
 0x3af   : >> { %v7438_v60 = vrot.slane %v6395_v21, %v7427_v30  ;;  %v5605_v21 = vcombine.high %v8305_v43, %v8304_v15  ;;  %v5602_v6 = vcombine.low %v8303_v24, %v8302_v11  ;;  %v5604_v32 = vcombine.low %v8305_v43, %v8304_v15 }
 0x3b0   : > { %vm4633_vm10 = vcmask (%p3564_p13), 1044484   ;;  %vm4636_vm11 = vcmask (%p3564_p13), 1045509   ;;  %vm4639_vm12 = vcmask (%p3564_p13), 1046534   ;;  %vm4642_vm13 = vcmask (%p3564_p13), 1047559  }
 0x3b1   : >> { %4233 = vmatpush1.bf16.msra.mxu0 %v5562_v57  ;;  %4274 = vmatpush1.bf16.msra.mxu1 %v5564_v2  ;;  %v3583_v37 = vcombine.high %v7438_v60, %v7438_v60  ;;  %v8307_v57 = vld [vmem:[#allocation81_spill] sm:$0xff] }
 0x3b2   : >> { %4234 = vmatprep.subr.bf16.mxu0 %v5571_v36  ;;  %4275 = vmatprep.subr.bf16.mxu1 %v5573_v17  ;;  %v5611_v2 = vcombine.high %v8307_v57, %v8306_v42  ;;  %v8308_v36 = vld [vmem:[#allocation86_spill] sm:$0xff]  ;;  %v5610_v13 = vcombine.low %v8307_v57, %v8306_v42 }
 0x3b3   : >> { %v7450_v5 = vpack.c.bf16 %v3583_v37, %v3583_v37  ;;  %v8309_v17 = vld [vmem:[#allocation82_spill] sm:$0xff] }
 0x3b4   : >> { %v5613_v23 = vcombine.high %v8309_v17, %v8308_v36  ;;  %v8317_v37 = vld [vmem:[#allocation98_spill] sm:$0xff] }
 0x3b5   : >> { %4235 = vmatpush1.bf16.msra.mxu0 %v5570_v45  ;;  %4276 = vmatpush1.bf16.msra.mxu1 %v5572_v40  ;;  %v5612_v45 = vcombine.low %v8309_v17, %v8308_v36  ;;  %v8310_v40 = vld [vmem:[#allocation93_spill] sm:$0xff] }
 0x3b6   : >> { %4236 = vmatprep.subr.bf16.mxu0 %v5579_v25  ;;  %4277 = vmatprep.subr.bf16.mxu1 %v5581_v54  ;;  %v8311_v25 = vld [vmem:[#allocation89_spill] sm:$0xff] }
 0x3b7   : >> { %4260 = vmatprep.mubr.bf16.mxu0 %v7450_v5  ;;  %4301 = vmatprep.mubr.bf16.mxu1 %v7450_v5  ;;  %v5619_v54 = vcombine.high %v8311_v25, %v8310_v40 }
 0x3b9   : >> { %4237 = vmatpush1.bf16.msra.mxu0 %v5578_v44  ;;  %4278 = vmatpush1.bf16.msra.mxu1 %v5580_v35  ;;  %v8313_v44 = vld [vmem:[#allocation90_spill] sm:$0xff] }
 0x3ba   : >> { %4238 = vmatprep.subr.bf16.mxu0 %v5587_v55  ;;  %4279 = vmatprep.subr.bf16.mxu1 %v5589_v59  ;;  %v5621_v35 = vcombine.high %v8313_v44, %v8312_v20  ;;  %v5618_v55 = vcombine.low %v8311_v25, %v8310_v40  ;;  %v5620_v59 = vcombine.low %v8313_v44, %v8312_v20 }
 0x3bd   : >> { %4239 = vmatpush1.bf16.msra.mxu0 %v5586_v19  ;;  %4280 = vmatpush1.bf16.msra.mxu1 %v5588_v14  ;;  %v8314_v19 = vld [vmem:[#allocation101_spill] sm:$0xff] }
 0x3be   : >> { %4240 = vmatprep.subr.bf16.mxu0 %v5595_v16  ;;  %4281 = vmatprep.subr.bf16.mxu1 %v5597_v49  ;;  %v8315_v14 = vld [vmem:[#allocation97_spill] sm:$0xff]  ;;  %v8316_v49 = vld [vmem:[#allocation102_spill] sm:$0xff] }
 0x3bf   : >> { %v5627_v16 = vcombine.high %v8315_v14, %v8314_v19 }
 0x3c1   : >> { %4241 = vmatpush1.bf16.msra.mxu0 %v5594_v34  ;;  %4282 = vmatpush1.bf16.msra.mxu1 %v5596_v22  ;;  %v5629_v34 = vcombine.high %v8317_v37, %v8316_v49  ;;  %v5626_v22 = vcombine.low %v8315_v14, %v8314_v19 }
 0x3c2   : >> { %4242 = vmatprep.subr.bf16.mxu0 %v5603_v31  ;;  %4283 = vmatprep.subr.bf16.mxu1 %v5605_v21  ;;  %v5628_v31 = vcombine.low %v8317_v37, %v8316_v49  ;;  %v8318_v21 = vld [vmem:[#allocation109_spill] sm:$0xff] }
 0x3c5   : >> { %4243 = vmatpush1.bf16.msra.mxu0 %v5602_v6  ;;  %4284 = vmatpush1.bf16.msra.mxu1 %v5604_v32  ;;  %v8319_v6 = vmov %v8318_v21  ;;  %v8320_v32 = vld [vmem:[#allocation105_spill] sm:$0xff] }
 0x3c6   : >> { %4244 = vmatprep.subr.bf16.mxu0 %v5611_v2  ;;  %4285 = vmatprep.subr.bf16.mxu1 %v5613_v23  ;;  %v5635_v2 = vcombine.high %v8320_v32, %v8318_v21  ;;  %v8321_v23 = vld [vmem:[#allocation110_spill] sm:$0xff]  ;;  %v8327_v21 = vld [vmem:[#allocation125_spill] sm:$0xff] }
 0x3c7   : >> { %v8328_v3 = vmov %v8327_v21 }
 0x3c9   : >> { %4245 = vmatpush1.bf16.msra.mxu0 %v5610_v13  ;;  %4286 = vmatpush1.bf16.msra.mxu1 %v5612_v45  ;;  %v8322_v13 = vld [vmem:[#allocation106_spill] sm:$0xff] }
 0x3ca   : >> { %4246 = vmatprep.subr.bf16.mxu0 %v5619_v54  ;;  %4287 = vmatprep.subr.bf16.mxu1 %v5621_v35  ;;  %v5637_v45 = vcombine.high %v8322_v13, %v8321_v23  ;;  %v5634_v54 = vcombine.low %v8320_v32, %v8319_v6  ;;  %v5636_v35 = vcombine.low %v8322_v13, %v8321_v23  ;;  %v8331_v6 = vld [vmem:[#allocation122_spill] sm:$0xff] }
 0x3cd   : >> { %4247 = vmatpush1.bf16.msra.mxu0 %v5618_v55  ;;  %4288 = vmatpush1.bf16.msra.mxu1 %v5620_v59  ;;  %v8323_v55 = vld [vmem:[#allocation117_spill] sm:$0xff] }
 0x3ce   : >> { %4248 = vmatprep.subr.bf16.mxu0 %v5627_v16  ;;  %4289 = vmatprep.subr.bf16.mxu1 %v5629_v34  ;;  %v8324_v59 = vld [vmem:[#allocation113_spill] sm:$0xff]  ;;  %v8325_v34 = vld [vmem:[#allocation118_spill] sm:$0xff] }
 0x3cf   : >> { %v5643_v16 = vcombine.high %v8324_v59, %v8323_v55  ;;  %v5645_v1 = vcombine.high %v8326_v0, %v8325_v34 }
 0x3d1   : >> { %4249 = vmatpush1.bf16.msra.mxu0 %v5626_v22  ;;  %4290 = vmatpush1.bf16.msra.mxu1 %v5628_v31  ;;  %v5642_v22 = vcombine.low %v8324_v59, %v8323_v55  ;;  %v5644_v31 = vcombine.low %v8326_v0, %v8325_v34  ;;  %v8333_v0 = vld [vmem:[#allocation129_spill] sm:$0xff] }
 0x3d2   : >> { %4250 = vmatprep.subr.bf16.mxu0 %v5635_v2  ;;  %4291 = vmatprep.subr.bf16.mxu1 %v5637_v45  ;;  %v5651_v2 = vcombine.high %v8329_v4, %v8327_v21  ;;  %v8330_v45 = vld [vmem:[#allocation126_spill] sm:$0xff]  ;;  %v8336_v21 = vld [vmem:[#allocation141_spill] sm:$0xff] }
 0x3d3   : >> { %v5653_v8 = vcombine.high %v8331_v6, %v8330_v45 }
 0x3d5   : >> { %4251 = vmatpush1.bf16.msra.mxu0 %v5634_v54  ;;  %4292 = vmatpush1.bf16.msra.mxu1 %v5636_v35  ;;  %v5650_v54 = vcombine.low %v8329_v4, %v8328_v3  ;;  %v5652_v35 = vcombine.low %v8331_v6, %v8330_v45  ;;  %v8337_v3 = vmov %v8336_v21  ;;  %v8338_v4 = vld [vmem:[#allocation137_spill] sm:$0xff]  ;;  %v8340_v6 = vld [vmem:[#allocation138_spill] sm:$0xff] }
 0x3d6   : >> { %4252 = vmatprep.subr.bf16.mxu0 %v5643_v16  ;;  %4293 = vmatprep.subr.bf16.mxu1 %v5645_v1  ;;  %v5659_v16 = vcombine.high %v8333_v0, %v8332_v9  ;;  %v8334_v1 = vld [vmem:[#allocation134_spill] sm:$0xff] }
 0x3d7   : >> { %v5661_v11 = vcombine.high %v8335_v10, %v8334_v1 }
 0x3d9   : >> { %4253 = vmatpush1.bf16.msra.mxu0 %v5642_v22  ;;  %4294 = vmatpush1.bf16.msra.mxu1 %v5644_v31  ;;  %v5658_v22 = vcombine.low %v8333_v0, %v8332_v9  ;;  %v5660_v31 = vcombine.low %v8335_v10, %v8334_v1  ;;  %v8341_v0 = vld [vmem:[#allocation40_spill] sm:$0xff]  ;;  %v8342_v1 = vld [vmem:[#allocation38_spill] sm:$0xff]  ;;  %v8344_v9 = vld [vmem:[#allocation39_spill] sm:$0xff] }
 0x3da   : >> { %4254 = vmatprep.subr.bf16.mxu0 %v5651_v2  ;;  %4295 = vmatprep.subr.bf16.mxu1 %v5653_v8  ;;  %v5667_v2 = vcombine.high %v8338_v4, %v8336_v21  ;;  %v8339_v8 = vld [vmem:[#allocation142_spill] sm:$0xff]  ;;  %v7528_v21 = vpack.c.bf16 %v7438_v60, %v7438_v60 }
 0x3db   : >> { %v5669_v12 = vcombine.high %v8340_v6, %v8339_v8 }
 0x3dd   : >> { %4255 = vmatpush1.bf16.msra.mxu0 %v5650_v54  ;;  %4296 = vmatpush1.bf16.msra.mxu1 %v5652_v35  ;;  %v5666_v54 = vcombine.low %v8338_v4, %v8337_v3  ;;  %v5668_v35 = vcombine.low %v8340_v6, %v8339_v8  ;;  %v8347_v4 = vld [vmem:[#allocation45_spill] sm:$0xff]  ;;  %v8348_v6 = vld [vmem:[#allocation43_spill] sm:$0xff] }
 0x3de   : >> { %4256 = vmatprep.subr.bf16.mxu0 %v5659_v16  ;;  %4297 = vmatprep.subr.bf16.mxu1 %v5661_v11  ;;  %v5551_v16 = vcombine.high %v8342_v1, %v8341_v0  ;;  %v8343_v11 = vld [vmem:[#allocation41_spill] sm:$0xff]  ;;  %v5561_v8 = vcombine.high %v8348_v6, %v8347_v4 }
 0x3df   : >> { %v5553_v10 = vcombine.high %v8344_v9, %v8343_v11 }
 0x3e1   : >> { %4257 = vmatpush1.bf16.msra.mxu0 %v5658_v22  ;;  %4298 = vmatpush1.bf16.msra.mxu1 %v5660_v31  ;;  %v5550_v22 = vcombine.low %v8342_v1, %v8341_v0  ;;  %v5552_v31 = vcombine.low %v8344_v9, %v8343_v11  ;;  %v8351_v0 = vld [vmem:[#allocation51_spill] sm:$0xff] }
 0x3e2   : >> { %4258 = vmatprep.subr.bf16.mxu0 %v5667_v2  ;;  %4299 = vmatprep.subr.bf16.mxu1 %v5669_v12  ;;  %v8345_v12 = vld [vmem:[#allocation44_spill] sm:$0xff]  ;;  %v8346_v2 = vld [vmem:[#allocation42_spill] sm:$0xff]  ;;  %v8352_v1 = vld [vmem:[#allocation47_spill] sm:$0xff] }
 0x3e3   : >> { %v5559_v3 = vcombine.high %v8346_v2, %v8345_v12  ;;  %v5558_v60 = vcombine.low %v8346_v2, %v8345_v12  ;;  %v5569_v9 = vcombine.high %v8352_v1, %v8351_v0 }
 0x3e5   : >> { %4259 = vmatpush1.bf16.msra.mxu0 %v5666_v54  ;;  %4300 = vmatpush1.bf16.msra.mxu1 %v5668_v35  ;;  %v5560_v54 = vcombine.low %v8348_v6, %v8347_v4  ;;  %v8350_v35 = vld [vmem:[#allocation46_spill] sm:$0xff]  ;;  %v8355_v4 = vld [vmem:[#allocation56_spill] sm:$0xff] }
 0x3e6   : >> { %4310 = vmatprep.subr.bf16.mxu0 %v5551_v16  ;;  %4351 = vmatprep.subr.bf16.mxu1 %v5553_v10  ;;  %v8349_v10 = vld [vmem:[#allocation50_spill] sm:$0xff] }
 0x3e7   : >> { %v5567_v16 = vcombine.high %v8350_v35, %v8349_v10  ;;  %v8356_v6 = vld [vmem:[#allocation54_spill] sm:$0xff] }
 0x3e8   : >> { %4261 = vmatmul.mubr.bf16.vlgmr.msra.gmra.mrb[0].mxu0 %v7528_v21  ;;  %4302 = vmatmul.mubr.bf16.vlgmr.msra.gmra.mrb[0].mxu1 %v7528_v21  ;;  %v5577_v11 = vcombine.high %v8356_v6, %v8355_v4 }
 0x3e9   : >> { %4311 = vmatpush1.bf16.msra.mxu0 %v5550_v22  ;;  %4352 = vmatpush1.bf16.msra.mxu1 %v5552_v31  ;;  %v5566_v22 = vcombine.low %v8350_v35, %v8349_v10  ;;  %v5568_v31 = vcombine.low %v8352_v1, %v8351_v0  ;;  %v8358_v0 = vld [vmem:[#allocation58_spill] sm:$0xff]  ;;  %v8360_v1 = vld [vmem:[#allocation59_spill] sm:$0xff] }
 0x3ea   : >> { %4312 = vmatprep.subr.bf16.mxu0 %v5559_v3  ;;  %4353 = vmatprep.subr.bf16.mxu1 %v5561_v8  ;;  %v8353_v3 = vld [vmem:[#allocation55_spill] sm:$0xff]  ;;  %v8354_v8 = vld [vmem:[#allocation53_spill] sm:$0xff] }
 0x3eb   : >> { %4342 = vmatprep.mubr.bf16.mxu0 %v7450_v5  ;;  %4383 = vmatprep.mubr.bf16.mxu1 %v7450_v5  ;;  %v5575_v2 = vcombine.high %v8354_v8, %v8353_v3  ;;  %v5574_v5 = vcombine.low %v8354_v8, %v8353_v3  ;;  %v8361_v3 = vld [vmem:[#allocation66_spill] sm:$0xff] }
 0x3ed   : >> { %4313 = vmatpush1.bf16.msra.mxu0 %v5558_v60  ;;  %4354 = vmatpush1.bf16.msra.mxu1 %v5560_v54  ;;  %v5576_v60 = vcombine.low %v8356_v6, %v8355_v4  ;;  %v8357_v54 = vld [vmem:[#allocation62_spill] sm:$0xff]  ;;  %v8362_v4 = vld [vmem:[#allocation64_spill] sm:$0xff]  ;;  %v8364_v6 = vld [vmem:[#allocation65_spill] sm:$0xff] }
 0x3ee   : >> { %4314 = vmatprep.subr.bf16.mxu0 %v5567_v16  ;;  %4355 = vmatprep.subr.bf16.mxu1 %v5569_v9  ;;  %v5583_v16 = vcombine.high %v8358_v0, %v8357_v54  ;;  %v8359_v9 = vld [vmem:[#allocation63_spill] sm:$0xff] }
 0x3ef   : >> { %v5585_v10 = vcombine.high %v8360_v1, %v8359_v9 }
 0x3f1   : >> { %4315 = vmatpush1.bf16.msra.mxu0 %v5566_v22  ;;  %4356 = vmatpush1.bf16.msra.mxu1 %v5568_v31  ;;  %v5582_v22 = vcombine.low %v8358_v0, %v8357_v54  ;;  %v5584_v31 = vcombine.low %v8360_v1, %v8359_v9  ;;  %v8365_v0 = vld [vmem:[#allocation71_spill] sm:$0xff]  ;;  %v8366_v1 = vld [vmem:[#allocation69_spill] sm:$0xff]  ;;  %v8368_v9 = vld [vmem:[#allocation70_spill] sm:$0xff] }
 0x3f2   : >> { %4316 = vmatprep.subr.bf16.mxu0 %v5575_v2  ;;  %4357 = vmatprep.subr.bf16.mxu1 %v5577_v11  ;;  %v5591_v2 = vcombine.high %v8362_v4, %v8361_v3  ;;  %v8363_v11 = vld [vmem:[#allocation67_spill] sm:$0xff] }
 0x3f3   : >> { %v5593_v8 = vcombine.high %v8364_v6, %v8363_v11 }
 0x3f5   : >> { %4317 = vmatpush1.bf16.msra.mxu0 %v5574_v5  ;;  %4358 = vmatpush1.bf16.msra.mxu1 %v5576_v60  ;;  %v5590_v5 = vcombine.low %v8362_v4, %v8361_v3  ;;  %v5592_v60 = vcombine.low %v8364_v6, %v8363_v11  ;;  %v8369_v3 = vld [vmem:[#allocation79_spill] sm:$0xff]  ;;  %v8372_v6 = vld [vmem:[#allocation76_spill] sm:$0xff] }
 0x3f6   : >> { %4318 = vmatprep.subr.bf16.mxu0 %v5583_v16  ;;  %4359 = vmatprep.subr.bf16.mxu1 %v5585_v10  ;;  %v5599_v16 = vcombine.high %v8366_v1, %v8365_v0  ;;  %v8367_v10 = vld [vmem:[#allocation72_spill] sm:$0xff]  ;;  %v8370_v4 = vld [vmem:[#allocation75_spill] sm:$0xff] }
 0x3f7   : >> { %v5601_v12 = vcombine.high %v8368_v9, %v8367_v10 }
 0x3f9   : >> { %4319 = vmatpush1.bf16.msra.mxu0 %v5582_v22  ;;  %4360 = vmatpush1.bf16.msra.mxu1 %v5584_v31  ;;  %v5598_v22 = vcombine.low %v8366_v1, %v8365_v0  ;;  %v5600_v31 = vcombine.low %v8368_v9, %v8367_v10  ;;  %v8373_v0 = vld [vmem:[#allocation87_spill] sm:$0xff]  ;;  %v8376_v9 = vld [vmem:[#allocation84_spill] sm:$0xff] }
 0x3fa   : >> { %4320 = vmatprep.subr.bf16.mxu0 %v5591_v2  ;;  %4361 = vmatprep.subr.bf16.mxu1 %v5593_v8  ;;  %v5607_v2 = vcombine.high %v8370_v4, %v8369_v3  ;;  %v8371_v8 = vld [vmem:[#allocation80_spill] sm:$0xff]  ;;  %v8374_v1 = vld [vmem:[#allocation83_spill] sm:$0xff] }
 0x3fb   : >> { %v5609_v11 = vcombine.high %v8372_v6, %v8371_v8 }
 0x3fd   : >> { %4321 = vmatpush1.bf16.msra.mxu0 %v5590_v5  ;;  %4362 = vmatpush1.bf16.msra.mxu1 %v5592_v60  ;;  %v5606_v5 = vcombine.low %v8370_v4, %v8369_v3  ;;  %v5608_v60 = vcombine.low %v8372_v6, %v8371_v8  ;;  %v8377_v3 = vld [vmem:[#allocation95_spill] sm:$0xff]  ;;  %v8380_v6 = vld [vmem:[#allocation92_spill] sm:$0xff] }
 0x3fe   : >> { %4322 = vmatprep.subr.bf16.mxu0 %v5599_v16  ;;  %4363 = vmatprep.subr.bf16.mxu1 %v5601_v12  ;;  %v5615_v16 = vcombine.high %v8374_v1, %v8373_v0  ;;  %v8375_v12 = vld [vmem:[#allocation88_spill] sm:$0xff]  ;;  %v8378_v4 = vld [vmem:[#allocation91_spill] sm:$0xff] }
 0x3ff   : >> { %v5617_v10 = vcombine.high %v8376_v9, %v8375_v12 }
 0x401   : >> { %4323 = vmatpush1.bf16.msra.mxu0 %v5598_v22  ;;  %4364 = vmatpush1.bf16.msra.mxu1 %v5600_v31  ;;  %v5614_v22 = vcombine.low %v8374_v1, %v8373_v0  ;;  %v5616_v31 = vcombine.low %v8376_v9, %v8375_v12  ;;  %v8381_v0 = vld [vmem:[#allocation103_spill] sm:$0xff]  ;;  %v8384_v9 = vld [vmem:[#allocation100_spill] sm:$0xff] }
 0x402   : >> { %4324 = vmatprep.subr.bf16.mxu0 %v5607_v2  ;;  %4365 = vmatprep.subr.bf16.mxu1 %v5609_v11  ;;  %v5623_v2 = vcombine.high %v8378_v4, %v8377_v3  ;;  %v8379_v11 = vld [vmem:[#allocation96_spill] sm:$0xff]  ;;  %v8382_v1 = vld [vmem:[#allocation99_spill] sm:$0xff] }
 0x403   : >> { %v5625_v8 = vcombine.high %v8380_v6, %v8379_v11 }
 0x405   : >> { %4325 = vmatpush1.bf16.msra.mxu0 %v5606_v5  ;;  %4366 = vmatpush1.bf16.msra.mxu1 %v5608_v60  ;;  %v5622_v5 = vcombine.low %v8378_v4, %v8377_v3  ;;  %v5624_v60 = vcombine.low %v8380_v6, %v8379_v11  ;;  %v8385_v3 = vld [vmem:[#allocation111_spill] sm:$0xff]  ;;  %v8388_v6 = vld [vmem:[#allocation108_spill] sm:$0xff] }
 0x406   : >> { %4326 = vmatprep.subr.bf16.mxu0 %v5615_v16  ;;  %4367 = vmatprep.subr.bf16.mxu1 %v5617_v10  ;;  %v5631_v16 = vcombine.high %v8382_v1, %v8381_v0  ;;  %v8383_v10 = vld [vmem:[#allocation104_spill] sm:$0xff]  ;;  %v8386_v4 = vld [vmem:[#allocation107_spill] sm:$0xff] }
 0x407   : >> { %v5633_v12 = vcombine.high %v8384_v9, %v8383_v10 }
 0x409   : >> { %4327 = vmatpush1.bf16.msra.mxu0 %v5614_v22  ;;  %4368 = vmatpush1.bf16.msra.mxu1 %v5616_v31  ;;  %v5630_v22 = vcombine.low %v8382_v1, %v8381_v0  ;;  %v5632_v31 = vcombine.low %v8384_v9, %v8383_v10  ;;  %v8389_v0 = vld [vmem:[#allocation119_spill] sm:$0xff]  ;;  %v8392_v9 = vld [vmem:[#allocation116_spill] sm:$0xff] }
 0x40a   : >> { %4328 = vmatprep.subr.bf16.mxu0 %v5623_v2  ;;  %4369 = vmatprep.subr.bf16.mxu1 %v5625_v8  ;;  %v5639_v2 = vcombine.high %v8386_v4, %v8385_v3  ;;  %v8387_v8 = vld [vmem:[#allocation112_spill] sm:$0xff]  ;;  %v8390_v1 = vld [vmem:[#allocation115_spill] sm:$0xff] }
 0x40b   : >> { %v5641_v11 = vcombine.high %v8388_v6, %v8387_v8 }
 0x40d   : >> { %4329 = vmatpush1.bf16.msra.mxu0 %v5622_v5  ;;  %4370 = vmatpush1.bf16.msra.mxu1 %v5624_v60  ;;  %v5638_v5 = vcombine.low %v8386_v4, %v8385_v3  ;;  %v5640_v60 = vcombine.low %v8388_v6, %v8387_v8  ;;  %v8393_v3 = vld [vmem:[#allocation127_spill] sm:$0xff]  ;;  %v8396_v6 = vld [vmem:[#allocation124_spill] sm:$0xff] }
 0x40e   : >> { %4330 = vmatprep.subr.bf16.mxu0 %v5631_v16  ;;  %4371 = vmatprep.subr.bf16.mxu1 %v5633_v12  ;;  %v5647_v16 = vcombine.high %v8390_v1, %v8389_v0  ;;  %v8391_v12 = vld [vmem:[#allocation120_spill] sm:$0xff]  ;;  %v8394_v4 = vld [vmem:[#allocation123_spill] sm:$0xff] }
 0x40f   : >> { %v5649_v10 = vcombine.high %v8392_v9, %v8391_v12 }
 0x411   : >> { %4331 = vmatpush1.bf16.msra.mxu0 %v5630_v22  ;;  %4372 = vmatpush1.bf16.msra.mxu1 %v5632_v31  ;;  %v5646_v22 = vcombine.low %v8390_v1, %v8389_v0  ;;  %v5648_v31 = vcombine.low %v8392_v9, %v8391_v12  ;;  %v8397_v0 = vld [vmem:[#allocation135_spill] sm:$0xff]  ;;  %v8400_v9 = vld [vmem:[#allocation132_spill] sm:$0xff] }
 0x412   : >> { %4332 = vmatprep.subr.bf16.mxu0 %v5639_v2  ;;  %4373 = vmatprep.subr.bf16.mxu1 %v5641_v11  ;;  %v5655_v2 = vcombine.high %v8394_v4, %v8393_v3  ;;  %v8395_v11 = vld [vmem:[#allocation128_spill] sm:$0xff]  ;;  %v8398_v1 = vld [vmem:[#allocation131_spill] sm:$0xff] }
 0x413   : >> { %v5657_v8 = vcombine.high %v8396_v6, %v8395_v11 }
 0x415   : >> { %4333 = vmatpush1.bf16.msra.mxu0 %v5638_v5  ;;  %4374 = vmatpush1.bf16.msra.mxu1 %v5640_v60  ;;  %v5654_v5 = vcombine.low %v8394_v4, %v8393_v3  ;;  %v5656_v60 = vcombine.low %v8396_v6, %v8395_v11  ;;  %v8401_v3 = vld [vmem:[#allocation143_spill] sm:$0xff]  ;;  %v8404_v6 = vld [vmem:[#allocation140_spill] sm:$0xff] }
 0x416   : >> { %4334 = vmatprep.subr.bf16.mxu0 %v5647_v16  ;;  %4375 = vmatprep.subr.bf16.mxu1 %v5649_v10  ;;  %v5663_v16 = vcombine.high %v8398_v1, %v8397_v0  ;;  %v8399_v10 = vld [vmem:[#allocation136_spill] sm:$0xff]  ;;  %v8402_v4 = vld [vmem:[#allocation139_spill] sm:$0xff] }
 0x417   : >> { %v5665_v12 = vcombine.high %v8400_v9, %v8399_v10 }
 0x419   : >> { %4335 = vmatpush1.bf16.msra.mxu0 %v5646_v22  ;;  %4376 = vmatpush1.bf16.msra.mxu1 %v5648_v31  ;;  %v5662_v22 = vcombine.low %v8398_v1, %v8397_v0  ;;  %v5664_v31 = vcombine.low %v8400_v9, %v8399_v10 }
 0x41a   : >> { %4336 = vmatprep.subr.bf16.mxu0 %v5655_v2  ;;  %4377 = vmatprep.subr.bf16.mxu1 %v5657_v8  ;;  %v5671_v2 = vcombine.high %v8402_v4, %v8401_v3  ;;  %v8403_v8 = vld [vmem:[#allocation144_spill] sm:$0xff] }
 0x41b   : >> { %v5673_v11 = vcombine.high %v8404_v6, %v8403_v8 }
 0x41d   : >> { %4337 = vmatpush1.bf16.msra.mxu0 %v5654_v5  ;;  %4378 = vmatpush1.bf16.msra.mxu1 %v5656_v60  ;;  %v5670_v5 = vcombine.low %v8402_v4, %v8401_v3  ;;  %v5672_v60 = vcombine.low %v8404_v6, %v8403_v8 }
 0x41e   : >> { %4338 = vmatprep.subr.bf16.mxu0 %v5663_v16  ;;  %4379 = vmatprep.subr.bf16.mxu1 %v5665_v12 }
 0x421   : >> { %4339 = vmatpush1.bf16.msra.mxu0 %v5662_v22  ;;  %4380 = vmatpush1.bf16.msra.mxu1 %v5664_v31 }
 0x422   : >> { %4340 = vmatprep.subr.bf16.mxu0 %v5671_v2  ;;  %4381 = vmatprep.subr.bf16.mxu1 %v5673_v11 }
 0x425   : >> { %4341 = vmatpush1.bf16.msra.mxu0 %v5670_v5  ;;  %4382 = vmatpush1.bf16.msra.mxu1 %v5672_v60  ;;  %v3573_v60 = vld [vmem:[%s3572_s27] sm:$0xff] }
 0x428   : >> { %4343 = vmatmul.mubr.bf16.vlgmr.msra.gmra.mrb[4].mxu0 %v7528_v21  ;;  %4384 = vmatmul.mubr.bf16.vlgmr.msra.gmra.mrb[4].mxu1 %v7528_v21 }
 0x4bb   : >> { %v4262_v12 = vpop.f32.mrb[0].mxu0  ;;  %v4303_v16 = vpop.f32.mrb[0].mxu1 }
 0x4bc   : >> { %v4264_v0 = vpop.f32.mrb[1].mxu0  ;;  %v4305_v22 = vpop.f32.mrb[1].mxu1 }
 0x4bd   : >> { %v4400_v31 = vcombine.low %v4262_v12, %v4264_v0  ;;  %v4401_v1 = vcombine.low %v4303_v16, %v4305_v22  ;;  %v4266_v9 = vpop.f32.mrb[2].mxu0  ;;  %v4307_v3 = vpop.f32.mrb[2].mxu1 }
 0x4be   : >> { %v4267_v4 = vpop.f32.mrb[3].mxu0  ;;  %v4308_v10 = vpop.f32.mrb[3].mxu1 }
 0x4bf   : >> { %v4408_v2 = vrot.slane %v4400_v31, %v7427_v30  ;;  %v4415_v11 = vrot.slane %v4401_v1, %v7427_v30 }
 0x4c1   : >> { %v4416_v5 = vcombine.low %v4408_v2, %v4415_v11 }
 0x4c3   : >> { %v4436_v6 = vadd.f32 %v4416_v5, %v3573_v60 }
 0x4c5   : >> { %v4445_v21 = vrot.slane %v4436_v6, 4  ;;  %v5674_v13 = vmul.f32 -1.442695, %v4436_v6 }
 0x4c7   : >> { %v5675_v8 = vmul.f32 -1.442695, %v4445_v21 }
 0x4c9   : >> { %6041 = vpow2.f32 %v5675_v8  ;;  %v3574_v8 = vld [vmem:[%s3572_s27 + $0x8] sm:$0xff] }
 0x4ca   : >> { %6043 = vpow2.f32 %v5674_v13 }
 0x4d3   : >> { %v6042_v9 = vpop.eup %6041 }
 0x4d4   : >> { %v6044_v10 = vpop.eup %6043  ;;  %v4450_v14 = vadd.f32 1.0, %v6042_v9 }
 0x4d5   : >> { %v4441_v6 = vadd.f32 1.0, %v6044_v10 }
 0x4d6   : >> { %6045 = vrcp.f32 %v4450_v14 }
 0x4d7   : >> { %6047 = vrcp.f32 %v4441_v6  ;;  %v8406_v6 = vld [vmem:[#allocation37_spill] sm:$0xff] (%p3564_p13) }
 0x4fb   : >> { %v4344_v0 = vpop.f32.mrb[4].mxu0  ;;  %v4385_v12 = vpop.f32.mrb[4].mxu1 }
 0x4fc   : >> { %v4346_v3 = vpop.f32.mrb[5].mxu0  ;;  %v4387_v4 = vpop.f32.mrb[5].mxu1 }
 0x4fd   : >> { %v4417_v16 = vcombine.low %v4344_v0, %v4346_v3  ;;  %v4418_v22 = vcombine.low %v4385_v12, %v4387_v4  ;;  %v4348_v31 = vpop.f32.mrb[6].mxu0  ;;  %v4389_v1 = vpop.f32.mrb[6].mxu1 }
 0x4fe   : >> { %v4349_v2 = vpop.f32.mrb[7].mxu0  ;;  %v4390_v11 = vpop.f32.mrb[7].mxu1 }
 0x4ff   : >> { %v4425_v5 = vrot.slane %v4417_v16, %v7427_v30  ;;  %v4432_v60 = vrot.slane %v4418_v22, %v7427_v30  ;;  %v6046_v12 = vpop.eup %6045  ;;  %v8405_v11 = vld [vmem:[#allocation36_spill] sm:$0xff] (%p3564_p13) }
 0x500   : >> { %v6048_v3 = vpop.eup %6047  ;;  %v4463_v9 = vmul.f32 %v6391_v7, %v6046_v12 }
 0x501   : >> { %v4433_v13 = vcombine.low %v4425_v5, %v4432_v60 }
 0x503   : >> { %v4437_v21 = vadd.f32 %v4433_v13, %v3574_v8 }
 0x505   : >> { %6049 = vtanh.f32 %v4437_v21  ;;  %v4455_v15 = vrot.slane %v4437_v21, 4 }
 0x507   : >> { %v5676_v0 = vmul.f32 -1.442695, %v4455_v15 }
 0x509   : >> { %6051 = vpow2.f32 %v5676_v0 }
 0x50f   : >> { %v6050_v4 = vpop.eup %6049 }
 0x510   : >> { %v4464_v31 = vmul.f32 %v6050_v4, %v6048_v3 }
 0x512   : >> { %v4465_v7 = vadd.f32 %v4464_v31, %v4463_v9  }
 0x513   : >> { %v6052_v16 = vpop.eup %6051 }
 0x514   : >> { %v4460_v30 = vadd.f32 1.0, %v6052_v16  ;;  %6053 = vtanh.f32 %v4465_v7 }
 0x516   : >> { %6055 = vrcp.f32 %v4460_v30 }
 0x51d   : > { %3566 = sbr.rel (!%p3564_p13) target bundleno = 934 (0x3a6), region = 168 }
 0x51e   : >> { %v6054_v14 = vpop.eup %6053 }
 0x520   : >> { %v6056_v10 = vpop.eup %6055 }
 0x521   : >> { %v4467_v21 = vmul.f32 %v6056_v10, %v6054_v14  }
 0x523   : >> { %4471 = vst [vmem:[%s4470_s26] sm:$0xf] %v4467_v21 }
 0x52a   : > { %v4472_v15 = vld [vmem:[#allocation3] ss:$2 sm:$0x3]  ;;  %v4474_v22 = vld [vmem:[#allocation3 + $0x4] ss:$2 sm:$0x3] }
 0x52b   : > { %v4476_v1 = vld [vmem:[#allocation3 + $0x8] ss:$2 sm:$0x3]  ;;  %v4478_v2 = vld [vmem:[#allocation3 + $0xc] ss:$2 sm:$0x3]  ;;  %v4498_v5 = vrot.slane %v4472_v15, %v8405_v11  ;;  %v4506_v60 = vrot.slane %v4474_v22, %v8405_v11  ;;  %v7677_v8 = vrot.slane %v4472_v15, %v8406_v6  ;;  %v7680_v13 = vrot.slane %v4474_v22, %v8406_v6 }
 0x52c   : > { %v4480_v0 = vld [vmem:[#allocation3 + $0x10] ss:$2 sm:$0x3]  ;;  %v4482_v12 = vld [vmem:[#allocation3 + $0x14] ss:$2 sm:$0x3]  ;;  %v4514_v21 = vrot.slane %v4476_v1, %v8405_v11  ;;  %v4522_v3 = vrot.slane %v4478_v2, %v8405_v11  ;;  %v7685_v53 = vrot.slane %v4476_v1, %v8406_v6  ;;  %v7688_v61 = vrot.slane %v4478_v2, %v8406_v6 }
 0x52d   : > { %v4484_v26 = vld [vmem:[#allocation3 + $0x18] ss:$2 sm:$0x3]  ;;  %v4486_v27 = vld [vmem:[#allocation3 + $0x1c] ss:$2 sm:$0x3]  ;;  %v4530_v58 = vrot.slane %v4480_v0, %v8405_v11  ;;  %v4538_v29 = vrot.slane %v4482_v12, %v8405_v11  ;;  %v4575_v33 = vpack.c.bf16 %v4498_v5, %v4498_v5  ;;  %v4577_v28 = vpack.c.bf16 %v4506_v60, %v4506_v60 }
 0x52e   : > { %v4546_v38 = vrot.slane %v4484_v26, %v8405_v11  ;;  %v4554_v39 = vrot.slane %v4486_v27, %v8405_v11  ;;  %v4579_v46 = vpack.c.bf16 %v4514_v21, %v4514_v21  ;;  %v4581_v48 = vpack.c.bf16 %v4522_v3, %v4522_v3  ;;  %v7713_v10 = vld [vmem:[#allocation3 + $0x1] ss:$2 sm:$0x3]  ;;  %v7715_v15 = vld [vmem:[#allocation3 + $0x5] ss:$2 sm:$0x3] }
 0x52f   : > { %v4583_v62 = vpack.c.bf16 %v4530_v58, %v4530_v58  ;;  %v4585_v63 = vpack.c.bf16 %v4538_v29, %v4538_v29  ;;  %v4607_v50 = vunpack.c.l.b16 %v4575_v33  ;;  %v4609_v51 = vunpack.c.l.b16 %v4577_v28  ;;  %v7717_v60 = vld [vmem:[#allocation3 + $0x9] ss:$2 sm:$0x3]  ;;  %v4679_v29 = vld [vmem:[#allocation3 + $0x1d] ss:$2 sm:$0x3] }
 0x530   : > { %v4587_v52 = vpack.c.bf16 %v4546_v38, %v4546_v38  ;;  %v4589_v56 = vpack.c.bf16 %v4554_v39, %v4554_v39  ;;  %v4611_v18 = vunpack.c.l.b16 %v4579_v46  ;;  %v4613_v41 = vunpack.c.l.b16 %v4581_v48 }
 0x531   : > { %v4615_v47 = vunpack.c.l.b16 %v4583_v62  ;;  %v4617_v7 = vunpack.c.l.b16 %v4585_v63  ;;  %v4623_v24 = vrot.slane %v4609_v51, 7  ;;  %v4534_v32 = vrot.slane %v4480_v0, %v8406_v6 }
 0x532   : > { %v4619_v43 = vunpack.c.l.b16 %v4587_v52  ;;  %v4621_v42 = vunpack.c.l.b16 %v4589_v56  ;;  %v4626_v57 = vrot.slane %v4611_v18, 6  ;;  %v4629_v17 = vrot.slane %v4613_v41, 5 }
 0x533   : > { %v4625_v36 = vsel %vm4624_vm7, %v4623_v24, %v4607_v50  ;;  %v4632_v40 = vrot.slane %v4615_v47, 4  ;;  %v4635_v20 = vrot.slane %v4617_v7, 3  ;;  %v4542_v23 = vrot.slane %v4482_v12, %v8406_v6 }
 0x534   : > { %v4628_v25 = vsel %vm4627_vm8, %v4626_v57, %v4625_v36  ;;  %v4638_v19 = vrot.slane %v4619_v43, 2  ;;  %v4641_v49 = vrot.slane %v4621_v42, 1  ;;  %v4550_v59 = vrot.slane %v4484_v26, %v8406_v6 }
 0x535   : > { %v4631_v44 = vsel %vm4630_vm9, %v4629_v17, %v4628_v25  ;;  %v4558_v34 = vrot.slane %v4486_v27, %v8406_v6  ;;  %v4576_v45 = vpack.c.bf16 %v7677_v8, %v7677_v8  ;;  %v4578_v54 = vpack.c.bf16 %v7680_v13, %v7680_v13  ;;  %v7719_v8 = vld [vmem:[#allocation3 + $0xd] ss:$2 sm:$0x3]  ;;  %v7721_v13 = vld [vmem:[#allocation3 + $0x11] ss:$2 sm:$0x3] }
 0x536   : > { %v4634_v37 = vsel %vm4633_vm10, %v4632_v40, %v4631_v44  ;;  %v4580_v4 = vpack.c.bf16 %v7685_v53, %v7685_v53  ;;  %v4582_v9 = vpack.c.bf16 %v7688_v61, %v7688_v61  ;;  %v4584_v16 = vpack.c.bf16 %v4534_v32, %v4534_v32  ;;  %v4675_v53 = vld [vmem:[#allocation3 + $0x15] ss:$2 sm:$0x3]  ;;  %v4677_v61 = vld [vmem:[#allocation3 + $0x19] ss:$2 sm:$0x3] }
 0x537   : > { %v4637_v55 = vsel %vm4636_vm11, %v4635_v20, %v4634_v37  ;;  %v4586_v30 = vpack.c.bf16 %v4542_v23, %v4542_v23  ;;  %v4588_v14 = vpack.c.bf16 %v4550_v59, %v4550_v59  ;;  %v4590_v1 = vpack.c.bf16 %v4558_v34, %v4558_v34 }
 0x538   : > { %v4640_v35 = vsel %vm4639_vm12, %v4638_v19, %v4637_v55  ;;  %v4608_v2 = vunpack.c.l.b16 %v4576_v45  ;;  %v4610_v5 = vunpack.c.l.b16 %v4578_v54  ;;  %v4612_v0 = vunpack.c.l.b16 %v4580_v4 }
 0x539   : > { %v4643_v31 = vsel %vm4642_vm13, %v4641_v49, %v4640_v35  ;;  %v4614_v12 = vunpack.c.l.b16 %v4582_v9  ;;  %v4616_v21 = vunpack.c.l.b16 %v4584_v16  ;;  %v4618_v3 = vunpack.c.l.b16 %v4586_v30 }
 0x53a   : > { %v4658_v22 = vpack.c.b16 %v4643_v31, %v4643_v31  ;;  %v4620_v26 = vunpack.c.l.b16 %v4588_v14  ;;  %v4622_v27 = vunpack.c.l.b16 %v4590_v1  ;;  %v4644_v58 = vrot.slane %v4610_v5, 7 }
 0x53b   : > { %v4691_v33 = vrot.slane %v7713_v10, %v8405_v11  ;;  %v4646_v28 = vrot.slane %v4612_v0, 6  ;;  %v4648_v38 = vrot.slane %v4614_v12, 5  ;;  %v4650_v39 = vrot.slane %v4616_v21, 4 }
 0x53c   : > { %4662 = vst [vmem:[#allocation4] sm:$0xf] %v4658_v22  ;;  %v4652_v46 = vrot.slane %v4618_v3, 3  ;;  %v4645_v48 = vsel %vm4624_vm7, %v4644_v58, %v4608_v2  ;;  %v4654_v62 = vrot.slane %v4620_v26, 2  ;;  %v4656_v63 = vrot.slane %v4622_v27, 1 }
 0x53d   : > { %v4699_v50 = vrot.slane %v7715_v15, %v8405_v11  ;;  %v4647_v51 = vsel %vm4627_vm8, %v4646_v28, %v4645_v48  ;;  %v4707_v52 = vrot.slane %v7717_v60, %v8405_v11  ;;  %v4715_v56 = vrot.slane %v7719_v8, %v8405_v11 }
 0x53e   : > { %v4723_v18 = vrot.slane %v7721_v13, %v8405_v11  ;;  %v4649_v41 = vsel %vm4630_vm9, %v4648_v38, %v4647_v51  ;;  %v4731_v47 = vrot.slane %v4675_v53, %v8405_v11  ;;  %v4739_v7 = vrot.slane %v4677_v61, %v8405_v11 }
 0x53f   : > { %v4747_v24 = vrot.slane %v4679_v29, %v8405_v11  ;;  %v4651_v43 = vsel %vm4633_vm10, %v4650_v39, %v4649_v41  ;;  %v4768_v42 = vpack.c.bf16 %v4691_v33, %v4691_v33  ;;  %v4770_v57 = vpack.c.bf16 %v4699_v50, %v4699_v50 }
 0x540   : > { %v4772_v36 = vpack.c.bf16 %v4707_v52, %v4707_v52  ;;  %v4653_v17 = vsel %vm4636_vm11, %v4652_v46, %v4651_v43  ;;  %v4774_v40 = vpack.c.bf16 %v4715_v56, %v4715_v56  ;;  %v4776_v25 = vpack.c.bf16 %v4723_v18, %v4723_v18 }
 0x541   : > { %v4778_v20 = vpack.c.bf16 %v4731_v47, %v4731_v47  ;;  %v4655_v44 = vsel %vm4639_vm12, %v4654_v62, %v4653_v17  ;;  %v4780_v19 = vpack.c.bf16 %v4739_v7, %v4739_v7  ;;  %v4782_v49 = vpack.c.bf16 %v4747_v24, %v4747_v24 }
 0x542   : > { %v4800_v37 = vunpack.c.l.b16 %v4768_v42  ;;  %v4657_v32 = vsel %vm4642_vm13, %v4656_v63, %v4655_v44  ;;  %v4802_v23 = vunpack.c.l.b16 %v4770_v57  ;;  %v4804_v55 = vunpack.c.l.b16 %v4772_v36 }
 0x543   : > { %v4806_v11 = vunpack.c.l.b16 %v4774_v40  ;;  %v4659_v59 = vpack.c.b16 %v4657_v32, %v4657_v32  ;;  %v4808_v34 = vunpack.c.l.b16 %v4776_v25  ;;  %v4810_v45 = vunpack.c.l.b16 %v4778_v20 }
 0x544   : > { %v4812_v35 = vunpack.c.l.b16 %v4780_v19  ;;  %v4814_v54 = vunpack.c.l.b16 %v4782_v49  ;;  %v4816_v4 = vrot.slane %v4802_v23, 7  ;;  %v4818_v9 = vrot.slane %v4804_v55, 6 }
 0x545   : > { %v4820_v31 = vrot.slane %v4806_v11, 5  ;;  %4663 = vst [vmem:[#allocation4 + $0x8] sm:$0xf] %v4659_v59  ;;  %v4822_v16 = vrot.slane %v4808_v34, 4  ;;  %v4824_v30 = vrot.slane %v4810_v45, 3  ;;  %v4695_v22 = vrot.slane %v7713_v10, %v8406_v6 }
 0x546   : > { %v4826_v14 = vrot.slane %v4812_v35, 2  ;;  %v4817_v1 = vsel %vm4624_vm7, %v4816_v4, %v4800_v37  ;;  %v4828_v2 = vrot.slane %v4814_v54, 1  ;;  %v4703_v5 = vrot.slane %v7715_v15, %v8406_v6 }
 0x547   : > { %v4711_v0 = vrot.slane %v7717_v60, %v8406_v6  ;;  %v4819_v12 = vsel %vm4627_vm8, %v4818_v9, %v4817_v1  ;;  %v4719_v21 = vrot.slane %v7719_v8, %v8406_v6  ;;  %v4727_v3 = vrot.slane %v7721_v13, %v8406_v6 }
 0x548   : > { %v4735_v26 = vrot.slane %v4675_v53, %v8406_v6  ;;  %v4821_v10 = vsel %vm4630_vm9, %v4820_v31, %v4819_v12  ;;  %v4743_v27 = vrot.slane %v4677_v61, %v8406_v6  ;;  %v4751_v58 = vrot.slane %v4679_v29, %v8406_v6 }
 0x549   : > { %v4769_v15 = vpack.c.bf16 %v4695_v22, %v4695_v22  ;;  %v4823_v33 = vsel %vm4633_vm10, %v4822_v16, %v4821_v10  ;;  %v4771_v60 = vpack.c.bf16 %v4703_v5, %v4703_v5  ;;  %v4773_v28 = vpack.c.bf16 %v4711_v0, %v4711_v0 }
 0x54a   : > { %v4775_v38 = vpack.c.bf16 %v4719_v21, %v4719_v21  ;;  %v4825_v39 = vsel %vm4636_vm11, %v4824_v30, %v4823_v33  ;;  %v4777_v8 = vpack.c.bf16 %v4727_v3, %v4727_v3  ;;  %v4779_v46 = vpack.c.bf16 %v4735_v26, %v4735_v26 }
 0x54b   : > { %v4781_v48 = vpack.c.bf16 %v4743_v27, %v4743_v27  ;;  %v4827_v13 = vsel %vm4639_vm12, %v4826_v14, %v4825_v39  ;;  %v4783_v53 = vpack.c.bf16 %v4751_v58, %v4751_v58  ;;  %v4801_v62 = vunpack.c.l.b16 %v4769_v15 }
 0x54c   : > { %v4803_v63 = vunpack.c.l.b16 %v4771_v60  ;;  %v4829_v61 = vsel %vm4642_vm13, %v4828_v2, %v4827_v13  ;;  %v4805_v50 = vunpack.c.l.b16 %v4773_v28  ;;  %v4807_v6 = vunpack.c.l.b16 %v4775_v38 }
 0x54d   : > { %v4809_v29 = vunpack.c.l.b16 %v4777_v8  ;;  %v4844_v51 = vpack.c.b16 %v4829_v61, %v4829_v61  ;;  %v4811_v52 = vunpack.c.l.b16 %v4779_v46  ;;  %v4813_v56 = vunpack.c.l.b16 %v4781_v48 }
 0x54e   : > { %v4815_v18 = vunpack.c.l.b16 %v4783_v53  ;;  %v4830_v41 = vrot.slane %v4803_v63, 7  ;;  %v4832_v47 = vrot.slane %v4805_v50, 6  ;;  %v4834_v7 = vrot.slane %v4807_v6, 5 }
 0x54f   : > { %4848 = vst [vmem:[#allocation4] sm:$0xf0] %v4844_v51  ;;  %v4836_v24 = vrot.slane %v4809_v29, 4  ;;  %v4838_v42 = vrot.slane %v4811_v52, 3  ;;  %v4840_v36 = vrot.slane %v4813_v56, 2 }
 0x550   : > { %v4831_v43 = vsel %vm4624_vm7, %v4830_v41, %v4801_v62  ;;  %v4842_v40 = vrot.slane %v4815_v18, 1 }
 0x551   : > { %v4833_v57 = vsel %vm4627_vm8, %v4832_v47, %v4831_v43 }
 0x552   : > { %v4835_v17 = vsel %vm4630_vm9, %v4834_v7, %v4833_v57 }
 0x553   : > { %v4837_v25 = vsel %vm4633_vm10, %v4836_v24, %v4835_v17 }
 0x554   : > { %v4839_v20 = vsel %vm4636_vm11, %v4838_v42, %v4837_v25 }
 0x555   : > { %v4841_v44 = vsel %vm4639_vm12, %v4840_v36, %v4839_v20 }
 0x556   : > { %v4843_v19 = vsel %vm4642_vm13, %v4842_v40, %v4841_v44 }
 0x557   : > { %v4845_v49 = vpack.c.b16 %v4843_v19, %v4843_v19 }
 0x559   : > { %4849 = vst [vmem:[#allocation4 + $0x8] sm:$0xf0] %v4845_v49 }
 0x55a PF: > { %v6057_v37 = vld [vmem:[%s6791_s28 + $0x40] sm:$0xff]   ;;  %v6059_v23 = vld [vmem:[%s6791_s28 + $0x48] sm:$0xff]   ;;  %v6061_v11 = vld [vmem:[%s6791_s28 + $0x50] sm:$0xff]   ;;  %s8407_s8 = sld [smem:[#allocation25_spill]]  ;;  %s8408_s24 = sld [smem:[#allocation24_spill]] }
 0x55b   : > { %v6058_v32 = vld [vmem:[%s6791_s28] sm:$0xff]   ;;  %5715 = vmatprep.subr.bf16.mxu0 %v6057_v37  ;;  %v6060_v55 = vld [vmem:[%s6791_s28 + $0x8] sm:$0xff]   ;;  %v6062_v59 = vld [vmem:[%s6791_s28 + $0x10] sm:$0xff]   ;;  %s8410_s7 = sld [smem:[#allocation29_spill]]  ;;  %s5054_s11 = sshll.u32 %s428_s20, 4  ;;  %s7800_s11 = int_to_ptr.vmem [resolvable:$true] %s5054_s11 }
 0x55c   : > { %5716 = vmatpush3.bf16.msra.mxu0 %v6058_v32  ;;  %v6063_v34 = vld [vmem:[%s6791_s28 + $0x58] sm:$0xff]   ;;  %v6065_v35 = vld [vmem:[%s6791_s28 + $0x60] sm:$0xff]   ;;  %v6067_v4 = vld [vmem:[%s6791_s28 + $0x68] sm:$0xff]   ;;  %s8412_s25 = sld [smem:[#allocation150_spill]]  ;;  %s7806_s1 = scalar_lea.sflag [#allocation7], %s426_s22 }
 0x55d   : > { %5717 = vmatprep.subr.bf16.mxu0 %v6059_v23  ;;  %v6064_v45 = vld [vmem:[%s6791_s28 + $0x18] sm:$0xff]   ;;  %v6066_v54 = vld [vmem:[%s6791_s28 + $0x20] sm:$0xff]   ;;  %v6068_v31 = vld [vmem:[%s6791_s28 + $0x28] sm:$0xff]   ;;  %s6416_s30 = smov [#allocation14]  }
 0x55e   : > { %v6069_v16 = vld [vmem:[%s6791_s28 + $0x70] sm:$0xff]   ;;  %v6071_v14 = vld [vmem:[%s6791_s28 + $0x78] sm:$0xff]   ;;  %v4850_v1 = vld [vmem:[#allocation4] sm:$0xff]  ;;  %s6221_s26 = sshll.u32 %s6416_s30, 4  ;;  %s6222_s26 = int_to_ptr.vmem [resolvable:$false] %s6221_s26 }
 0x55f   : > { %v6070_v30 = vld [vmem:[%s6791_s28 + $0x30] sm:$0xff]   ;;  %v6072_v22 = vld [vmem:[%s6791_s28 + $0x38] sm:$0xff]   ;;  %v5679_v21 = vld [vmem:[%s432_s17] ss:$0 sm:$0xff]  ;;  %s6217_s17 = scalar_lea.vmem %s7800_s11, 128  ;;  %p6224_p6 = scmp.lt.s32.totalorder %s7800_s11, %s6222_s26 }
 0x560   : > { %5718 = vmatpush3.bf16.msra.mxu0 %v6060_v55  ;;  %v4851_v9 = vld [vmem:[#allocation4 + $0x8] sm:$0xff]  ;;  %s5709_s21 = sshll.u32 %s8407_s8, 2  ;;  %p6218_p2 = scmp.ne.s32.totalorder %s7800_s11, %s6217_s17 }
 0x561   : > { %5719 = vmatprep.subr.bf16.mxu0 %v6061_v11  ;;  %5019 = vmatprep.mubr.bf16.mxu0 %v4851_v9  ;;  %s5051_s23 = sadd.s32 %s8408_s24, %s5709_s21  ;;  %p8413_p5 = scmp.ne.s32.totalorder %s8410_s7, 0 }
 0x562   : > { %s5701_s28 = sshll.u32 %s5051_s23, 6  ;;  %s6223_s8 = scalar_lea.vmem %s6222_s26, 256 }
 0x563   : > { %s7798_s27 = scalar_lea.hbm %s8412_s25, %s5701_s28  ;;  %p6219_p7 = pnand %p6218_p2, %p8413_p5 }
 0x564   : > { %5720 = vmatpush3.bf16.msra.mxu0 %v6062_v59  ;;  %p6225_p3 = scmp.lt.s32.totalorder %s6223_s8, %s6217_s17 }
 0x565   : > { %5721 = vmatprep.subr.bf16.mxu0 %v6063_v34  ;;  %p6220_p9 = pneg %p6219_p7 }
 0x566   : > { %p6226_p8 = por %p6225_p3, %p6224_p6 }
 0x568   : > { %5722 = vmatpush3.bf16.msra.mxu0 %v6064_v45  ;;  %p6227_p11 = pnand %p6226_p8, %p6220_p9 }
 0x569   : > { %5723 = vmatprep.subr.bf16.mxu0 %v6065_v35 }
 0x56c   : > { %5724 = vmatpush3.bf16.msra.mxu0 %v6066_v54 }
 0x56d   : > { %5725 = vmatprep.subr.bf16.mxu0 %v6067_v4 }
 0x570   : > { %5726 = vmatpush3.bf16.msra.mxu0 %v6068_v31 }
 0x571   : > { %5727 = vmatprep.subr.bf16.mxu0 %v6069_v16 }
 0x574   : > { %5728 = vmatpush3.bf16.msra.mxu0 %v6070_v30 }
 0x575   : > { %5729 = vmatprep.subr.bf16.mxu0 %v6071_v14 }
 0x578   : > { %5730 = vmatpush3.bf16.msra.mxu0 %v6072_v22 }
 0x57b   : > { %5020 = vmatmul.mubr.bf16.vlgmr.msra.gmra.mrb[0].mxu0 %v4850_v1 }
 0x64e   : > { %v5731_v2 = vpop.f32.mrb[0].mxu0 }
 0x64f   : > { %v5732_v5 = vpop.f32.mrb[1].mxu0 }
 0x650   : > { %v5733_v0 = vadd.f32 %v5732_v5, %v5731_v2  ;;  %v5734_v12 = vpop.f32.mrb[2].mxu0 }
 0x651   : > { %v5735_v3 = vpop.f32.mrb[3].mxu0 }
 0x652   : > { %v5736_v26 = vadd.f32 %v5735_v3, %v5734_v12  ;;  %v5022_v10 = vadd.f32 %v5733_v0, %v5679_v21 }
 0x654   : > { %v5025_v27 = vadd.f32 %v5736_v26, %v5679_v21 }
 0x656   : > { %v5713_v58 = vpack.c.bf16 %v5025_v27, %v5022_v10 }
 0x658   : > { %5714 = vst [vmem:[%s428_s20] sm:$0xff] %v5713_v58  }
 0x659   : > { %6230 = shalt.err (!%p6227_p11)
}
 0x65a   : > { %s6231_s22 = scalar_lea.hbm %s7798_s27, 128  ;;  %s6235_s24 = scalar_lea.hbm %s8412_s25, 512 }
 0x65b   : > { %p6232_p1 = scmp.ne.s32.totalorder %s7798_s27, %s6231_s22  ;;  %p6236_p12 = scmp.lt.u32.totalorder %s7798_s27, %s8412_s25 }
 0x65c   : > { %p6237_p0 = scmp.lt.u32.totalorder %s6235_s24, %s6231_s22  ;;  %p6239_p2 = scmp.lt.u32.totalorder %s6231_s22, %s7798_s27 }
 0x65d   : > { %p6233_p4 = pnand %p6232_p1, %p8413_p5 }
 0x65e   : > { %p6238_p13 = por %p6237_p0, %p6236_p12 }
 0x65f   : > { %p6234_p10 = pneg %p6233_p4 }
 0x660   : > { %p6240_p7 = por %p6239_p2, %p6238_p13 }
 0x662   : > { %p6241_p9 = pnand %p6240_p7, %p6234_p10 }
 0x664   : > { %6244 = shalt.err (!%p6241_p9)
}
 0x665   : > { %s6417_s23 = smov 64   ;;  %s6418_s13 = smov 128  }
 0x666   : > { %s6419_s9 = smov 4  }
 0x667   : > { %5785 = dma.vmem_to_hbm [thread:$0]  (%p8413_p5), %s7800_s11, 128, %s7798_s27, %s7806_s1, %s6417_s23, %s6418_s13, %s6419_s9  }
 0x668 PF: > { %s8414_s5 = sld [smem:[#allocation20_spill]]  ;;  %s8415_s28 = sld [smem:[#allocation30_spill]] }
 0x669   : > { %p5815_p6 = scmp.ge.s32.totalorder %s6387_s18, 2 }
 0x66e   : > { %s5069_s0 = sand.u32 1, %s8414_s5   ;;  %p8416_p3 = scmp.ne.s32.totalorder %s8415_s28, 0 }
 0x66f   : > { %s5070_s2 = scalar_lea.sflag [#allocation7], %s5069_s0 }
 0x670   : > { %p5805_p8 = pnand %p5815_p6, %p8416_p3 }
 0x672   : > { %6330 = dma.done.wait (!%p5805_p8), %s5070_s2, 128  }
 0x673   : > { %6332 = vsyncadd (!%p5805_p8), %s5070_s2, 4294967168  ;;  %s26_s18 = sadd.s32 1, %s6387_s18   ;;  %s8418_s27 = sld [smem:[#allocation21_spill]] }
 0x674   : > { %p7835_p11 = scmp.ge.s32.totalorder %s26_s18, 6   ;;  %s8419_s30 = sld [smem:[#allocation22_spill]] }
 0x675   : > { %s8420_s7 = sld [smem:[#allocation33_spill]]  ;;  %s8421_s1 = sld [smem:[#allocation23_spill]] }
 0x676   : > { %s8422_s13 = sld [smem:[#allocation34_spill]]  ;;  %s8423_s15 = sld [smem:[#allocation26_spill]] }
 0x677   : > { %s8424_s26 = sld [smem:[#allocation31_spill]]  ;;  %s8425_s8 = sld [smem:[#allocation32_spill]] }
 0x678   : > { %s8427_s28 = smov %s6343_s29  ;;  %s8428_s29 = smov %s6638_s14 }
 0x679   : > { %s8429_s9 = smov %s6355_s10  ;;  %s8431_s11 = smov %s6363_s12 }
 0x67a   : > { %s8433_s14 = smov %s6379_s16  ;;  %25 = sbr.rel (!%p7835_p11) target bundleno = 19 (0x13), region = 179 }
 0x67b   : > { %s8430_s10 = smov %s8420_s7  ;;  %s8432_s12 = smov %s8421_s1 }
 0x67d   : > { %s8434_s16 = smov %s8424_s26  ;;  %s8435_s17 = smov %s8425_s8 }
 0x681   :  { %5075 = vsyncpa [#allocation6], 1 }
 0x682   :  { %5077 = vsyncpa [#allocation6 + $0x1], 1 }
 0x683   :  { %5078 = vsyncpa [#allocation9], 1 }
 0x684   :  { %5079 = vsyncpa [#allocation12], 1 }
 0x685   :  { %5080 = vsyncpa [#allocation7], 1 }
 0x686   :  { %5082 = vsyncpa [#allocation7 + $0x1], 1 }

</bundles_post_ra>
